<compile_context>
chip_gen: v7x
topology: tpu7x:2x2x1
jax: 0.10.0
libtpu: 0.0.40
codegen_flags: <defaults>
</compile_context>

<pallas_src>
import functools
import numpy as np

import jax
import jax.numpy as jnp
from jax.experimental import pallas as pl
from jax.experimental.pallas import tpu as pltpu

# ----------------------------- configuration -------------------------------
PATCH = (2, 2)
EMBED_DIM = 32
DEPTHS = (2, 1)
NUM_HEADS = (2, 4)
WINDOW = (4, 4)
MLP_RATIO = 4.0
LN_EPS = 1e-5
MXU_DTYPE = jnp.bfloat16          # matmul operand dtype (f32 accumulation)
ACT_DTYPE = jnp.bfloat16          # inter-kernel activation dtype
NEG_INF = -1e9                    # excludes cross-window pairs from softmax
_GELU_C = 0.7978845608028654      # sqrt(2/pi)


# ------------------------------ small helpers --------------------------------
def _parallel_params(ndim=1):
    return pltpu.CompilerParams(dimension_semantics=("parallel",) * ndim)


def _row_block(M, target=2048):
    """Largest multiple-of-8 divisor of M that keeps >=2 grid steps and <= target rows."""
    cap = min(target, M // 2)
    best = None
    b = 8
    while b <= cap:
        if M % b == 0:
            best = b
        b += 8
    return best if best is not None else M


def _ln(x, gamma, beta, eps):
    mean = jnp.mean(x, axis=-1, keepdims=True)
    xc = x - mean
    var = jnp.mean(xc * xc, axis=-1, keepdims=True)
    return xc * jax.lax.rsqrt(var + eps) * gamma + beta


def _gelu_tanh(x):
    # TODO(synk): PyTorch nn.GELU defaults to exact erf; the tanh approximation is used
    # because erf lowering in Mosaic is not guaranteed.
    return 0.5 * x * (1.0 + jnp.tanh(_GELU_C * (x + 0.044715 * x * x * x)))


# ------------------------------ Pallas kernels ------------------------------
def _patch_embed_kernel(x_ref, w_ref, b_ref, g_ref, bb_ref, o_ref, *, eps):
    x = x_ref[...].astype(jnp.float32)
    h = jnp.dot(x.astype(w_ref.dtype), w_ref[...],
                preferred_element_type=jnp.float32) + b_ref[...]
    o_ref[...] = _ln(h, g_ref[...], bb_ref[...], eps).astype(o_ref.dtype)


def patch_embed(xp, p):
    M, K = xp.shape
    N = p["conv_wt"].shape[1]
    bm = _row_block(M)
    return pl.pallas_call(
        functools.partial(_patch_embed_kernel, eps=LN_EPS),
        out_shape=jax.ShapeDtypeStruct((M, N), ACT_DTYPE),
        grid=(M // bm,),
        in_specs=[
            pl.BlockSpec((bm, K), lambda i: (i, 0)),
            pl.BlockSpec((K, N), lambda i: (0, 0)),
            pl.BlockSpec((1, N), lambda i: (0, 0)),
            pl.BlockSpec((1, N), lambda i: (0, 0)),
            pl.BlockSpec((1, N), lambda i: (0, 0)),
        ],
        out_specs=pl.BlockSpec((bm, N), lambda i: (i, 0)),
        compiler_params=_parallel_params(),
    )(xp, p["conv_wt"], p["conv_b"].reshape(1, N),
      p["pe_ln_g"].reshape(1, N), p["pe_ln_b"].reshape(1, N))


def _swin_block_kernel(x_ref, vm_ref, g1_ref, b1_ref, qkvw_ref, qkvb_ref,
                       projw_ref, projb_ref, bias_ref, g2_ref, b2_ref,
                       w1_ref, bm1_ref, w2_ref, bm2_ref, o_ref,
                       *, heads, C, Dh, scale, eps):
    """Full Swin block on one image's (T, C) token slab (original spatial order)."""
    x = x_ref[...].astype(jnp.float32)                              # (T, C)
    # --- LN1; padded rows zeroed after the norm (== torchvision pad-after-norm1) ---
    xn = _ln(x, g1_ref[...], b1_ref[...], eps) * vm_ref[...]
    # --- QKV projection (single MXU matmul, bf16 operands, f32 accumulation) ---
    qkv = jnp.dot(xn.astype(qkvw_ref.dtype), qkvw_ref[...],
                  preferred_element_type=jnp.float32) + qkvb_ref[...]    # (T, 3C)
    qkv = qkv.astype(MXU_DTYPE)

    outs = []
    for h in range(heads):                                          # 2 / 4 heads, static
        q = qkv[:, h * Dh:(h + 1) * Dh]
        k = qkv[:, C + h * Dh:C + (h + 1) * Dh]
        v = qkv[:, 2 * C + h * Dh:2 * C + (h + 1) * Dh]
        s = jax.lax.dot_general(q, k, (((1,), (1,)), ((), ())),
                                preferred_element_type=jnp.float32)       # (T, T)
        # bias already encodes rel-pos bias + shift mask + cross-window -inf
        s = s * scale + bias_ref[h]
        s = s - jnp.max(s, axis=-1, keepdims=True)
        p = jnp.exp(s)
        p = p / jnp.sum(p, axis=-1, keepdims=True)
        outs.append(jnp.dot(p.astype(MXU_DTYPE), v,
                            preferred_element_type=jnp.float32))          # (T, Dh)

    o = jnp.concatenate(outs, axis=-1)                                    # (T, C)
    y = jnp.dot(o.astype(projw_ref.dtype), projw_ref[...],
                preferred_element_type=jnp.float32) + projb_ref[...]      # single proj
    x = x + y                                                             # residual 1

    # --- LN2 + MLP + residual 2 ---
    h1 = _ln(x, g2_ref[...], b2_ref[...], eps)
    h1 = jnp.dot(h1.astype(w1_ref.dtype), w1_ref[...],
                 preferred_element_type=jnp.float32) + bm1_ref[...]
    h1 = _gelu_tanh(h1)
    y2 = jnp.dot(h1.astype(w2_ref.dtype), w2_ref[...],
                 preferred_element_type=jnp.float32) + bm2_ref[...]
    o_ref[...] = (x + y2).astype(o_ref.dtype)


@functools.lru_cache(maxsize=None)
def _dense_attn_layout(pad_H, pad_W, wh, ww, sh, sw):
    """Static (numpy) same-window mask, rel-pos index and shift penalty over all tokens."""
    gh, gw = np.meshgrid(np.arange(pad_H), np.arange(pad_W), indexing="ij")
    gh = gh.reshape(-1)
    gw = gw.reshape(-1)
    rh = (gh - sh) % pad_H                 # coordinate of each original token in the rolled grid
    rw = (gw - sw) % pad_W
    win = (rh // wh) * (pad_W // ww) + (rw // ww)
    same = win[:, None] == win[None, :]
    in_r = rh % wh
    in_c = rw % ww
    rel = (in_r[:, None] - in_r[None, :] + wh - 1) * (2 * ww - 1) \
        + (in_c[:, None] - in_c[None, :] + ww - 1)
    rel = np.where(same, rel, 0).astype(np.int32)

    T = pad_H * pad_W
    pen = np.zeros((T, T), np.float32)
    if sh + sw > 0:
        region = np.zeros((pad_H, pad_W), np.float32)
        cnt = 0
        for h0, h1 in ((0, -wh), (-wh, -sh), (-sh, None)):
            for w0, w1 in ((0, -ww), (-ww, -sw), (-sw, None)):
                region[h0:h1, w0:w1] = cnt
                cnt += 1
        reg = region[rh, rw]
        pen = np.where(reg[:, None] != reg[None, :],
                       np.float32(-100.0), np.float32(0.0))
    return same, rel, pen


def _dense_bias(blk, pad_H, pad_W, wh, ww, sh, sw):
    same, rel, pen = _dense_attn_layout(pad_H, pad_W, wh, ww, sh, sw)
    rpb = jnp.transpose(blk["rpb_table"][rel], (2, 0, 1))      # (heads, T, T) gather
    return jnp.where(same[None], rpb + pen[None], NEG_INF).astype(jnp.float32)


def swin_block(x, blk, window_size):
    """One fused pallas_call: LN1 + shifted-window MSA + residual + LN2 + MLP + residual."""
    B, H, W, C = x.shape
    wh, ww = window_size
    sh, sw = blk["shift"]
    pad_b = (wh - H % wh) % wh
    pad_r = (ww - W % ww) % ww
    pad_H, pad_W = H + pad_b, W + pad_r
    if wh >= pad_H:
        sh = 0
    if ww >= pad_W:
        sw = 0

    xp = x
    if pad_b or pad_r:
        xp = jnp.pad(x, ((0, 0), (0, pad_b), (0, pad_r), (0, 0)))

    T = pad_H * pad_W
    heads = blk["heads"]
    Dh = C // heads
    Hd = blk["mlp_w1t"].shape[1]
    bias = _dense_bias(blk, pad_H, pad_W, wh, ww, sh, sw)      # (heads, T, T), trace-time
    valid = np.ones((pad_H, pad_W), np.float32)
    valid[H:, :] = 0.0
    valid[:, W:] = 0.0
    valid = jnp.asarray(valid.reshape(T, 1))
    x2d = xp.reshape(B * T, C)

    kernel = functools.partial(_swin_block_kernel, heads=heads, C=C, Dh=Dh,
                               scale=float(Dh) ** -0.5, eps=LN_EPS)
    y = pl.pallas_call(
        kernel,
        out_shape=jax.ShapeDtypeStruct((B * T, C), ACT_DTYPE),
        grid=(B,),
        in_specs=[
            pl.BlockSpec((T, C), lambda b: (b, 0)),
            pl.BlockSpec((T, 1), lambda b: (0, 0)),
            pl.BlockSpec((1, C), lambda b: (0, 0)),
            pl.BlockSpec((1, C), lambda b: (0, 0)),
            pl.BlockSpec((C, 3 * C), lambda b: (0, 0)),
            pl.BlockSpec((1, 3 * C), lambda b: (0, 0)),
            pl.BlockSpec((C, C), lambda b: (0, 0)),
            pl.BlockSpec((1, C), lambda b: (0, 0)),
            pl.BlockSpec((heads, T, T), lambda b: (0, 0, 0)),   # shared, not tiled per batch
            pl.BlockSpec((1, C), lambda b: (0, 0)),
            pl.BlockSpec((1, C), lambda b: (0, 0)),
            pl.BlockSpec((C, Hd), lambda b: (0, 0)),
            pl.BlockSpec((1, Hd), lambda b: (0, 0)),
            pl.BlockSpec((Hd, C), lambda b: (0, 0)),
            pl.BlockSpec((1, C), lambda b: (0, 0)),
        ],
        out_specs=pl.BlockSpec((T, C), lambda b: (b, 0)),
        compiler_params=_parallel_params(),
    )(x2d, valid,
      blk["norm1_g"].reshape(1, C), blk["norm1_b"].reshape(1, C),
      blk["qkv_wt"], blk["qkv_b"].reshape(1, 3 * C),
      blk["proj_wt"], blk["proj_b"].reshape(1, C),
      bias,
      blk["norm2_g"].reshape(1, C), blk["norm2_b"].reshape(1, C),
      blk["mlp_w1t"], blk["mlp_b1"].reshape(1, Hd),
      blk["mlp_w2t"], blk["mlp_b2"].reshape(1, C))

    y = y.reshape(B, pad_H, pad_W, C)
    if pad_b or pad_r:
        y = y[:, :H, :W, :]
    return y


def _merge_kernel(x_ref, g_ref, b_ref, w_ref, o_ref, *, eps):
    x = x_ref[...].astype(jnp.float32)
    h = _ln(x, g_ref[...], b_ref[...], eps)
    o_ref[...] = jnp.dot(h.astype(w_ref.dtype), w_ref[...],
                         preferred_element_type=jnp.float32).astype(o_ref.dtype)


def patch_merging(x, mp):
    B, H, W, C = x.shape
    x = jnp.pad(x, ((0, 0), (0, H % 2), (0, W % 2), (0, 0)))
    x0 = x[:, 0::2, 0::2, :]
    x1 = x[:, 1::2, 0::2, :]
    x2 = x[:, 0::2, 1::2, :]
    x3 = x[:, 1::2, 1::2, :]
    x = jnp.concatenate([x0, x1, x2, x3], axis=-1)
    Bn, Hn, Wn, C4 = x.shape
    x2d = x.reshape(-1, C4)
    M = x2d.shape[0]
    C2 = mp["red_wt"].shape[1]
    bm = _row_block(M)
    y = pl.pallas_call(
        functools.partial(_merge_kernel, eps=LN_EPS),
        out_shape=jax.ShapeDtypeStruct((M, C2), ACT_DTYPE),
        grid=(M // bm,),
        in_specs=[
            pl.BlockSpec((bm, C4), lambda i: (i, 0)),
            pl.BlockSpec((1, C4), lambda i: (0, 0)),
            pl.BlockSpec((1, C4), lambda i: (0, 0)),
            pl.BlockSpec((C4, C2), lambda i: (0, 0)),
        ],
        out_specs=pl.BlockSpec((bm, C2), lambda i: (i, 0)),
        compiler_params=_parallel_params(),
    )(x2d, mp["norm_g"].reshape(1, C4), mp["norm_b"].reshape(1, C4), mp["red_wt"])
    return y.reshape(Bn, Hn, Wn, C2)


# ------------------------------ forward (glue) --------------------------------
def swin_forward(params, x):
    B, Cin, H, W = x.shape
    ph, pw = PATCH
    Hp, Wp = H // ph, W // pw
    # patch-embed conv (kernel == stride) as patch extraction + fused matmul+LN kernel
    x = x[:, :, :Hp * ph, :Wp * pw]
    xp = x.reshape(B, Cin, Hp, ph, Wp, pw).transpose(0, 2, 4, 1, 3, 5)
    xp = xp.reshape(B * Hp * Wp, Cin * ph * pw)
    K = params["conv_wt"].shape[0]
    if K > xp.shape[1]:
        xp = jnp.pad(xp, ((0, 0), (0, K - xp.shape[1])))      # contraction dim 12 -> 16
    h = patch_embed(xp, params)
    x = h.reshape(B, Hp, Wp, EMBED_DIM)

    feats = []
    layer_idx = 0
    for i_stage in range(len(DEPTHS)):
        for blk in params["blocks"][i_stage]:
            x = swin_block(x, blk, WINDOW)
        if layer_idx in (0, 2, 4, 6):
            feats.append(jnp.transpose(x, (0, 3, 1, 2)).astype(jnp.float32))  # NCHW
        layer_idx += 1
        if i_stage < len(DEPTHS) - 1:
            x = patch_merging(x, params["merges"][i_stage])
            if layer_idx in (0, 2, 4, 6):
                feats.append(jnp.transpose(x, (0, 3, 1, 2)).astype(jnp.float32))
            layer_idx += 1
    return feats


# --------------------------- deterministic init ------------------------------
def init_params(key):
    keys = iter(jax.random.split(key, 64))

    def nrm(shape, std=0.02):
        return jax.random.normal(next(keys), shape, jnp.float32) * std

    ph, pw = PATCH
    wh, ww = WINDOW
    kpatch = 3 * ph * pw
    kpad = 16                                  # pad contraction dim 12 -> 16 at init time
    conv_w = nrm((EMBED_DIM, kpatch))
    conv_wt = jnp.zeros((kpad, EMBED_DIM), jnp.float32).at[:kpatch].set(conv_w.T)

    params = {
        "conv_wt": conv_wt.astype(MXU_DTYPE),
        "conv_b": jnp.zeros((EMBED_DIM,), jnp.float32),
        "pe_ln_g": jnp.ones((EMBED_DIM,), jnp.float32),
        "pe_ln_b": jnp.zeros((EMBED_DIM,), jnp.float32),
        "blocks": [],
        "merges": [],
    }
    for i_stage, depth in enumerate(DEPTHS):
        dim = EMBED_DIM * 2 ** i_stage
        heads = NUM_HEADS[i_stage]
        hidden = int(dim * MLP_RATIO)
        stage = []
        for i_layer in range(depth):
            stage.append(dict(
                norm1_g=jnp.ones((dim,), jnp.float32),
                norm1_b=jnp.zeros((dim,), jnp.float32),
                qkv_wt=jnp.transpose(nrm((3 * dim, dim))).astype(MXU_DTYPE),
                qkv_b=jnp.zeros((3 * dim,), jnp.float32),
                proj_wt=jnp.transpose(nrm((dim, dim))).astype(MXU_DTYPE),
                proj_b=jnp.zeros((dim,), jnp.float32),
                rpb_table=nrm(((2 * wh - 1) * (2 * ww - 1), heads)),
                norm2_g=jnp.ones((dim,), jnp.float32),
                norm2_b=jnp.zeros((dim,), jnp.float32),
                mlp_w1t=jnp.transpose(nrm((hidden, dim))).astype(MXU_DTYPE),
                mlp_b1=jnp.zeros((hidden,), jnp.float32),
                mlp_w2t=jnp.transpose(nrm((dim, hidden))).astype(MXU_DTYPE),
                mlp_b2=jnp.zeros((dim,), jnp.float32),
                shift=(0 if i_layer % 2 == 0 else wh // 2,
                       0 if i_layer % 2 == 0 else ww // 2),
                heads=heads,
            ))
        params["blocks"].append(stage)
        if i_stage < len(DEPTHS) - 1:
            params["merges"].append(dict(
                norm_g=jnp.ones((4 * dim,), jnp.float32),
                norm_b=jnp.zeros((4 * dim,), jnp.float32),
                red_wt=jnp.transpose(nrm((2 * dim, 4 * dim))).astype(MXU_DTYPE),
            ))
    return params


# ----------------------------------- main ------------------------------------
if __name__ == "__main__":
    key = jax.random.PRNGKey(0)
    kp, kx = jax.random.split(key)
    params = init_params(kp)
    x = jax.random.normal(kx, (2, 3, 16, 16), jnp.float32)   # NCHW like PyTorch
    forward = jax.jit(functools.partial(swin_forward, params))
    feats = jax.block_until_ready(forward(x))
    assert feats[0].shape == (2, EMBED_DIM, 8, 8)
    assert feats[1].shape == (2, 2 * EMBED_DIM, 4, 4)
    print("KERNEL_OK")
</pallas_src>

<mosaic_0001>
module attributes {stable_mosaic.version = 11 : i64} {
  func.func @_patch_embed_kernel(%arg0: i32, %arg1: memref<64x16xf32, #tpu.memory_space<vmem>>, %arg2: memref<16x32xbf16, #tpu.memory_space<vmem>>, %arg3: memref<1x32xf32, #tpu.memory_space<vmem>>, %arg4: memref<1x32xf32, #tpu.memory_space<vmem>>, %arg5: memref<1x32xf32, #tpu.memory_space<vmem>>, %arg6: memref<64x32xbf16, #tpu.memory_space<vmem>>) attributes {dimension_semantics = [#tpu.dimension_semantics<parallel>], iteration_bounds = array<i64: 2>, scalar_prefetch = 0 : i64, scratch_operands = 0 : i64, tpu.core_type = #tpu.core_type<tc>, window_params = [{transform_indices = @transform_0, window_bounds = array<i64: 64, 16>}, {pipeline_mode = #tpu.pipeline_mode<synchronous>, transform_indices = @transform_1, window_bounds = array<i64: 16, 32>}, {pipeline_mode = #tpu.pipeline_mode<synchronous>, transform_indices = @transform_2, window_bounds = array<i64: 1, 32>}, {pipeline_mode = #tpu.pipeline_mode<synchronous>, transform_indices = @transform_3, window_bounds = array<i64: 1, 32>}, {pipeline_mode = #tpu.pipeline_mode<synchronous>, transform_indices = @transform_4, window_bounds = array<i64: 1, 32>}, {transform_indices = @transform_5, window_bounds = array<i64: 64, 32>}]} {
    %c0 = arith.constant 0 : index
    %c0_0 = arith.constant 0 : index
    %0 = vector.load %arg1[%c0, %c0_0] : memref<64x16xf32, #tpu.memory_space<vmem>>, vector<64x16xf32>
    %1 = arith.truncf %0 : vector<64x16xf32> to vector<64x16xbf16>
    %c0_1 = arith.constant 0 : index
    %c0_2 = arith.constant 0 : index
    %2 = vector.load %arg2[%c0_1, %c0_2] : memref<16x32xbf16, #tpu.memory_space<vmem>>, vector<16x32xbf16>
    %cst = arith.constant dense<0.000000e+00> : vector<64x32xf32>
    %3 = tpu.matmul %1, %2, %cst {dimension_numbers = #tpu.dot_dimension_numbers<[1], [0], [0], [1], [0, 0, 1, 1], [], []>} : vector<64x16xbf16>, vector<16x32xbf16>, vector<64x32xf32> -> vector<64x32xf32>
    %c0_3 = arith.constant 0 : index
    %c0_4 = arith.constant 0 : index
    %4 = vector.load %arg3[%c0_3, %c0_4] : memref<1x32xf32, #tpu.memory_space<vmem>>, vector<1x32xf32>
    %5 = vector.broadcast %4 : vector<1x32xf32> to vector<64x32xf32>
    %6 = arith.addf %3, %5 : vector<64x32xf32>
    %c0_5 = arith.constant 0 : index
    %c0_6 = arith.constant 0 : index
    %7 = vector.load %arg4[%c0_5, %c0_6] : memref<1x32xf32, #tpu.memory_space<vmem>>, vector<1x32xf32>
    %c0_7 = arith.constant 0 : index
    %c0_8 = arith.constant 0 : index
    %8 = vector.load %arg5[%c0_7, %c0_8] : memref<1x32xf32, #tpu.memory_space<vmem>>, vector<1x32xf32>
    %cst_9 = arith.constant dense<0.000000e+00> : vector<64xf32>
    %9 = vector.multi_reduction <add>, %6, %cst_9 [1] : vector<64x32xf32> to vector<64xf32>
    %10 = vector.shape_cast %9 : vector<64xf32> to vector<64x1xf32>
    %cst_10 = arith.constant 3.200000e+01 : f32
    %11 = vector.broadcast %cst_10 : f32 to vector<64x1xf32>
    %12 = arith.divf %10, %11 : vector<64x1xf32>
    %13 = vector.broadcast %12 : vector<64x1xf32> to vector<64x32xf32>
    %14 = arith.subf %6, %13 : vector<64x32xf32>
    %15 = arith.mulf %14, %14 : vector<64x32xf32>
    %cst_11 = arith.constant dense<0.000000e+00> : vector<64xf32>
    %16 = vector.multi_reduction <add>, %15, %cst_11 [1] : vector<64x32xf32> to vector<64xf32>
    %17 = vector.shape_cast %16 : vector<64xf32> to vector<64x1xf32>
    %cst_12 = arith.constant 3.200000e+01 : f32
    %18 = vector.broadcast %cst_12 : f32 to vector<64x1xf32>
    %19 = arith.divf %17, %18 : vector<64x1xf32>
    %cst_13 = arith.constant 9.99999974E-6 : f32
    %20 = vector.broadcast %cst_13 : f32 to vector<64x1xf32>
    %21 = arith.addf %19, %20 : vector<64x1xf32>
    %22 = math.rsqrt %21 : vector<64x1xf32>
    %23 = vector.broadcast %22 : vector<64x1xf32> to vector<64x32xf32>
    %24 = arith.mulf %14, %23 : vector<64x32xf32>
    %25 = vector.broadcast %7 : vector<1x32xf32> to vector<64x32xf32>
    %26 = arith.mulf %24, %25 : vector<64x32xf32>
    %27 = vector.broadcast %8 : vector<1x32xf32> to vector<64x32xf32>
    %28 = arith.addf %26, %27 : vector<64x32xf32>
    %29 = arith.truncf %28 : vector<64x32xf32> to vector<64x32xbf16>
    %c0_14 = arith.constant 0 : index
    %c0_15 = arith.constant 0 : index
    %30 = vector.load %arg6[%c0_14, %c0_15] : memref<64x32xbf16, #tpu.memory_space<vmem>>, vector<64x32xbf16>
    tpu.vector_store %arg6[%c0_14, %c0_15], %29 {strides = array<i32>} : memref<64x32xbf16, #tpu.memory_space<vmem>>, vector<64x32xbf16>,
    return
  }
  func.func @transform_0(%arg0: i32) -> (i32, i32) {
    %c0_i32 = arith.constant 0 : i32
    %c0_i32_0 = arith.constant 0 : i32
    return %arg0, %c0_i32 : i32, i32
  }
  func.func @transform_1(%arg0: i32) -> (i32, i32) {
    %c0_i32 = arith.constant 0 : i32
    %c0_i32_0 = arith.constant 0 : i32
    %c0_i32_1 = arith.constant 0 : i32
    return %c0_i32, %c0_i32_0 : i32, i32
  }
  func.func @transform_2(%arg0: i32) -> (i32, i32) {
    %c0_i32 = arith.constant 0 : i32
    %c0_i32_0 = arith.constant 0 : i32
    %c0_i32_1 = arith.constant 0 : i32
    return %c0_i32, %c0_i32_0 : i32, i32
  }
  func.func @transform_3(%arg0: i32) -> (i32, i32) {
    %c0_i32 = arith.constant 0 : i32
    %c0_i32_0 = arith.constant 0 : i32
    %c0_i32_1 = arith.constant 0 : i32
    return %c0_i32, %c0_i32_0 : i32, i32
  }
  func.func @transform_4(%arg0: i32) -> (i32, i32) {
    %c0_i32 = arith.constant 0 : i32
    %c0_i32_0 = arith.constant 0 : i32
    %c0_i32_1 = arith.constant 0 : i32
    return %c0_i32, %c0_i32_0 : i32, i32
  }
  func.func @transform_5(%arg0: i32) -> (i32, i32) {
    %c0_i32 = arith.constant 0 : i32
    %c0_i32_0 = arith.constant 0 : i32
    return %arg0, %c0_i32 : i32, i32
  }
}

module attributes {stable_mosaic.version = 11 : i64} {
  func.func @_swin_block_kernel(%arg0: i32, %arg1: memref<64x32xbf16, #tpu.memory_space<vmem>>, %arg2: memref<64x1xf32, #tpu.memory_space<vmem>>, %arg3: memref<1x32xf32, #tpu.memory_space<vmem>>, %arg4: memref<1x32xf32, #tpu.memory_space<vmem>>, %arg5: memref<32x96xbf16, #tpu.memory_space<vmem>>, %arg6: memref<1x96xf32, #tpu.memory_space<vmem>>, %arg7: memref<32x32xbf16, #tpu.memory_space<vmem>>, %arg8: memref<1x32xf32, #tpu.memory_space<vmem>>, %arg9: memref<2x64x64xf32, #tpu.memory_space<vmem>>, %arg10: memref<1x32xf32, #tpu.memory_space<vmem>>, %arg11: memref<1x32xf32, #tpu.memory_space<vmem>>, %arg12: memref<32x128xbf16, #tpu.memory_space<vmem>>, %arg13: memref<1x128xf32, #tpu.memory_space<vmem>>, %arg14: memref<128x32xbf16, #tpu.memory_space<vmem>>, %arg15: memref<1x32xf32, #tpu.memory_space<vmem>>, %arg16: memref<64x32xbf16, #tpu.memory_space<vmem>>) attributes {dimension_semantics = [#tpu.dimension_semantics<parallel>], iteration_bounds = array<i64: 2>, scalar_prefetch = 0 : i64, scratch_operands = 0 : i64, tpu.core_type = #tpu.core_type<tc>, window_params = [{transform_indices = @transform_0, window_bounds = array<i64: 64, 32>}, {pipeline_mode = #tpu.pipeline_mode<synchronous>, transform_indices = @transform_1, window_bounds = array<i64: 64, 1>}, {pipeline_mode = #tpu.pipeline_mode<synchronous>, transform_indices = @transform_2, window_bounds = array<i64: 1, 32>}, {pipeline_mode = #tpu.pipeline_mode<synchronous>, transform_indices = @transform_3, window_bounds = array<i64: 1, 32>}, {pipeline_mode = #tpu.pipeline_mode<synchronous>, transform_indices = @transform_4, window_bounds = array<i64: 32, 96>}, {pipeline_mode = #tpu.pipeline_mode<synchronous>, transform_indices = @transform_5, window_bounds = array<i64: 1, 96>}, {pipeline_mode = #tpu.pipeline_mode<synchronous>, transform_indices = @transform_6, window_bounds = array<i64: 32, 32>}, {pipeline_mode = #tpu.pipeline_mode<synchronous>, transform_indices = @transform_7, window_bounds = array<i64: 1, 32>}, {pipeline_mode = #tpu.pipeline_mode<synchronous>, transform_indices = @transform_8, window_bounds = array<i64: 2, 64, 64>}, {pipeline_mode = #tpu.pipeline_mode<synchronous>, transform_indices = @transform_9, window_bounds = array<i64: 1, 32>}, {pipeline_mode = #tpu.pipeline_mode<synchronous>, transform_indices = @transform_10, window_bounds = array<i64: 1, 32>}, {pipeline_mode = #tpu.pipeline_mode<synchronous>, transform_indices = @transform_11, window_bounds = array<i64: 32, 128>}, {pipeline_mode = #tpu.pipeline_mode<synchronous>, transform_indices = @transform_12, window_bounds = array<i64: 1, 128>}, {pipeline_mode = #tpu.pipeline_mode<synchronous>, transform_indices = @transform_13, window_bounds = array<i64: 128, 32>}, {pipeline_mode = #tpu.pipeline_mode<synchronous>, transform_indices = @transform_14, window_bounds = array<i64: 1, 32>}, {transform_indices = @transform_15, window_bounds = array<i64: 64, 32>}]} {
    %c0 = arith.constant 0 : index
    %c0_0 = arith.constant 0 : index
    %0 = vector.load %arg1[%c0, %c0_0] : memref<64x32xbf16, #tpu.memory_space<vmem>>, vector<64x32xbf16>
    %1 = arith.extf %0 : vector<64x32xbf16> to vector<64x32xf32>
    %c0_1 = arith.constant 0 : index
    %c0_2 = arith.constant 0 : index
    %2 = vector.load %arg3[%c0_1, %c0_2] : memref<1x32xf32, #tpu.memory_space<vmem>>, vector<1x32xf32>
    %c0_3 = arith.constant 0 : index
    %c0_4 = arith.constant 0 : index
    %3 = vector.load %arg4[%c0_3, %c0_4] : memref<1x32xf32, #tpu.memory_space<vmem>>, vector<1x32xf32>
    %cst = arith.constant dense<0.000000e+00> : vector<64xf32>
    %4 = vector.multi_reduction <add>, %1, %cst [1] : vector<64x32xf32> to vector<64xf32>
    %5 = vector.shape_cast %4 : vector<64xf32> to vector<64x1xf32>
    %cst_5 = arith.constant 3.200000e+01 : f32
    %6 = vector.broadcast %cst_5 : f32 to vector<64x1xf32>
    %7 = arith.divf %5, %6 : vector<64x1xf32>
    %8 = vector.broadcast %7 : vector<64x1xf32> to vector<64x32xf32>
    %9 = arith.subf %1, %8 : vector<64x32xf32>
    %10 = arith.mulf %9, %9 : vector<64x32xf32>
    %cst_6 = arith.constant dense<0.000000e+00> : vector<64xf32>
    %11 = vector.multi_reduction <add>, %10, %cst_6 [1] : vector<64x32xf32> to vector<64xf32>
    %12 = vector.shape_cast %11 : vector<64xf32> to vector<64x1xf32>
    %cst_7 = arith.constant 3.200000e+01 : f32
    %13 = vector.broadcast %cst_7 : f32 to vector<64x1xf32>
    %14 = arith.divf %12, %13 : vector<64x1xf32>
    %cst_8 = arith.constant 9.99999974E-6 : f32
    %15 = vector.broadcast %cst_8 : f32 to vector<64x1xf32>
    %16 = arith.addf %14, %15 : vector<64x1xf32>
    %17 = math.rsqrt %16 : vector<64x1xf32>
    %18 = vector.broadcast %17 : vector<64x1xf32> to vector<64x32xf32>
    %19 = arith.mulf %9, %18 : vector<64x32xf32>
    %20 = vector.broadcast %2 : vector<1x32xf32> to vector<64x32xf32>
    %21 = arith.mulf %19, %20 : vector<64x32xf32>
    %22 = vector.broadcast %3 : vector<1x32xf32> to vector<64x32xf32>
    %23 = arith.addf %21, %22 : vector<64x32xf32>
    %c0_9 = arith.constant 0 : index
    %c0_10 = arith.constant 0 : index
    %24 = vector.load %arg2[%c0_9, %c0_10] : memref<64x1xf32, #tpu.memory_space<vmem>>, vector<64x1xf32>
    %25 = vector.broadcast %24 : vector<64x1xf32> to vector<64x32xf32>
    %26 = arith.mulf %23, %25 : vector<64x32xf32>
    %27 = arith.truncf %26 : vector<64x32xf32> to vector<64x32xbf16>
    %c0_11 = arith.constant 0 : index
    %c0_12 = arith.constant 0 : index
    %28 = vector.load %arg5[%c0_11, %c0_12] : memref<32x96xbf16, #tpu.memory_space<vmem>>, vector<32x96xbf16>
    %cst_13 = arith.constant dense<0.000000e+00> : vector<64x96xf32>
    %29 = tpu.matmul %27, %28, %cst_13 {dimension_numbers = #tpu.dot_dimension_numbers<[1], [0], [0], [1], [0, 0, 1, 1], [], []>} : vector<64x32xbf16>, vector<32x96xbf16>, vector<64x96xf32> -> vector<64x96xf32>
    %c0_14 = arith.constant 0 : index
    %c0_15 = arith.constant 0 : index
    %30 = vector.load %arg6[%c0_14, %c0_15] : memref<1x96xf32, #tpu.memory_space<vmem>>, vector<1x96xf32>
    %31 = vector.broadcast %30 : vector<1x96xf32> to vector<64x96xf32>
    %32 = arith.addf %29, %31 : vector<64x96xf32>
    %33 = arith.truncf %32 : vector<64x96xf32> to vector<64x96xbf16>
    %34 = vector.extract_strided_slice %33 {offsets = [0, 0], sizes = [64, 16], strides = [1, 1]} : vector<64x96xbf16> to vector<64x16xbf16>
    %35 = vector.extract_strided_slice %33 {offsets = [0, 32], sizes = [64, 16], strides = [1, 1]} : vector<64x96xbf16> to vector<64x16xbf16>
    %36 = vector.extract_strided_slice %33 {offsets = [0, 64], sizes = [64, 16], strides = [1, 1]} : vector<64x96xbf16> to vector<64x16xbf16>
    %cst_16 = arith.constant dense<0.000000e+00> : vector<64x64xf32>
    %37 = tpu.matmul %34, %35, %cst_16 {dimension_numbers = #tpu.dot_dimension_numbers<[1], [1], [0], [0], [0, 0, 1, 0], [], []>} : vector<64x16xbf16>, vector<64x16xbf16>, vector<64x64xf32> -> vector<64x64xf32>
    %cst_17 = arith.constant 2.500000e-01 : f32
    %38 = vector.broadcast %cst_17 : f32 to vector<64x64xf32>
    %39 = arith.mulf %37, %38 : vector<64x64xf32>
    %c0_18 = arith.constant 0 : index
    %c0_19 = arith.constant 0 : index
    %c0_20 = arith.constant 0 : index
    %40 = vector.load %arg9[%c0_18, %c0_19, %c0_20] : memref<2x64x64xf32, #tpu.memory_space<vmem>>, vector<1x64x64xf32>
    %41 = vector.shape_cast %40 : vector<1x64x64xf32> to vector<64x64xf32>
    %42 = arith.addf %39, %41 : vector<64x64xf32>
    %cst_21 = arith.constant dense<0xFF800000> : vector<64xf32>
    %43 = vector.multi_reduction <maximumf>, %42, %cst_21 [1] : vector<64x64xf32> to vector<64xf32>
    %44 = vector.shape_cast %43 : vector<64xf32> to vector<64x1xf32>
    %45 = vector.broadcast %44 : vector<64x1xf32> to vector<64x64xf32>
    %46 = arith.subf %42, %45 : vector<64x64xf32>
    %47 = math.exp %46 : vector<64x64xf32>
    %cst_22 = arith.constant dense<0.000000e+00> : vector<64xf32>
    %48 = vector.multi_reduction <add>, %47, %cst_22 [1] : vector<64x64xf32> to vector<64xf32>
    %49 = vector.shape_cast %48 : vector<64xf32> to vector<64x1xf32>
    %50 = vector.broadcast %49 : vector<64x1xf32> to vector<64x64xf32>
    %51 = arith.divf %47, %50 : vector<64x64xf32>
    %52 = arith.truncf %51 : vector<64x64xf32> to vector<64x64xbf16>
    %cst_23 = arith.constant dense<0.000000e+00> : vector<64x16xf32>
    %53 = tpu.matmul %52, %36, %cst_23 {dimension_numbers = #tpu.dot_dimension_numbers<[1], [0], [0], [1], [0, 0, 1, 1], [], []>} : vector<64x64xbf16>, vector<64x16xbf16>, vector<64x16xf32> -> vector<64x16xf32>
    %54 = vector.extract_strided_slice %33 {offsets = [0, 16], sizes = [64, 16], strides = [1, 1]} : vector<64x96xbf16> to vector<64x16xbf16>
    %55 = vector.extract_strided_slice %33 {offsets = [0, 48], sizes = [64, 16], strides = [1, 1]} : vector<64x96xbf16> to vector<64x16xbf16>
    %56 = vector.extract_strided_slice %33 {offsets = [0, 80], sizes = [64, 16], strides = [1, 1]} : vector<64x96xbf16> to vector<64x16xbf16>
    %cst_24 = arith.constant dense<0.000000e+00> : vector<64x64xf32>
    %57 = tpu.matmul %54, %55, %cst_24 {dimension_numbers = #tpu.dot_dimension_numbers<[1], [1], [0], [0], [0, 0, 1, 0], [], []>} : vector<64x16xbf16>, vector<64x16xbf16>, vector<64x64xf32> -> vector<64x64xf32>
    %cst_25 = arith.constant 2.500000e-01 : f32
    %58 = vector.broadcast %cst_25 : f32 to vector<64x64xf32>
    %59 = arith.mulf %57, %58 : vector<64x64xf32>
    %c1 = arith.constant 1 : index
    %c0_26 = arith.constant 0 : index
    %c0_27 = arith.constant 0 : index
    %60 = vector.load %arg9[%c1, %c0_26, %c0_27] : memref<2x64x64xf32, #tpu.memory_space<vmem>>, vector<1x64x64xf32>
    %61 = vector.shape_cast %60 : vector<1x64x64xf32> to vector<64x64xf32>
    %62 = arith.addf %59, %61 : vector<64x64xf32>
    %cst_28 = arith.constant dense<0xFF800000> : vector<64xf32>
    %63 = vector.multi_reduction <maximumf>, %62, %cst_28 [1] : vector<64x64xf32> to vector<64xf32>
    %64 = vector.shape_cast %63 : vector<64xf32> to vector<64x1xf32>
    %65 = vector.broadcast %64 : vector<64x1xf32> to vector<64x64xf32>
    %66 = arith.subf %62, %65 : vector<64x64xf32>
    %67 = math.exp %66 : vector<64x64xf32>
    %cst_29 = arith.constant dense<0.000000e+00> : vector<64xf32>
    %68 = vector.multi_reduction <add>, %67, %cst_29 [1] : vector<64x64xf32> to vector<64xf32>
    %69 = vector.shape_cast %68 : vector<64xf32> to vector<64x1xf32>
    %70 = vector.broadcast %69 : vector<64x1xf32> to vector<64x64xf32>
    %71 = arith.divf %67, %70 : vector<64x64xf32>
    %72 = arith.truncf %71 : vector<64x64xf32> to vector<64x64xbf16>
    %cst_30 = arith.constant dense<0.000000e+00> : vector<64x16xf32>
    %73 = tpu.matmul %72, %56, %cst_30 {dimension_numbers = #tpu.dot_dimension_numbers<[1], [0], [0], [1], [0, 0, 1, 1], [], []>} : vector<64x64xbf16>, vector<64x16xbf16>, vector<64x16xf32> -> vector<64x16xf32>
    %74 = tpu.concatenate %53, %73 in 1 : vector<64x16xf32>, vector<64x16xf32> -> vector<64x32xf32>
    %75 = arith.truncf %74 : vector<64x32xf32> to vector<64x32xbf16>
    %c0_31 = arith.constant 0 : index
    %c0_32 = arith.constant 0 : index
    %76 = vector.load %arg7[%c0_31, %c0_32] : memref<32x32xbf16, #tpu.memory_space<vmem>>, vector<32x32xbf16>
    %cst_33 = arith.constant dense<0.000000e+00> : vector<64x32xf32>
    %77 = tpu.matmul %75, %76, %cst_33 {dimension_numbers = #tpu.dot_dimension_numbers<[1], [0], [0], [1], [0, 0, 1, 1], [], []>} : vector<64x32xbf16>, vector<32x32xbf16>, vector<64x32xf32> -> vector<64x32xf32>
    %c0_34 = arith.constant 0 : index
    %c0_35 = arith.constant 0 : index
    %78 = vector.load %arg8[%c0_34, %c0_35] : memref<1x32xf32, #tpu.memory_space<vmem>>, vector<1x32xf32>
    %79 = vector.broadcast %78 : vector<1x32xf32> to vector<64x32xf32>
    %80 = arith.addf %77, %79 : vector<64x32xf32>
    %81 = arith.addf %1, %80 : vector<64x32xf32>
    %c0_36 = arith.constant 0 : index
    %c0_37 = arith.constant 0 : index
    %82 = vector.load %arg10[%c0_36, %c0_37] : memref<1x32xf32, #tpu.memory_space<vmem>>, vector<1x32xf32>
    %c0_38 = arith.constant 0 : index
    %c0_39 = arith.constant 0 : index
    %83 = vector.load %arg11[%c0_38, %c0_39] : memref<1x32xf32, #tpu.memory_space<vmem>>, vector<1x32xf32>
    %cst_40 = arith.constant dense<0.000000e+00> : vector<64xf32>
    %84 = vector.multi_reduction <add>, %81, %cst_40 [1] : vector<64x32xf32> to vector<64xf32>
    %85 = vector.shape_cast %84 : vector<64xf32> to vector<64x1xf32>
    %cst_41 = arith.constant 3.200000e+01 : f32
    %86 = vector.broadcast %cst_41 : f32 to vector<64x1xf32>
    %87 = arith.divf %85, %86 : vector<64x1xf32>
    %88 = vector.broadcast %87 : vector<64x1xf32> to vector<64x32xf32>
    %89 = arith.subf %81, %88 : vector<64x32xf32>
    %90 = arith.mulf %89, %89 : vector<64x32xf32>
    %cst_42 = arith.constant dense<0.000000e+00> : vector<64xf32>
    %91 = vector.multi_reduction <add>, %90, %cst_42 [1] : vector<64x32xf32> to vector<64xf32>
    %92 = vector.shape_cast %91 : vector<64xf32> to vector<64x1xf32>
    %cst_43 = arith.constant 3.200000e+01 : f32
    %93 = vector.broadcast %cst_43 : f32 to vector<64x1xf32>
    %94 = arith.divf %92, %93 : vector<64x1xf32>
    %cst_44 = arith.constant 9.99999974E-6 : f32
    %95 = vector.broadcast %cst_44 : f32 to vector<64x1xf32>
    %96 = arith.addf %94, %95 : vector<64x1xf32>
    %97 = math.rsqrt %96 : vector<64x1xf32>
    %98 = vector.broadcast %97 : vector<64x1xf32> to vector<64x32xf32>
    %99 = arith.mulf %89, %98 : vector<64x32xf32>
    %100 = vector.broadcast %82 : vector<1x32xf32> to vector<64x32xf32>
    %101 = arith.mulf %99, %100 : vector<64x32xf32>
    %102 = vector.broadcast %83 : vector<1x32xf32> to vector<64x32xf32>
    %103 = arith.addf %101, %102 : vector<64x32xf32>
    %104 = arith.truncf %103 : vector<64x32xf32> to vector<64x32xbf16>
    %c0_45 = arith.constant 0 : index
    %c0_46 = arith.constant 0 : index
    %105 = vector.load %arg12[%c0_45, %c0_46] : memref<32x128xbf16, #tpu.memory_space<vmem>>, vector<32x128xbf16>
    %cst_47 = arith.constant dense<0.000000e+00> : vector<64x128xf32>
    %106 = tpu.matmul %104, %105, %cst_47 {dimension_numbers = #tpu.dot_dimension_numbers<[1], [0], [0], [1], [0, 0, 1, 1], [], []>} : vector<64x32xbf16>, vector<32x128xbf16>, vector<64x128xf32> -> vector<64x128xf32>
    %c0_48 = arith.constant 0 : index
    %c0_49 = arith.constant 0 : index
    %107 = vector.load %arg13[%c0_48, %c0_49] : memref<1x128xf32, #tpu.memory_space<vmem>>, vector<1x128xf32>
    %108 = vector.broadcast %107 : vector<1x128xf32> to vector<64x128xf32>
    %109 = arith.addf %106, %108 : vector<64x128xf32>
    %cst_50 = arith.constant 5.000000e-01 : f32
    %110 = vector.broadcast %cst_50 : f32 to vector<64x128xf32>
    %111 = arith.mulf %110, %109 : vector<64x128xf32>
    %cst_51 = arith.constant 4.471500e-02 : f32
    %112 = vector.broadcast %cst_51 : f32 to vector<64x128xf32>
    %113 = arith.mulf %112, %109 : vector<64x128xf32>
    %114 = arith.mulf %113, %109 : vector<64x128xf32>
    %115 = arith.mulf %114, %109 : vector<64x128xf32>
    %116 = arith.addf %109, %115 : vector<64x128xf32>
    %cst_52 = arith.constant 0.797884583 : f32
    %117 = vector.broadcast %cst_52 : f32 to vector<64x128xf32>
    %118 = arith.mulf %117, %116 : vector<64x128xf32>
    %119 = math.tanh %118 : vector<64x128xf32>
    %cst_53 = arith.constant 1.000000e+00 : f32
    %120 = vector.broadcast %cst_53 : f32 to vector<64x128xf32>
    %121 = arith.addf %120, %119 : vector<64x128xf32>
    %122 = arith.mulf %111, %121 : vector<64x128xf32>
    %123 = arith.truncf %122 : vector<64x128xf32> to vector<64x128xbf16>
    %c0_54 = arith.constant 0 : index
    %c0_55 = arith.constant 0 : index
    %124 = vector.load %arg14[%c0_54, %c0_55] : memref<128x32xbf16, #tpu.memory_space<vmem>>, vector<128x32xbf16>
    %cst_56 = arith.constant dense<0.000000e+00> : vector<64x32xf32>
    %125 = tpu.matmul %123, %124, %cst_56 {dimension_numbers = #tpu.dot_dimension_numbers<[1], [0], [0], [1], [0, 0, 1, 1], [], []>} : vector<64x128xbf16>, vector<128x32xbf16>, vector<64x32xf32> -> vector<64x32xf32>
    %c0_57 = arith.constant 0 : index
    %c0_58 = arith.constant 0 : index
    %126 = vector.load %arg15[%c0_57, %c0_58] : memref<1x32xf32, #tpu.memory_space<vmem>>, vector<1x32xf32>
    %127 = vector.broadcast %126 : vector<1x32xf32> to vector<64x32xf32>
    %128 = arith.addf %125, %127 : vector<64x32xf32>
    %129 = arith.addf %81, %128 : vector<64x32xf32>
    %130 = arith.truncf %129 : vector<64x32xf32> to vector<64x32xbf16>
    %c0_59 = arith.constant 0 : index
    %c0_60 = arith.constant 0 : index
    %131 = vector.load %arg16[%c0_59, %c0_60] : memref<64x32xbf16, #tpu.memory_space<vmem>>, vector<64x32xbf16>
    tpu.vector_store %arg16[%c0_59, %c0_60], %130 {strides = array<i32>} : memref<64x32xbf16, #tpu.memory_space<vmem>>, vector<64x32xbf16>,
    return
  }
  func.func @transform_0(%arg0: i32) -> (i32, i32) {
    %c0_i32 = arith.constant 0 : i32
    %c0_i32_0 = arith.constant 0 : i32
    return %arg0, %c0_i32 : i32, i32
  }
  func.func @transform_1(%arg0: i32) -> (i32, i32) {
    %c0_i32 = arith.constant 0 : i32
    %c0_i32_0 = arith.constant 0 : i32
    %c0_i32_1 = arith.constant 0 : i32
    return %c0_i32, %c0_i32_0 : i32, i32
  }
  func.func @transform_2(%arg0: i32) -> (i32, i32) {
    %c0_i32 = arith.constant 0 : i32
    %c0_i32_0 = arith.constant 0 : i32
    %c0_i32_1 = arith.constant 0 : i32
    return %c0_i32, %c0_i32_0 : i32, i32
  }
  func.func @transform_3(%arg0: i32) -> (i32, i32) {
    %c0_i32 = arith.constant 0 : i32
    %c0_i32_0 = arith.constant 0 : i32
    %c0_i32_1 = arith.constant 0 : i32
    return %c0_i32, %c0_i32_0 : i32, i32
  }
  func.func @transform_4(%arg0: i32) -> (i32, i32) {
    %c0_i32 = arith.constant 0 : i32
    %c0_i32_0 = arith.constant 0 : i32
    %c0_i32_1 = arith.constant 0 : i32
    return %c0_i32, %c0_i32_0 : i32, i32
  }
  func.func @transform_5(%arg0: i32) -> (i32, i32) {
    %c0_i32 = arith.constant 0 : i32
    %c0_i32_0 = arith.constant 0 : i32
    %c0_i32_1 = arith.constant 0 : i32
    return %c0_i32, %c0_i32_0 : i32, i32
  }
  func.func @transform_6(%arg0: i32) -> (i32, i32) {
    %c0_i32 = arith.constant 0 : i32
    %c0_i32_0 = arith.constant 0 : i32
    %c0_i32_1 = arith.constant 0 : i32
    return %c0_i32, %c0_i32_0 : i32, i32
  }
  func.func @transform_7(%arg0: i32) -> (i32, i32) {
    %c0_i32 = arith.constant 0 : i32
    %c0_i32_0 = arith.constant 0 : i32
    %c0_i32_1 = arith.constant 0 : i32
    return %c0_i32, %c0_i32_0 : i32, i32
  }
  func.func @transform_8(%arg0: i32) -> (i32, i32, i32) {
    %c0_i32 = arith.constant 0 : i32
    %c0_i32_0 = arith.constant 0 : i32
    %c0_i32_1 = arith.constant 0 : i32
    %c0_i32_2 = arith.constant 0 : i32
    return %c0_i32, %c0_i32_0, %c0_i32_1 : i32, i32, i32
  }
  func.func @transform_9(%arg0: i32) -> (i32, i32) {
    %c0_i32 = arith.constant 0 : i32
    %c0_i32_0 = arith.constant 0 : i32
    %c0_i32_1 = arith.constant 0 : i32
    return %c0_i32, %c0_i32_0 : i32, i32
  }
  func.func @transform_10(%arg0: i32) -> (i32, i32) {
    %c0_i32 = arith.constant 0 : i32
    %c0_i32_0 = arith.constant 0 : i32
    %c0_i32_1 = arith.constant 0 : i32
    return %c0_i32, %c0_i32_0 : i32, i32
  }
  func.func @transform_11(%arg0: i32) -> (i32, i32) {
    %c0_i32 = arith.constant 0 : i32
    %c0_i32_0 = arith.constant 0 : i32
    %c0_i32_1 = arith.constant 0 : i32
    return %c0_i32, %c0_i32_0 : i32, i32
  }
  func.func @transform_12(%arg0: i32) -> (i32, i32) {
    %c0_i32 = arith.constant 0 : i32
    %c0_i32_0 = arith.constant 0 : i32
    %c0_i32_1 = arith.constant 0 : i32
    return %c0_i32, %c0_i32_0 : i32, i32
  }
  func.func @transform_13(%arg0: i32) -> (i32, i32) {
    %c0_i32 = arith.constant 0 : i32
    %c0_i32_0 = arith.constant 0 : i32
    %c0_i32_1 = arith.constant 0 : i32
    return %c0_i32, %c0_i32_0 : i32, i32
  }
  func.func @transform_14(%arg0: i32) -> (i32, i32) {
    %c0_i32 = arith.constant 0 : i32
    %c0_i32_0 = arith.constant 0 : i32
    %c0_i32_1 = arith.constant 0 : i32
    return %c0_i32, %c0_i32_0 : i32, i32
  }
  func.func @transform_15(%arg0: i32) -> (i32, i32) {
    %c0_i32 = arith.constant 0 : i32
    %c0_i32_0 = arith.constant 0 : i32
    return %arg0, %c0_i32 : i32, i32
  }
}

module attributes {stable_mosaic.version = 11 : i64} {
  func.func @_merge_kernel(%arg0: i32, %arg1: memref<16x128xbf16, #tpu.memory_space<vmem>>, %arg2: memref<1x128xf32, #tpu.memory_space<vmem>>, %arg3: memref<1x128xf32, #tpu.memory_space<vmem>>, %arg4: memref<128x64xbf16, #tpu.memory_space<vmem>>, %arg5: memref<16x64xbf16, #tpu.memory_space<vmem>>) attributes {dimension_semantics = [#tpu.dimension_semantics<parallel>], iteration_bounds = array<i64: 2>, scalar_prefetch = 0 : i64, scratch_operands = 0 : i64, tpu.core_type = #tpu.core_type<tc>, window_params = [{transform_indices = @transform_0, window_bounds = array<i64: 16, 128>}, {pipeline_mode = #tpu.pipeline_mode<synchronous>, transform_indices = @transform_1, window_bounds = array<i64: 1, 128>}, {pipeline_mode = #tpu.pipeline_mode<synchronous>, transform_indices = @transform_2, window_bounds = array<i64: 1, 128>}, {pipeline_mode = #tpu.pipeline_mode<synchronous>, transform_indices = @transform_3, window_bounds = array<i64: 128, 64>}, {transform_indices = @transform_4, window_bounds = array<i64: 16, 64>}]} {
    %c0 = arith.constant 0 : index
    %c0_0 = arith.constant 0 : index
    %0 = vector.load %arg1[%c0, %c0_0] : memref<16x128xbf16, #tpu.memory_space<vmem>>, vector<16x128xbf16>
    %1 = arith.extf %0 : vector<16x128xbf16> to vector<16x128xf32>
    %c0_1 = arith.constant 0 : index
    %c0_2 = arith.constant 0 : index
    %2 = vector.load %arg2[%c0_1, %c0_2] : memref<1x128xf32, #tpu.memory_space<vmem>>, vector<1x128xf32>
    %c0_3 = arith.constant 0 : index
    %c0_4 = arith.constant 0 : index
    %3 = vector.load %arg3[%c0_3, %c0_4] : memref<1x128xf32, #tpu.memory_space<vmem>>, vector<1x128xf32>
    %cst = arith.constant dense<0.000000e+00> : vector<16xf32>
    %4 = vector.multi_reduction <add>, %1, %cst [1] : vector<16x128xf32> to vector<16xf32>
    %5 = vector.shape_cast %4 : vector<16xf32> to vector<16x1xf32>
    %cst_5 = arith.constant 1.280000e+02 : f32
    %6 = vector.broadcast %cst_5 : f32 to vector<16x1xf32>
    %7 = arith.divf %5, %6 : vector<16x1xf32>
    %8 = vector.broadcast %7 : vector<16x1xf32> to vector<16x128xf32>
    %9 = arith.subf %1, %8 : vector<16x128xf32>
    %10 = arith.mulf %9, %9 : vector<16x128xf32>
    %cst_6 = arith.constant dense<0.000000e+00> : vector<16xf32>
    %11 = vector.multi_reduction <add>, %10, %cst_6 [1] : vector<16x128xf32> to vector<16xf32>
    %12 = vector.shape_cast %11 : vector<16xf32> to vector<16x1xf32>
    %cst_7 = arith.constant 1.280000e+02 : f32
    %13 = vector.broadcast %cst_7 : f32 to vector<16x1xf32>
    %14 = arith.divf %12, %13 : vector<16x1xf32>
    %cst_8 = arith.constant 9.99999974E-6 : f32
    %15 = vector.broadcast %cst_8 : f32 to vector<16x1xf32>
    %16 = arith.addf %14, %15 : vector<16x1xf32>
    %17 = math.rsqrt %16 : vector<16x1xf32>
    %18 = vector.broadcast %17 : vector<16x1xf32> to vector<16x128xf32>
    %19 = arith.mulf %9, %18 : vector<16x128xf32>
    %20 = vector.broadcast %2 : vector<1x128xf32> to vector<16x128xf32>
    %21 = arith.mulf %19, %20 : vector<16x128xf32>
    %22 = vector.broadcast %3 : vector<1x128xf32> to vector<16x128xf32>
    %23 = arith.addf %21, %22 : vector<16x128xf32>
    %24 = arith.truncf %23 : vector<16x128xf32> to vector<16x128xbf16>
    %c0_9 = arith.constant 0 : index
    %c0_10 = arith.constant 0 : index
    %25 = vector.load %arg4[%c0_9, %c0_10] : memref<128x64xbf16, #tpu.memory_space<vmem>>, vector<128x64xbf16>
    %cst_11 = arith.constant dense<0.000000e+00> : vector<16x64xf32>
    %26 = tpu.matmul %24, %25, %cst_11 {dimension_numbers = #tpu.dot_dimension_numbers<[1], [0], [0], [1], [0, 0, 1, 1], [], []>} : vector<16x128xbf16>, vector<128x64xbf16>, vector<16x64xf32> -> vector<16x64xf32>
    %27 = arith.truncf %26 : vector<16x64xf32> to vector<16x64xbf16>
    %c0_12 = arith.constant 0 : index
    %c0_13 = arith.constant 0 : index
    %28 = vector.load %arg5[%c0_12, %c0_13] : memref<16x64xbf16, #tpu.memory_space<vmem>>, vector<16x64xbf16>
    tpu.vector_store %arg5[%c0_12, %c0_13], %27 {strides = array<i32>} : memref<16x64xbf16, #tpu.memory_space<vmem>>, vector<16x64xbf16>,
    return
  }
  func.func @transform_0(%arg0: i32) -> (i32, i32) {
    %c0_i32 = arith.constant 0 : i32
    %c0_i32_0 = arith.constant 0 : i32
    return %arg0, %c0_i32 : i32, i32
  }
  func.func @transform_1(%arg0: i32) -> (i32, i32) {
    %c0_i32 = arith.constant 0 : i32
    %c0_i32_0 = arith.constant 0 : i32
    %c0_i32_1 = arith.constant 0 : i32
    return %c0_i32, %c0_i32_0 : i32, i32
  }
  func.func @transform_2(%arg0: i32) -> (i32, i32) {
    %c0_i32 = arith.constant 0 : i32
    %c0_i32_0 = arith.constant 0 : i32
    %c0_i32_1 = arith.constant 0 : i32
    return %c0_i32, %c0_i32_0 : i32, i32
  }
  func.func @transform_3(%arg0: i32) -> (i32, i32) {
    %c0_i32 = arith.constant 0 : i32
    %c0_i32_0 = arith.constant 0 : i32
    %c0_i32_1 = arith.constant 0 : i32
    return %c0_i32, %c0_i32_0 : i32, i32
  }
  func.func @transform_4(%arg0: i32) -> (i32, i32) {
    %c0_i32 = arith.constant 0 : i32
    %c0_i32_0 = arith.constant 0 : i32
    return %arg0, %c0_i32 : i32, i32
  }
}

module attributes {stable_mosaic.version = 11 : i64} {
  func.func @_swin_block_kernel(%arg0: i32, %arg1: memref<16x64xbf16, #tpu.memory_space<vmem>>, %arg2: memref<16x1xf32, #tpu.memory_space<vmem>>, %arg3: memref<1x64xf32, #tpu.memory_space<vmem>>, %arg4: memref<1x64xf32, #tpu.memory_space<vmem>>, %arg5: memref<64x192xbf16, #tpu.memory_space<vmem>>, %arg6: memref<1x192xf32, #tpu.memory_space<vmem>>, %arg7: memref<64x64xbf16, #tpu.memory_space<vmem>>, %arg8: memref<1x64xf32, #tpu.memory_space<vmem>>, %arg9: memref<4x16x16xf32, #tpu.memory_space<vmem>>, %arg10: memref<1x64xf32, #tpu.memory_space<vmem>>, %arg11: memref<1x64xf32, #tpu.memory_space<vmem>>, %arg12: memref<64x256xbf16, #tpu.memory_space<vmem>>, %arg13: memref<1x256xf32, #tpu.memory_space<vmem>>, %arg14: memref<256x64xbf16, #tpu.memory_space<vmem>>, %arg15: memref<1x64xf32, #tpu.memory_space<vmem>>, %arg16: memref<16x64xbf16, #tpu.memory_space<vmem>>) attributes {dimension_semantics = [#tpu.dimension_semantics<parallel>], iteration_bounds = array<i64: 2>, scalar_prefetch = 0 : i64, scratch_operands = 0 : i64, tpu.core_type = #tpu.core_type<tc>, window_params = [{transform_indices = @transform_0, window_bounds = array<i64: 16, 64>}, {pipeline_mode = #tpu.pipeline_mode<synchronous>, transform_indices = @transform_1, window_bounds = array<i64: 16, 1>}, {pipeline_mode = #tpu.pipeline_mode<synchronous>, transform_indices = @transform_2, window_bounds = array<i64: 1, 64>}, {pipeline_mode = #tpu.pipeline_mode<synchronous>, transform_indices = @transform_3, window_bounds = array<i64: 1, 64>}, {pipeline_mode = #tpu.pipeline_mode<synchronous>, transform_indices = @transform_4, window_bounds = array<i64: 64, 192>}, {pipeline_mode = #tpu.pipeline_mode<synchronous>, transform_indices = @transform_5, window_bounds = array<i64: 1, 192>}, {pipeline_mode = #tpu.pipeline_mode<synchronous>, transform_indices = @transform_6, window_bounds = array<i64: 64, 64>}, {pipeline_mode = #tpu.pipeline_mode<synchronous>, transform_indices = @transform_7, window_bounds = array<i64: 1, 64>}, {pipeline_mode = #tpu.pipeline_mode<synchronous>, transform_indices = @transform_8, window_bounds = array<i64: 4, 16, 16>}, {pipeline_mode = #tpu.pipeline_mode<synchronous>, transform_indices = @transform_9, window_bounds = array<i64: 1, 64>}, {pipeline_mode = #tpu.pipeline_mode<synchronous>, transform_indices = @transform_10, window_bounds = array<i64: 1, 64>}, {pipeline_mode = #tpu.pipeline_mode<synchronous>, transform_indices = @transform_11, window_bounds = array<i64: 64, 256>}, {pipeline_mode = #tpu.pipeline_mode<synchronous>, transform_indices = @transform_12, window_bounds = array<i64: 1, 256>}, {pipeline_mode = #tpu.pipeline_mode<synchronous>, transform_indices = @transform_13, window_bounds = array<i64: 256, 64>}, {pipeline_mode = #tpu.pipeline_mode<synchronous>, transform_indices = @transform_14, window_bounds = array<i64: 1, 64>}, {transform_indices = @transform_15, window_bounds = array<i64: 16, 64>}]} {
    %c0 = arith.constant 0 : index
    %c0_0 = arith.constant 0 : index
    %0 = vector.load %arg1[%c0, %c0_0] : memref<16x64xbf16, #tpu.memory_space<vmem>>, vector<16x64xbf16>
    %1 = arith.extf %0 : vector<16x64xbf16> to vector<16x64xf32>
    %c0_1 = arith.constant 0 : index
    %c0_2 = arith.constant 0 : index
    %2 = vector.load %arg3[%c0_1, %c0_2] : memref<1x64xf32, #tpu.memory_space<vmem>>, vector<1x64xf32>
    %c0_3 = arith.constant 0 : index
    %c0_4 = arith.constant 0 : index
    %3 = vector.load %arg4[%c0_3, %c0_4] : memref<1x64xf32, #tpu.memory_space<vmem>>, vector<1x64xf32>
    %cst = arith.constant dense<0.000000e+00> : vector<16xf32>
    %4 = vector.multi_reduction <add>, %1, %cst [1] : vector<16x64xf32> to vector<16xf32>
    %5 = vector.shape_cast %4 : vector<16xf32> to vector<16x1xf32>
    %cst_5 = arith.constant 6.400000e+01 : f32
    %6 = vector.broadcast %cst_5 : f32 to vector<16x1xf32>
    %7 = arith.divf %5, %6 : vector<16x1xf32>
    %8 = vector.broadcast %7 : vector<16x1xf32> to vector<16x64xf32>
    %9 = arith.subf %1, %8 : vector<16x64xf32>
    %10 = arith.mulf %9, %9 : vector<16x64xf32>
    %cst_6 = arith.constant dense<0.000000e+00> : vector<16xf32>
    %11 = vector.multi_reduction <add>, %10, %cst_6 [1] : vector<16x64xf32> to vector<16xf32>
    %12 = vector.shape_cast %11 : vector<16xf32> to vector<16x1xf32>
    %cst_7 = arith.constant 6.400000e+01 : f32
    %13 = vector.broadcast %cst_7 : f32 to vector<16x1xf32>
    %14 = arith.divf %12, %13 : vector<16x1xf32>
    %cst_8 = arith.constant 9.99999974E-6 : f32
    %15 = vector.broadcast %cst_8 : f32 to vector<16x1xf32>
    %16 = arith.addf %14, %15 : vector<16x1xf32>
    %17 = math.rsqrt %16 : vector<16x1xf32>
    %18 = vector.broadcast %17 : vector<16x1xf32> to vector<16x64xf32>
    %19 = arith.mulf %9, %18 : vector<16x64xf32>
    %20 = vector.broadcast %2 : vector<1x64xf32> to vector<16x64xf32>
    %21 = arith.mulf %19, %20 : vector<16x64xf32>
    %22 = vector.broadcast %3 : vector<1x64xf32> to vector<16x64xf32>
    %23 = arith.addf %21, %22 : vector<16x64xf32>
    %c0_9 = arith.constant 0 : index
    %c0_10 = arith.constant 0 : index
    %24 = vector.load %arg2[%c0_9, %c0_10] : memref<16x1xf32, #tpu.memory_space<vmem>>, vector<16x1xf32>
    %25 = vector.broadcast %24 : vector<16x1xf32> to vector<16x64xf32>
    %26 = arith.mulf %23, %25 : vector<16x64xf32>
    %27 = arith.truncf %26 : vector<16x64xf32> to vector<16x64xbf16>
    %c0_11 = arith.constant 0 : index
    %c0_12 = arith.constant 0 : index
    %28 = vector.load %arg5[%c0_11, %c0_12] : memref<64x192xbf16, #tpu.memory_space<vmem>>, vector<64x192xbf16>
    %cst_13 = arith.constant dense<0.000000e+00> : vector<16x192xf32>
    %29 = tpu.matmul %27, %28, %cst_13 {dimension_numbers = #tpu.dot_dimension_numbers<[1], [0], [0], [1], [0, 0, 1, 1], [], []>} : vector<16x64xbf16>, vector<64x192xbf16>, vector<16x192xf32> -> vector<16x192xf32>
    %c0_14 = arith.constant 0 : index
    %c0_15 = arith.constant 0 : index
    %30 = vector.load %arg6[%c0_14, %c0_15] : memref<1x192xf32, #tpu.memory_space<vmem>>, vector<1x192xf32>
    %31 = vector.broadcast %30 : vector<1x192xf32> to vector<16x192xf32>
    %32 = arith.addf %29, %31 : vector<16x192xf32>
    %33 = arith.truncf %32 : vector<16x192xf32> to vector<16x192xbf16>
    %34 = vector.extract_strided_slice %33 {offsets = [0, 0], sizes = [16, 16], strides = [1, 1]} : vector<16x192xbf16> to vector<16x16xbf16>
    %35 = vector.extract_strided_slice %33 {offsets = [0, 64], sizes = [16, 16], strides = [1, 1]} : vector<16x192xbf16> to vector<16x16xbf16>
    %36 = vector.extract_strided_slice %33 {offsets = [0, 128], sizes = [16, 16], strides = [1, 1]} : vector<16x192xbf16> to vector<16x16xbf16>
    %cst_16 = arith.constant dense<0.000000e+00> : vector<16x16xf32>
    %37 = tpu.matmul %34, %35, %cst_16 {dimension_numbers = #tpu.dot_dimension_numbers<[1], [1], [0], [0], [0, 0, 1, 0], [], []>} : vector<16x16xbf16>, vector<16x16xbf16>, vector<16x16xf32> -> vector<16x16xf32>
    %cst_17 = arith.constant 2.500000e-01 : f32
    %38 = vector.broadcast %cst_17 : f32 to vector<16x16xf32>
    %39 = arith.mulf %37, %38 : vector<16x16xf32>
    %c0_18 = arith.constant 0 : index
    %c0_19 = arith.constant 0 : index
    %c0_20 = arith.constant 0 : index
    %40 = vector.load %arg9[%c0_18, %c0_19, %c0_20] : memref<4x16x16xf32, #tpu.memory_space<vmem>>, vector<1x16x16xf32>
    %41 = vector.shape_cast %40 : vector<1x16x16xf32> to vector<16x16xf32>
    %42 = arith.addf %39, %41 : vector<16x16xf32>
    %cst_21 = arith.constant dense<0xFF800000> : vector<16xf32>
    %43 = vector.multi_reduction <maximumf>, %42, %cst_21 [1] : vector<16x16xf32> to vector<16xf32>
    %44 = vector.shape_cast %43 : vector<16xf32> to vector<16x1xf32>
    %45 = vector.broadcast %44 : vector<16x1xf32> to vector<16x16xf32>
    %46 = arith.subf %42, %45 : vector<16x16xf32>
    %47 = math.exp %46 : vector<16x16xf32>
    %cst_22 = arith.constant dense<0.000000e+00> : vector<16xf32>
    %48 = vector.multi_reduction <add>, %47, %cst_22 [1] : vector<16x16xf32> to vector<16xf32>
    %49 = vector.shape_cast %48 : vector<16xf32> to vector<16x1xf32>
    %50 = vector.broadcast %49 : vector<16x1xf32> to vector<16x16xf32>
    %51 = arith.divf %47, %50 : vector<16x16xf32>
    %52 = arith.truncf %51 : vector<16x16xf32> to vector<16x16xbf16>
    %cst_23 = arith.constant dense<0.000000e+00> : vector<16x16xf32>
    %53 = tpu.matmul %52, %36, %cst_23 {dimension_numbers = #tpu.dot_dimension_numbers<[1], [0], [0], [1], [0, 0, 1, 1], [], []>} : vector<16x16xbf16>, vector<16x16xbf16>, vector<16x16xf32> -> vector<16x16xf32>
    %54 = vector.extract_strided_slice %33 {offsets = [0, 16], sizes = [16, 16], strides = [1, 1]} : vector<16x192xbf16> to vector<16x16xbf16>
    %55 = vector.extract_strided_slice %33 {offsets = [0, 80], sizes = [16, 16], strides = [1, 1]} : vector<16x192xbf16> to vector<16x16xbf16>
    %56 = vector.extract_strided_slice %33 {offsets = [0, 144], sizes = [16, 16], strides = [1, 1]} : vector<16x192xbf16> to vector<16x16xbf16>
    %cst_24 = arith.constant dense<0.000000e+00> : vector<16x16xf32>
    %57 = tpu.matmul %54, %55, %cst_24 {dimension_numbers = #tpu.dot_dimension_numbers<[1], [1], [0], [0], [0, 0, 1, 0], [], []>} : vector<16x16xbf16>, vector<16x16xbf16>, vector<16x16xf32> -> vector<16x16xf32>
    %cst_25 = arith.constant 2.500000e-01 : f32
    %58 = vector.broadcast %cst_25 : f32 to vector<16x16xf32>
    %59 = arith.mulf %57, %58 : vector<16x16xf32>
    %c1 = arith.constant 1 : index
    %c0_26 = arith.constant 0 : index
    %c0_27 = arith.constant 0 : index
    %60 = vector.load %arg9[%c1, %c0_26, %c0_27] : memref<4x16x16xf32, #tpu.memory_space<vmem>>, vector<1x16x16xf32>
    %61 = vector.shape_cast %60 : vector<1x16x16xf32> to vector<16x16xf32>
    %62 = arith.addf %59, %61 : vector<16x16xf32>
    %cst_28 = arith.constant dense<0xFF800000> : vector<16xf32>
    %63 = vector.multi_reduction <maximumf>, %62, %cst_28 [1] : vector<16x16xf32> to vector<16xf32>
    %64 = vector.shape_cast %63 : vector<16xf32> to vector<16x1xf32>
    %65 = vector.broadcast %64 : vector<16x1xf32> to vector<16x16xf32>
    %66 = arith.subf %62, %65 : vector<16x16xf32>
    %67 = math.exp %66 : vector<16x16xf32>
    %cst_29 = arith.constant dense<0.000000e+00> : vector<16xf32>
    %68 = vector.multi_reduction <add>, %67, %cst_29 [1] : vector<16x16xf32> to vector<16xf32>
    %69 = vector.shape_cast %68 : vector<16xf32> to vector<16x1xf32>
    %70 = vector.broadcast %69 : vector<16x1xf32> to vector<16x16xf32>
    %71 = arith.divf %67, %70 : vector<16x16xf32>
    %72 = arith.truncf %71 : vector<16x16xf32> to vector<16x16xbf16>
    %cst_30 = arith.constant dense<0.000000e+00> : vector<16x16xf32>
    %73 = tpu.matmul %72, %56, %cst_30 {dimension_numbers = #tpu.dot_dimension_numbers<[1], [0], [0], [1], [0, 0, 1, 1], [], []>} : vector<16x16xbf16>, vector<16x16xbf16>, vector<16x16xf32> -> vector<16x16xf32>
    %74 = vector.extract_strided_slice %33 {offsets = [0, 32], sizes = [16, 16], strides = [1, 1]} : vector<16x192xbf16> to vector<16x16xbf16>
    %75 = vector.extract_strided_slice %33 {offsets = [0, 96], sizes = [16, 16], strides = [1, 1]} : vector<16x192xbf16> to vector<16x16xbf16>
    %76 = vector.extract_strided_slice %33 {offsets = [0, 160], sizes = [16, 16], strides = [1, 1]} : vector<16x192xbf16> to vector<16x16xbf16>
    %cst_31 = arith.constant dense<0.000000e+00> : vector<16x16xf32>
    %77 = tpu.matmul %74, %75, %cst_31 {dimension_numbers = #tpu.dot_dimension_numbers<[1], [1], [0], [0], [0, 0, 1, 0], [], []>} : vector<16x16xbf16>, vector<16x16xbf16>, vector<16x16xf32> -> vector<16x16xf32>
    %cst_32 = arith.constant 2.500000e-01 : f32
    %78 = vector.broadcast %cst_32 : f32 to vector<16x16xf32>
    %79 = arith.mulf %77, %78 : vector<16x16xf32>
    %c2 = arith.constant 2 : index
    %c0_33 = arith.constant 0 : index
    %c0_34 = arith.constant 0 : index
    %80 = vector.load %arg9[%c2, %c0_33, %c0_34] : memref<4x16x16xf32, #tpu.memory_space<vmem>>, vector<1x16x16xf32>
    %81 = vector.shape_cast %80 : vector<1x16x16xf32> to vector<16x16xf32>
    %82 = arith.addf %79, %81 : vector<16x16xf32>
    %cst_35 = arith.constant dense<0xFF800000> : vector<16xf32>
    %83 = vector.multi_reduction <maximumf>, %82, %cst_35 [1] : vector<16x16xf32> to vector<16xf32>
    %84 = vector.shape_cast %83 : vector<16xf32> to vector<16x1xf32>
    %85 = vector.broadcast %84 : vector<16x1xf32> to vector<16x16xf32>
    %86 = arith.subf %82, %85 : vector<16x16xf32>
    %87 = math.exp %86 : vector<16x16xf32>
    %cst_36 = arith.constant dense<0.000000e+00> : vector<16xf32>
    %88 = vector.multi_reduction <add>, %87, %cst_36 [1] : vector<16x16xf32> to vector<16xf32>
    %89 = vector.shape_cast %88 : vector<16xf32> to vector<16x1xf32>
    %90 = vector.broadcast %89 : vector<16x1xf32> to vector<16x16xf32>
    %91 = arith.divf %87, %90 : vector<16x16xf32>
    %92 = arith.truncf %91 : vector<16x16xf32> to vector<16x16xbf16>
    %cst_37 = arith.constant dense<0.000000e+00> : vector<16x16xf32>
    %93 = tpu.matmul %92, %76, %cst_37 {dimension_numbers = #tpu.dot_dimension_numbers<[1], [0], [0], [1], [0, 0, 1, 1], [], []>} : vector<16x16xbf16>, vector<16x16xbf16>, vector<16x16xf32> -> vector<16x16xf32>
    %94 = vector.extract_strided_slice %33 {offsets = [0, 48], sizes = [16, 16], strides = [1, 1]} : vector<16x192xbf16> to vector<16x16xbf16>
    %95 = vector.extract_strided_slice %33 {offsets = [0, 112], sizes = [16, 16], strides = [1, 1]} : vector<16x192xbf16> to vector<16x16xbf16>
    %96 = vector.extract_strided_slice %33 {offsets = [0, 176], sizes = [16, 16], strides = [1, 1]} : vector<16x192xbf16> to vector<16x16xbf16>
    %cst_38 = arith.constant dense<0.000000e+00> : vector<16x16xf32>
    %97 = tpu.matmul %94, %95, %cst_38 {dimension_numbers = #tpu.dot_dimension_numbers<[1], [1], [0], [0], [0, 0, 1, 0], [], []>} : vector<16x16xbf16>, vector<16x16xbf16>, vector<16x16xf32> -> vector<16x16xf32>
    %cst_39 = arith.constant 2.500000e-01 : f32
    %98 = vector.broadcast %cst_39 : f32 to vector<16x16xf32>
    %99 = arith.mulf %97, %98 : vector<16x16xf32>
    %c3 = arith.constant 3 : index
    %c0_40 = arith.constant 0 : index
    %c0_41 = arith.constant 0 : index
    %100 = vector.load %arg9[%c3, %c0_40, %c0_41] : memref<4x16x16xf32, #tpu.memory_space<vmem>>, vector<1x16x16xf32>
    %101 = vector.shape_cast %100 : vector<1x16x16xf32> to vector<16x16xf32>
    %102 = arith.addf %99, %101 : vector<16x16xf32>
    %cst_42 = arith.constant dense<0xFF800000> : vector<16xf32>
    %103 = vector.multi_reduction <maximumf>, %102, %cst_42 [1] : vector<16x16xf32> to vector<16xf32>
    %104 = vector.shape_cast %103 : vector<16xf32> to vector<16x1xf32>
    %105 = vector.broadcast %104 : vector<16x1xf32> to vector<16x16xf32>
    %106 = arith.subf %102, %105 : vector<16x16xf32>
    %107 = math.exp %106 : vector<16x16xf32>
    %cst_43 = arith.constant dense<0.000000e+00> : vector<16xf32>
    %108 = vector.multi_reduction <add>, %107, %cst_43 [1] : vector<16x16xf32> to vector<16xf32>
    %109 = vector.shape_cast %108 : vector<16xf32> to vector<16x1xf32>
    %110 = vector.broadcast %109 : vector<16x1xf32> to vector<16x16xf32>
    %111 = arith.divf %107, %110 : vector<16x16xf32>
    %112 = arith.truncf %111 : vector<16x16xf32> to vector<16x16xbf16>
    %cst_44 = arith.constant dense<0.000000e+00> : vector<16x16xf32>
    %113 = tpu.matmul %112, %96, %cst_44 {dimension_numbers = #tpu.dot_dimension_numbers<[1], [0], [0], [1], [0, 0, 1, 1], [], []>} : vector<16x16xbf16>, vector<16x16xbf16>, vector<16x16xf32> -> vector<16x16xf32>
    %114 = tpu.concatenate %53, %73, %93, %113 in 1 : vector<16x16xf32>, vector<16x16xf32>, vector<16x16xf32>, vector<16x16xf32> -> vector<16x64xf32>
    %115 = arith.truncf %114 : vector<16x64xf32> to vector<16x64xbf16>
    %c0_45 = arith.constant 0 : index
    %c0_46 = arith.constant 0 : index
    %116 = vector.load %arg7[%c0_45, %c0_46] : memref<64x64xbf16, #tpu.memory_space<vmem>>, vector<64x64xbf16>
    %cst_47 = arith.constant dense<0.000000e+00> : vector<16x64xf32>
    %117 = tpu.matmul %115, %116, %cst_47 {dimension_numbers = #tpu.dot_dimension_numbers<[1], [0], [0], [1], [0, 0, 1, 1], [], []>} : vector<16x64xbf16>, vector<64x64xbf16>, vector<16x64xf32> -> vector<16x64xf32>
    %c0_48 = arith.constant 0 : index
    %c0_49 = arith.constant 0 : index
    %118 = vector.load %arg8[%c0_48, %c0_49] : memref<1x64xf32, #tpu.memory_space<vmem>>, vector<1x64xf32>
    %119 = vector.broadcast %118 : vector<1x64xf32> to vector<16x64xf32>
    %120 = arith.addf %117, %119 : vector<16x64xf32>
    %121 = arith.addf %1, %120 : vector<16x64xf32>
    %c0_50 = arith.constant 0 : index
    %c0_51 = arith.constant 0 : index
    %122 = vector.load %arg10[%c0_50, %c0_51] : memref<1x64xf32, #tpu.memory_space<vmem>>, vector<1x64xf32>
    %c0_52 = arith.constant 0 : index
    %c0_53 = arith.constant 0 : index
    %123 = vector.load %arg11[%c0_52, %c0_53] : memref<1x64xf32, #tpu.memory_space<vmem>>, vector<1x64xf32>
    %cst_54 = arith.constant dense<0.000000e+00> : vector<16xf32>
    %124 = vector.multi_reduction <add>, %121, %cst_54 [1] : vector<16x64xf32> to vector<16xf32>
    %125 = vector.shape_cast %124 : vector<16xf32> to vector<16x1xf32>
    %cst_55 = arith.constant 6.400000e+01 : f32
    %126 = vector.broadcast %cst_55 : f32 to vector<16x1xf32>
    %127 = arith.divf %125, %126 : vector<16x1xf32>
    %128 = vector.broadcast %127 : vector<16x1xf32> to vector<16x64xf32>
    %129 = arith.subf %121, %128 : vector<16x64xf32>
    %130 = arith.mulf %129, %129 : vector<16x64xf32>
    %cst_56 = arith.constant dense<0.000000e+00> : vector<16xf32>
    %131 = vector.multi_reduction <add>, %130, %cst_56 [1] : vector<16x64xf32> to vector<16xf32>
    %132 = vector.shape_cast %131 : vector<16xf32> to vector<16x1xf32>
    %cst_57 = arith.constant 6.400000e+01 : f32
    %133 = vector.broadcast %cst_57 : f32 to vector<16x1xf32>
    %134 = arith.divf %132, %133 : vector<16x1xf32>
    %cst_58 = arith.constant 9.99999974E-6 : f32
    %135 = vector.broadcast %cst_58 : f32 to vector<16x1xf32>
    %136 = arith.addf %134, %135 : vector<16x1xf32>
    %137 = math.rsqrt %136 : vector<16x1xf32>
    %138 = vector.broadcast %137 : vector<16x1xf32> to vector<16x64xf32>
    %139 = arith.mulf %129, %138 : vector<16x64xf32>
    %140 = vector.broadcast %122 : vector<1x64xf32> to vector<16x64xf32>
    %141 = arith.mulf %139, %140 : vector<16x64xf32>
    %142 = vector.broadcast %123 : vector<1x64xf32> to vector<16x64xf32>
    %143 = arith.addf %141, %142 : vector<16x64xf32>
    %144 = arith.truncf %143 : vector<16x64xf32> to vector<16x64xbf16>
    %c0_59 = arith.constant 0 : index
    %c0_60 = arith.constant 0 : index
    %145 = vector.load %arg12[%c0_59, %c0_60] : memref<64x256xbf16, #tpu.memory_space<vmem>>, vector<64x256xbf16>
    %cst_61 = arith.constant dense<0.000000e+00> : vector<16x256xf32>
    %146 = tpu.matmul %144, %145, %cst_61 {dimension_numbers = #tpu.dot_dimension_numbers<[1], [0], [0], [1], [0, 0, 1, 1], [], []>} : vector<16x64xbf16>, vector<64x256xbf16>, vector<16x256xf32> -> vector<16x256xf32>
    %c0_62 = arith.constant 0 : index
    %c0_63 = arith.constant 0 : index
    %147 = vector.load %arg13[%c0_62, %c0_63] : memref<1x256xf32, #tpu.memory_space<vmem>>, vector<1x256xf32>
    %148 = vector.broadcast %147 : vector<1x256xf32> to vector<16x256xf32>
    %149 = arith.addf %146, %148 : vector<16x256xf32>
    %cst_64 = arith.constant 5.000000e-01 : f32
    %150 = vector.broadcast %cst_64 : f32 to vector<16x256xf32>
    %151 = arith.mulf %150, %149 : vector<16x256xf32>
    %cst_65 = arith.constant 4.471500e-02 : f32
    %152 = vector.broadcast %cst_65 : f32 to vector<16x256xf32>
    %153 = arith.mulf %152, %149 : vector<16x256xf32>
    %154 = arith.mulf %153, %149 : vector<16x256xf32>
    %155 = arith.mulf %154, %149 : vector<16x256xf32>
    %156 = arith.addf %149, %155 : vector<16x256xf32>
    %cst_66 = arith.constant 0.797884583 : f32
    %157 = vector.broadcast %cst_66 : f32 to vector<16x256xf32>
    %158 = arith.mulf %157, %156 : vector<16x256xf32>
    %159 = math.tanh %158 : vector<16x256xf32>
    %cst_67 = arith.constant 1.000000e+00 : f32
    %160 = vector.broadcast %cst_67 : f32 to vector<16x256xf32>
    %161 = arith.addf %160, %159 : vector<16x256xf32>
    %162 = arith.mulf %151, %161 : vector<16x256xf32>
    %163 = arith.truncf %162 : vector<16x256xf32> to vector<16x256xbf16>
    %c0_68 = arith.constant 0 : index
    %c0_69 = arith.constant 0 : index
    %164 = vector.load %arg14[%c0_68, %c0_69] : memref<256x64xbf16, #tpu.memory_space<vmem>>, vector<256x64xbf16>
    %cst_70 = arith.constant dense<0.000000e+00> : vector<16x64xf32>
    %165 = tpu.matmul %163, %164, %cst_70 {dimension_numbers = #tpu.dot_dimension_numbers<[1], [0], [0], [1], [0, 0, 1, 1], [], []>} : vector<16x256xbf16>, vector<256x64xbf16>, vector<16x64xf32> -> vector<16x64xf32>
    %c0_71 = arith.constant 0 : index
    %c0_72 = arith.constant 0 : index
    %166 = vector.load %arg15[%c0_71, %c0_72] : memref<1x64xf32, #tpu.memory_space<vmem>>, vector<1x64xf32>
    %167 = vector.broadcast %166 : vector<1x64xf32> to vector<16x64xf32>
    %168 = arith.addf %165, %167 : vector<16x64xf32>
    %169 = arith.addf %121, %168 : vector<16x64xf32>
    %170 = arith.truncf %169 : vector<16x64xf32> to vector<16x64xbf16>
    %c0_73 = arith.constant 0 : index
    %c0_74 = arith.constant 0 : index
    %171 = vector.load %arg16[%c0_73, %c0_74] : memref<16x64xbf16, #tpu.memory_space<vmem>>, vector<16x64xbf16>
    tpu.vector_store %arg16[%c0_73, %c0_74], %170 {strides = array<i32>} : memref<16x64xbf16, #tpu.memory_space<vmem>>, vector<16x64xbf16>,
    return
  }
  func.func @transform_0(%arg0: i32) -> (i32, i32) {
    %c0_i32 = arith.constant 0 : i32
    %c0_i32_0 = arith.constant 0 : i32
    return %arg0, %c0_i32 : i32, i32
  }
  func.func @transform_1(%arg0: i32) -> (i32, i32) {
    %c0_i32 = arith.constant 0 : i32
    %c0_i32_0 = arith.constant 0 : i32
    %c0_i32_1 = arith.constant 0 : i32
    return %c0_i32, %c0_i32_0 : i32, i32
  }
  func.func @transform_2(%arg0: i32) -> (i32, i32) {
    %c0_i32 = arith.constant 0 : i32
    %c0_i32_0 = arith.constant 0 : i32
    %c0_i32_1 = arith.constant 0 : i32
    return %c0_i32, %c0_i32_0 : i32, i32
  }
  func.func @transform_3(%arg0: i32) -> (i32, i32) {
    %c0_i32 = arith.constant 0 : i32
    %c0_i32_0 = arith.constant 0 : i32
    %c0_i32_1 = arith.constant 0 : i32
    return %c0_i32, %c0_i32_0 : i32, i32
  }
  func.func @transform_4(%arg0: i32) -> (i32, i32) {
    %c0_i32 = arith.constant 0 : i32
    %c0_i32_0 = arith.constant 0 : i32
    %c0_i32_1 = arith.constant 0 : i32
    return %c0_i32, %c0_i32_0 : i32, i32
  }
  func.func @transform_5(%arg0: i32) -> (i32, i32) {
    %c0_i32 = arith.constant 0 : i32
    %c0_i32_0 = arith.constant 0 : i32
    %c0_i32_1 = arith.constant 0 : i32
    return %c0_i32, %c0_i32_0 : i32, i32
  }
  func.func @transform_6(%arg0: i32) -> (i32, i32) {
    %c0_i32 = arith.constant 0 : i32
    %c0_i32_0 = arith.constant 0 : i32
    %c0_i32_1 = arith.constant 0 : i32
    return %c0_i32, %c0_i32_0 : i32, i32
  }
  func.func @transform_7(%arg0: i32) -> (i32, i32) {
    %c0_i32 = arith.constant 0 : i32
    %c0_i32_0 = arith.constant 0 : i32
    %c0_i32_1 = arith.constant 0 : i32
    return %c0_i32, %c0_i32_0 : i32, i32
  }
  func.func @transform_8(%arg0: i32) -> (i32, i32, i32) {
    %c0_i32 = arith.constant 0 : i32
    %c0_i32_0 = arith.constant 0 : i32
    %c0_i32_1 = arith.constant 0 : i32
    %c0_i32_2 = arith.constant 0 : i32
    return %c0_i32, %c0_i32_0, %c0_i32_1 : i32, i32, i32
  }
  func.func @transform_9(%arg0: i32) -> (i32, i32) {
    %c0_i32 = arith.constant 0 : i32
    %c0_i32_0 = arith.constant 0 : i32
    %c0_i32_1 = arith.constant 0 : i32
    return %c0_i32, %c0_i32_0 : i32, i32
  }
  func.func @transform_10(%arg0: i32) -> (i32, i32) {
    %c0_i32 = arith.constant 0 : i32
    %c0_i32_0 = arith.constant 0 : i32
    %c0_i32_1 = arith.constant 0 : i32
    return %c0_i32, %c0_i32_0 : i32, i32
  }
  func.func @transform_11(%arg0: i32) -> (i32, i32) {
    %c0_i32 = arith.constant 0 : i32
    %c0_i32_0 = arith.constant 0 : i32
    %c0_i32_1 = arith.constant 0 : i32
    return %c0_i32, %c0_i32_0 : i32, i32
  }
  func.func @transform_12(%arg0: i32) -> (i32, i32) {
    %c0_i32 = arith.constant 0 : i32
    %c0_i32_0 = arith.constant 0 : i32
    %c0_i32_1 = arith.constant 0 : i32
    return %c0_i32, %c0_i32_0 : i32, i32
  }
  func.func @transform_13(%arg0: i32) -> (i32, i32) {
    %c0_i32 = arith.constant 0 : i32
    %c0_i32_0 = arith.constant 0 : i32
    %c0_i32_1 = arith.constant 0 : i32
    return %c0_i32, %c0_i32_0 : i32, i32
  }
  func.func @transform_14(%arg0: i32) -> (i32, i32) {
    %c0_i32 = arith.constant 0 : i32
    %c0_i32_0 = arith.constant 0 : i32
    %c0_i32_1 = arith.constant 0 : i32
    return %c0_i32, %c0_i32_0 : i32, i32
  }
  func.func @transform_15(%arg0: i32) -> (i32, i32) {
    %c0_i32 = arith.constant 0 : i32
    %c0_i32_0 = arith.constant 0 : i32
    return %arg0, %c0_i32 : i32, i32
  }
}

</mosaic_0001>

<bundles_post_ra>
// kernel: swin_forward.5
= control target key start
LH: loop header
LB: loop body
LE: loop exit
PB: predicated region body
PF: predicated region fallthrough
CT: control target
= control target key end

     0   :  { %s682_s18 = smov 0   ;;  %s789_s0 = inlined_call_operand.vmem [shape: f32[128,16], index: 0, kind: input, shape index: {}]   ;;  %s790_s1 = inlined_call_operand.vmem [shape: bf16[16,32], index: 1, kind: input, shape index: {}]   ;;  %s791_s2 = inlined_call_operand.vmem [shape: f32[1,32], index: 2, kind: input, shape index: {}, may-alias: {2,4}]   ;;  %s792_s3 = inlined_call_operand.vmem [shape: f32[1,32], index: 3, kind: input, shape index: {}]   ;;  %s793_s4 = inlined_call_operand.vmem [shape: f32[1,32], index: 4, kind: input, shape index: {}, may-alias: {2,4}]   ;;  %s794_s5 = inlined_call_operand.vmem [shape: bf16[128,32], index: 5, kind: output, shape index: {}]  }
   0x1 LB: > { %s567_s19 = sadd.s32 4294967295, %s650_s18   ;;  %p571_p0 = scmp.ge.s32.totalorder %s650_s18, 1  ;;  %s650_s18 = sphi %s682_s18, %s15_s18  }
   0x2   : > { %p188_p1 = scmp.lt.s32.totalorder %s650_s18, 3 }
   0x4   : > { %p189_p2 = pnand %p571_p0, %p188_p1 }
   0x5   : > { %v627_v0 = vld [vmem:[%s790_s1] sm:$0xff] (!%p189_p2)   ;;  %s572_s22 = sshll.u32 (!%p189_p2), %s567_s19, 3  ;;  %vm256_vm0 = vcmask (!%p189_p2), 130048   ;;  %vm336_vm1 = vcmask (!%p189_p2), 261120   ;;  %vm502_vm2 = vcmask (!%p189_p2), 257024  }
   0x6   : > { %192 = sbr.rel (%p189_p2) target bundleno = 567 (0x237), region = 40  ;;  %p217_p3 = scmp.lt.s32.totalorder (!%p189_p2), %s572_s22, 15  ;;  %607 = vmatprep.subr.bf16.mxu0 (!%p189_p2), %v627_v0  ;;  %617 = vmatprep.subr.bf16.mxu1 (!%p189_p2), %v627_v0  ;;  %v576_v13 = vld [vmem:[%s791_s2] ss:$0 sm:$0xff] (!%p189_p2) }
   0x7   : > { %608 = vmatpush3.bf16.msra.mxu0 (!%p189_p2), %v627_v0  ;;  %618 = vmatpush3.bf16.msra.mxu1 (!%p189_p2), %v627_v0 }
   0xd   : > { %s796_s22 = smov (!%p217_p3, %s572_s22), 15 }
   0xe   : > { %s573_s23 = sshll.u32 %s796_s22, 3  ;;  %s575_s8 = sshll.u32 %s796_s22, 2 }
   0xf   : > { %s220_s26 = scalar_lea.vmem %s789_s0, %s573_s23  ;;  %s762_s11 = scalar_lea.vmem %s794_s5, %s575_s8 }
  0x10   : > { %v229_v1 = vld [vmem:[%s220_s26] sm:$0xff]  ;;  %v230_v2 = vld [vmem:[%s220_s26 + $0x8] sm:$0xff]  ;;  %v231_v3 = vld [vmem:[%s220_s26 + $0x10] sm:$0xff] }
  0x11   : > { %v237_v4 = vpack.c.bf16 %v230_v2, %v229_v1  ;;  %v232_v5 = vld [vmem:[%s220_s26 + $0x18] sm:$0xff]  ;;  %v233_v6 = vld [vmem:[%s220_s26 + $0x20] sm:$0xff]  ;;  %v234_v7 = vld [vmem:[%s220_s26 + $0x28] sm:$0xff] }
  0x12   : > { %v238_v8 = vpack.c.bf16 %v232_v5, %v231_v3  ;;  %v239_v9 = vpack.c.bf16 %v234_v7, %v233_v6  ;;  %v235_v10 = vld [vmem:[%s220_s26 + $0x30] sm:$0xff]  ;;  %v236_v11 = vld [vmem:[%s220_s26 + $0x38] sm:$0xff] }
  0x13   : > { %609 = vmatprep.mubr.msk.bf16.mxu0 %vm256_vm0, %v237_v4  ;;  %v240_v12 = vpack.c.bf16 %v236_v11, %v235_v10 }
  0x14   : > { %610 = vmatmul.mubr.msk.bf16.vlgmr.msra.gmra.mrb[0].mxu0 %vm256_vm0, %v238_v8  ;;  %613 = vmatprep.mubr.msk.bf16.mxu1 %vm256_vm0, %v239_v9 }
  0x15   : > { %614 = vmatmul.mubr.msk.bf16.vlgmr.msra.gmra.mrb[0].mxu1 %vm256_vm0, %v240_v12 }
  0xe7   : > { %v611_v14 = vpop.f32.mrb[0].mxu0 }
  0xe8   : > { %v312_v15 = vadd.f32 %v611_v14, %v576_v13  ;;  %v303_v16 = vpop.f32.mrb[1].mxu0  ;;  %v615_v17 = vpop.f32.mrb[0].mxu1 }
  0xe9   : > { %v304_v18 = vadd.f32 %v576_v13, %v303_v16  ;;  %v612_v19 = vpop.f32.mrb[2].mxu0  ;;  %v319_v20 = vpop.f32.mrb[1].mxu1  ;;  %v328_v34 = vadd.f32 %v615_v17, %v576_v13 }
  0xea   : > { %v315_v21 = vadd.f32 %v612_v19, %v576_v13  ;;  %v320_v22 = vadd.f32 %v576_v13, %v319_v20  ;;  %v306_v23 = vpop.f32.mrb[3].mxu0  ;;  %v616_v24 = vpop.f32.mrb[2].mxu1  ;;  %v343_v25 = vsel %vm336_vm1, %v312_v15, 0.0 }
  0xeb   : > { %v322_v26 = vpop.f32.mrb[3].mxu1  ;;  %344 = vadd.xlane.f32.xlu1 %v343_v25  ;;  %v337_v27 = vsel %vm336_vm1, %v304_v18, 0.0  ;;  %v307_v31 = vadd.f32 %v576_v13, %v306_v23  ;;  %v331_v32 = vadd.f32 %v616_v24, %v576_v13  ;;  %v355_v37 = vsel %vm336_vm1, %v328_v34, 0.0 }
  0xec   : > { %338 = vadd.xlane.f32.xlu0 %v337_v27  ;;  %v349_v28 = vsel %vm336_vm1, %v320_v22, 0.0  ;;  %v323_v29 = vadd.f32 %v576_v13, %v322_v26  ;;  %v346_v30 = vsel %vm336_vm1, %v315_v21, 0.0 }
  0xed   : > { %v340_v35 = vsel %vm336_vm1, %v307_v31, 0.0  ;;  %v358_v36 = vsel %vm336_vm1, %v331_v32, 0.0 }
  0xee   : > { %v352_v33 = vsel %vm336_vm1, %v323_v29, 0.0 }
  0xef   : > { %347 = vadd.xlane.f32.xlu1 %v346_v30 }
  0xf0   : > { %350 = vadd.xlane.f32.xlu0 %v349_v28 }
  0xf3   : > { %353 = vadd.xlane.f32.xlu1 %v352_v33 }
  0xf4   : > { %341 = vadd.xlane.f32.xlu0 %v340_v35 }
  0xf7   : > { %359 = vadd.xlane.f32.xlu1 %v358_v36 }
  0xf8   : > { %356 = vadd.xlane.f32.xlu0 %v355_v37 }
 0x178   : > { %v345_v38 = vpop.xlane.xlu1 %344 }
 0x179   : > { %v364_v39 = vmul.f32 0.03125, %v345_v38  ;;  %v339_v40 = vpop.xlane.xlu0 %338  ;;  %v583_v38 = vld [vmem:[%s793_s4] ss:$0 sm:$0xff] }
 0x17a   : > { %v362_v41 = vmul.f32 0.03125, %v339_v40 }
 0x17b   : > { %v710_v42 = vsub.f32 %v312_v15, %v364_v39 }
 0x17c   : > { %v712_v43 = vsub.f32 %v304_v18, %v362_v41  ;;  %v348_v44 = vpop.xlane.xlu1 %347 }
 0x17d   : > { %v365_v45 = vmul.f32 0.03125, %v348_v44  ;;  %v351_v46 = vpop.xlane.xlu0 %350  ;;  %v380_v47 = vmul.f32 %v710_v42, %v710_v42 }
 0x17e   : > { %v366_v48 = vmul.f32 0.03125, %v351_v46  ;;  %v378_v51 = vmul.f32 %v712_v43, %v712_v43 }
 0x17f   : > { %v716_v49 = vsub.f32 %v315_v21, %v365_v45  ;;  %v392_v50 = vsel %vm336_vm1, %v380_v47, 0.0 }
 0x180   : > { %v721_v52 = vsub.f32 %v320_v22, %v366_v48  ;;  %v354_v53 = vpop.xlane.xlu1 %353  ;;  %393 = vadd.xlane.f32.xlu0 %v392_v50  ;;  %v386_v59 = vsel %vm336_vm1, %v378_v51, 0.0 }
 0x181   : > { %v367_v54 = vmul.f32 0.03125, %v354_v53  ;;  %v342_v55 = vpop.xlane.xlu0 %341  ;;  %v381_v56 = vmul.f32 %v716_v49, %v716_v49 }
 0x182   : > { %v363_v57 = vmul.f32 0.03125, %v342_v55  ;;  %v382_v60 = vmul.f32 %v721_v52, %v721_v52 }
 0x183   : > { %v395_v58 = vsel %vm336_vm1, %v381_v56, 0.0  ;;  %v729_v61 = vsub.f32 %v323_v29, %v367_v54 }
 0x184   : > { %v731_v62 = vsub.f32 %v307_v31, %v363_v57  ;;  %396 = vadd.xlane.f32.xlu1 %v395_v58  ;;  %v360_v63 = vpop.xlane.xlu1 %359  ;;  %387 = vadd.xlane.f32.xlu0 %v386_v59  ;;  %v398_v4 = vsel %vm336_vm1, %v382_v60, 0.0 }
 0x185   : > { %v369_v0 = vmul.f32 0.03125, %v360_v63  ;;  %v357_v1 = vpop.xlane.xlu0 %356  ;;  %v383_v8 = vmul.f32 %v729_v61, %v729_v61 }
 0x186   : > { %v368_v2 = vmul.f32 0.03125, %v357_v1  ;;  %v379_v3 = vmul.f32 %v731_v62, %v731_v62 }
 0x187   : > { %v736_v5 = vsub.f32 %v331_v32, %v369_v0  ;;  %v401_v10 = vsel %vm336_vm1, %v383_v8, 0.0 }
 0x188   : > { %v738_v6 = vsub.f32 %v328_v34, %v368_v2  ;;  %399 = vadd.xlane.f32.xlu0 %v398_v4  ;;  %v389_v7 = vsel %vm336_vm1, %v379_v3, 0.0  ;;  %v582_v34 = vld [vmem:[%s792_s3] ss:$0 sm:$0xff] }
 0x189   : > { %390 = vadd.xlane.f32.xlu1 %v389_v7  ;;  %v385_v12 = vmul.f32 %v736_v5, %v736_v5 }
 0x18a   : > { %v384_v9 = vmul.f32 %v738_v6, %v738_v6 }
 0x18b   : > { %v407_v13 = vsel %vm336_vm1, %v385_v12, 0.0 }
 0x18c   : > { %v404_v11 = vsel %vm336_vm1, %v384_v9, 0.0 }
 0x18d   : > { %402 = vadd.xlane.f32.xlu1 %v401_v10  ;;  %405 = vadd.xlane.f32.xlu0 %v404_v11 }
 0x191   : > { %408 = vadd.xlane.f32.xlu1 %v407_v13 }
 0x20d   : > { %v394_v14 = vpop.xlane.xlu0 %393 }
 0x20e   : > { %v412_v15 = vmul.f32 0.03125, %v394_v14 }
 0x210   : > { %v420_v16 = vadd.f32 1e-05, %v412_v15 }
 0x211   : > { %v397_v17 = vpop.xlane.xlu1 %396  ;;  %v388_v18 = vpop.xlane.xlu0 %387 }
 0x212   : > { %628 = vrsqrt.f32 %v420_v16  ;;  %v413_v19 = vmul.f32 0.03125, %v397_v17  ;;  %v410_v20 = vmul.f32 0.03125, %v388_v18 }
 0x214   : > { %v421_v21 = vadd.f32 1e-05, %v413_v19  ;;  %v418_v22 = vadd.f32 1e-05, %v410_v20 }
 0x215   : > { %v400_v23 = vpop.xlane.xlu0 %399 }
 0x216   : > { %630 = vrsqrt.f32 %v421_v21  ;;  %v414_v24 = vmul.f32 0.03125, %v400_v23  ;;  %v391_v25 = vpop.xlane.xlu1 %390 }
 0x217   : > { %632 = vrsqrt.f32 %v418_v22  ;;  %v411_v26 = vmul.f32 0.03125, %v391_v25 }
 0x218   : > { %v422_v27 = vadd.f32 1e-05, %v414_v24 }
 0x219   : > { %v419_v28 = vadd.f32 1e-05, %v411_v26 }
 0x21a   : > { %634 = vrsqrt.f32 %v422_v27  ;;  %v403_v29 = vpop.xlane.xlu1 %402  ;;  %v406_v30 = vpop.xlane.xlu0 %405 }
 0x21b   : > { %636 = vrsqrt.f32 %v419_v28  ;;  %v415_v31 = vmul.f32 0.03125, %v403_v29  ;;  %v416_v32 = vmul.f32 0.03125, %v406_v30 }
 0x21c   : > { %v629_v33 = vpop.eup %628 }
 0x21d   : > { %v436_v35 = vmul.f32 %v629_v33, %v710_v42  ;;  %v423_v36 = vadd.f32 1e-05, %v415_v31  ;;  %v424_v37 = vadd.f32 1e-05, %v416_v32 }
 0x21e   : > { %v409_v39 = vpop.xlane.xlu1 %408 }
 0x21f   : > { %v450_v40 = vmul.f32 %v582_v34, %v436_v35  ;;  %638 = vrsqrt.f32 %v423_v36  ;;  %v417_v41 = vmul.f32 0.03125, %v409_v39 }
 0x220   : > { %v631_v44 = vpop.eup %630  ;;  %640 = vrsqrt.f32 %v424_v37 }
 0x221   : > { %v633_v45 = vpop.eup %632  ;;  %v464_v46 = vadd.f32 %v583_v38, %v450_v40  ;;  %v437_v47 = vmul.f32 %v631_v44, %v716_v49  ;;  %v425_v48 = vadd.f32 1e-05, %v417_v41 }
 0x222   : > { %v434_v42 = vmul.f32 %v633_v45, %v712_v43 }
 0x223   : > { %v596_v50 = vpack.c.bf16 %v464_v46, %v464_v46  ;;  %v451_v51 = vmul.f32 %v582_v34, %v437_v47  ;;  %642 = vrsqrt.f32 %v425_v48 }
 0x224   : > { %v635_v53 = vpop.eup %634  ;;  %v448_v54 = vmul.f32 %v582_v34, %v434_v42 }
 0x225   : > { %v637_v55 = vpop.eup %636  ;;  %505 = vst.msk [vmem:[%s762_s11 + $0x8] sm:$0xf] %vm502_vm2, %v596_v50  ;;  %v465_v49 = vadd.f32 %v583_v38, %v451_v51  ;;  %v438_v56 = vmul.f32 %v635_v53, %v721_v52 }
 0x226   : > { %v462_v57 = vadd.f32 %v583_v38, %v448_v54  ;;  %v435_v58 = vmul.f32 %v637_v55, %v731_v62 }
 0x227   : > { %v597_v59 = vpack.c.bf16 %v465_v49, %v465_v49  ;;  %v452_v60 = vmul.f32 %v582_v34, %v438_v56 }
 0x228   : > { %v594_v43 = vpack.c.bf16 %v462_v57, %v462_v57  ;;  %v449_v63 = vmul.f32 %v582_v34, %v435_v58 }
 0x229   : > { %v639_v0 = vpop.eup %638  ;;  %506 = vst.msk [vmem:[%s762_s11 + $0xc] sm:$0xf] %vm502_vm2, %v597_v59  ;;  %v466_v1 = vadd.f32 %v583_v38, %v452_v60 }
 0x22a   : > { %v641_v2 = vpop.eup %640  ;;  %503 = vst.msk [vmem:[%s762_s11] sm:$0xf] %vm502_vm2, %v594_v43  ;;  %v463_v3 = vadd.f32 %v583_v38, %v449_v63  ;;  %v439_v52 = vmul.f32 %v639_v0, %v729_v61 }
 0x22b   : > { %v598_v4 = vpack.c.bf16 %v466_v1, %v466_v1  ;;  %v440_v62 = vmul.f32 %v641_v2, %v738_v6 }
 0x22c   : > { %v595_v7 = vpack.c.bf16 %v463_v3, %v463_v3  ;;  %v453_v8 = vmul.f32 %v582_v34, %v439_v52 }
 0x22d   : > { %v643_v9 = vpop.eup %642  ;;  %507 = vst.msk [vmem:[%s762_s11 + $0x10] sm:$0xf] %vm502_vm2, %v598_v4  ;;  %v454_v10 = vmul.f32 %v582_v34, %v440_v62 }
 0x22e   : > { %504 = vst.msk [vmem:[%s762_s11 + $0x4] sm:$0xf] %vm502_vm2, %v595_v7  ;;  %v467_v11 = vadd.f32 %v583_v38, %v453_v8  ;;  %v441_v12 = vmul.f32 %v643_v9, %v736_v5 }
 0x22f   : > { %v468_v13 = vadd.f32 %v583_v38, %v454_v10 }
 0x230   : > { %v599_v14 = vpack.c.bf16 %v467_v11, %v467_v11  ;;  %v455_v15 = vmul.f32 %v582_v34, %v441_v12 }
 0x231   : > { %v600_v61 = vpack.c.bf16 %v468_v13, %v468_v13 }
 0x232   : > { %508 = vst.msk [vmem:[%s762_s11 + $0x14] sm:$0xf] %vm502_vm2, %v599_v14  ;;  %v469_v16 = vadd.f32 %v583_v38, %v455_v15 }
 0x233   : > { %509 = vst.msk [vmem:[%s762_s11 + $0x18] sm:$0xf] %vm502_vm2, %v600_v61 }
 0x234   : > { %v601_v6 = vpack.c.bf16 %v469_v16, %v469_v16 }
 0x236   : > { %510 = vst.msk [vmem:[%s762_s11 + $0x1c] sm:$0xf] %vm502_vm2, %v601_v6 }
 0x237 PF: > { %s15_s18 = sadd.s32 1, %s650_s18  }
 0x238   : > { %p12_p4 = scmp.ge.s32.totalorder %s15_s18, 4  }
 0x23a   :  { %14 = sbr.rel (!%p12_p4) target bundleno = 1 (0x1), region = 70 }

// kernel: swin_forward.8
= control target key start
LH: loop header
LB: loop body
LE: loop exit
PB: predicated region body
PF: predicated region fallthrough
CT: control target
= control target key end

     0   :  { %s535_s15 = smov 0   ;;  %s589_s0 = inlined_call_operand.vmem [shape: bf16[32,128], index: 0, kind: input, shape index: {}]   ;;  %s590_s1 = inlined_call_operand.vmem [shape: f32[1,128], index: 1, kind: input, shape index: {}]   ;;  %s591_s2 = inlined_call_operand.vmem [shape: f32[1,128], index: 2, kind: input, shape index: {}]   ;;  %s592_s3 = inlined_call_operand.vmem [shape: bf16[128,64], index: 3, kind: input, shape index: {}]   ;;  %s593_s4 = inlined_call_operand.vmem [shape: bf16[32,64], index: 4, kind: output, shape index: {}]  }
   0x1 LB: > { %s420_s16 = sadd.s32 4294967295, %s506_s15   ;;  %p424_p0 = scmp.ge.s32.totalorder %s506_s15, 1  ;;  %s506_s15 = sphi %s535_s15, %s14_s15  }
   0x2   : > { %p163_p1 = scmp.lt.s32.totalorder %s506_s15, 3 }
   0x4   : > { %p164_p2 = pnand %p424_p0, %p163_p1 }
   0x5   : > { %s425_s17 = sshll.u32 (!%p164_p2), %s420_s16, 1  ;;  %v488_v3 = vld [vmem:[%s592_s3] sm:$0xff] (!%p164_p2)   ;;  %v508_v4 = vmov (!%p164_p2), 0.0   ;;  %v489_v13 = vld [vmem:[%s592_s3 + $0x8] sm:$0xff] (!%p164_p2)   ;;  %v490_v14 = vld [vmem:[%s592_s3 + $0x10] sm:$0xff] (!%p164_p2)   ;;  %vm509_vm0 = vmmov (!%p164_p2), 0  }
   0x6   : > { %167 = sbr.rel (%p164_p2) target bundleno = 553 (0x229), region = 36  ;;  %p190_p3 = scmp.lt.s32.totalorder (!%p164_p2), %s425_s17, 3  ;;  %458 = vmatprep.subr.bf16.mxu0 (!%p164_p2), %v508_v4  ;;  %v491_v15 = vld [vmem:[%s592_s3 + $0x18] sm:$0xff] (!%p164_p2)   ;;  %v492_v16 = vld [vmem:[%s592_s3 + $0x20] sm:$0xff] (!%p164_p2)   ;;  %474 = vmatprep.mubr.msk.bf16.mxu0 (!%p164_p2), %vm509_vm0, %v508_v4  ;;  %v493_v17 = vld [vmem:[%s592_s3 + $0x28] sm:$0xff] (!%p164_p2)   ;;  %vm361_vm1 = vcmask (!%p164_p2), 519168  }
   0x7   : > { %459 = vmatpush3.bf16.msra.mxu0 (!%p164_p2), %v488_v3  ;;  %v494_v18 = vld [vmem:[%s592_s3 + $0x30] sm:$0xff] (!%p164_p2)   ;;  %v495_v19 = vld [vmem:[%s592_s3 + $0x38] sm:$0xff] (!%p164_p2)   ;;  %v429_v28 = vld [vmem:[%s590_s1] ss:$0 sm:$0xff] (!%p164_p2) }
   0x8   : > { %460 = vmatprep.subr.bf16.mxu0 (!%p164_p2), %v508_v4  ;;  %v430_v32 = vld [vmem:[%s591_s2] ss:$0 sm:$0xff] (!%p164_p2) }
   0xb   : > { %461 = vmatpush3.bf16.msra.mxu0 (!%p164_p2), %v489_v13 }
   0xc   : > { %462 = vmatprep.subr.bf16.mxu0 (!%p164_p2), %v508_v4 }
   0xd   : > { %s595_s17 = smov (!%p190_p3, %s425_s17), 3 }
   0xe   : > { %s426_s18 = sshll.u32 %s595_s17, 2 }
   0xf   : > { %s193_s21 = scalar_lea.vmem %s589_s0, %s426_s18  ;;  %463 = vmatpush3.bf16.msra.mxu0 %v490_v14 }
  0x10   : > { %v446_v0 = vld [vmem:[%s193_s21] sm:$0xff]   ;;  %464 = vmatprep.subr.bf16.mxu0 %v508_v4  ;;  %s199_s21 = scalar_lea.vmem %s593_s4, %s426_s18 }
  0x11   : > { %v447_v1 = vunpack.c.l.bf16 %v446_v0  ;;  %v448_v2 = vunpack.c.h.bf16 %v446_v0 }
  0x13   : > { %208 = vadd.xlane.f32.xlu0 %v447_v1  ;;  %465 = vmatpush3.bf16.msra.mxu0 %v491_v15 }
  0x14   : > { %466 = vmatprep.subr.bf16.mxu0 %v508_v4 }
  0x17   : > { %210 = vadd.xlane.f32.xlu0 %v448_v2  ;;  %467 = vmatpush3.bf16.msra.mxu0 %v492_v16 }
  0x18   : > { %468 = vmatprep.subr.bf16.mxu0 %v508_v4 }
  0x1b   : > { %469 = vmatpush3.bf16.msra.mxu0 %v493_v17 }
  0x1c   : > { %470 = vmatprep.subr.bf16.mxu0 %v508_v4 }
  0x1f   : > { %471 = vmatpush3.bf16.msra.mxu0 %v494_v18 }
  0x20   : > { %472 = vmatprep.subr.bf16.mxu0 %v508_v4 }
  0x23   : > { %473 = vmatpush3.bf16.msra.mxu0 %v495_v19 }
  0xa0   : > { %v209_v5 = vpop.xlane.xlu0 %208 }
  0xa1   : > { %v213_v6 = vmul.f32 0.0078125, %v209_v5 }
  0xa3   : > { %v215_v7 = vsub.f32 %v447_v1, %v213_v6 }
  0xa4   : > { %v211_v8 = vpop.xlane.xlu0 %210 }
  0xa5   : > { %v214_v9 = vmul.f32 0.0078125, %v211_v8  ;;  %v217_v10 = vmul.f32 %v215_v7, %v215_v7 }
  0xa7   : > { %v216_v11 = vsub.f32 %v448_v2, %v214_v9  ;;  %219 = vadd.xlane.f32.xlu1 %v217_v10 }
  0xa9   : > { %v218_v12 = vmul.f32 %v216_v11, %v216_v11 }
  0xab   : > { %221 = vadd.xlane.f32.xlu1 %v218_v12 }
 0x134   : > { %v220_v20 = vpop.xlane.xlu1 %219 }
 0x135   : > { %v223_v21 = vmul.f32 0.0078125, %v220_v20 }
 0x137   : > { %v225_v22 = vadd.f32 1e-05, %v223_v21 }
 0x138   : > { %v222_v23 = vpop.xlane.xlu1 %221 }
 0x139   : > { %496 = vrsqrt.f32 %v225_v22  ;;  %v224_v24 = vmul.f32 0.0078125, %v222_v23 }
 0x13b   : > { %v226_v25 = vadd.f32 1e-05, %v224_v24 }
 0x13d   : > { %498 = vrsqrt.f32 %v226_v25 }
 0x143   : > { %v497_v26 = vpop.eup %496 }
 0x144   : > { %v229_v27 = vmul.f32 %v497_v26, %v215_v7 }
 0x146   : > { %v237_v31 = vmul.f32 %v429_v28, %v229_v27 }
 0x147   : > { %v499_v29 = vpop.eup %498 }
 0x148   : > { %v230_v30 = vmul.f32 %v499_v29, %v216_v11  ;;  %v245_v34 = vadd.f32 %v430_v32, %v237_v31 }
 0x14a   : > { %v238_v33 = vmul.f32 %v429_v28, %v230_v30 }
 0x14c   : > { %v246_v35 = vadd.f32 %v430_v32, %v238_v33 }
 0x14e   : > { %v247_v36 = vpack.c.bf16 %v246_v35, %v245_v34 }
 0x150   : > { %475 = vmatmul.mubr.bf16.vlgmr.msra.gmra.mrb[0].mxu0 %v247_v36 }
 0x223   : > { %v346_v37 = vpop.f32.mrb[0].mxu0 }
 0x224   : > { %v443_v38 = vpack.c.bf16 %v346_v37, %v346_v37  ;;  %v476_v39 = vpop.f32.mrb[1].mxu0 }
 0x225   : > { %v349_v40 = vpop.f32.mrb[2].mxu0 }
 0x226   : > { %362 = vst.msk [vmem:[%s199_s21] sm:$0xf] %vm361_vm1, %v443_v38  ;;  %v444_v41 = vpack.c.bf16 %v349_v40, %v349_v40  ;;  %v477_v42 = vpop.f32.mrb[3].mxu0 }
 0x228   : > { %363 = vst.msk [vmem:[%s199_s21 + $0x4] sm:$0xf] %vm361_vm1, %v444_v41 }
 0x229 PF: > { %s14_s15 = sadd.s32 1, %s506_s15  }
 0x22a   : > { %p11_p4 = scmp.ge.s32.totalorder %s14_s15, 4  }
 0x22c   :  { %13 = sbr.rel (!%p11_p4) target bundleno = 1 (0x1), region = 66 }

// kernel: swin_forward.6
= control target key start
LH: loop header
LB: loop body
LE: loop exit
PB: predicated region body
PF: predicated region fallthrough
CT: control target
= control target key end

     0   :  { %s2697_s18 = smov 0   ;;  %s3279_s0 = inlined_call_operand.vmem [shape: bf16[128,32], index: 0, kind: input, shape index: {}]   ;;  %s3280_s1 = inlined_call_operand.vmem [shape: f32[64,1], index: 1, kind: input, shape index: {}]   ;;  %s3281_s2 = inlined_call_operand.vmem [shape: f32[1,32], index: 2, kind: input, shape index: {}, may-alias: {2,9}]   ;;  %s3282_s3 = inlined_call_operand.vmem [shape: f32[1,32], index: 3, kind: input, shape index: {}, may-alias: {3,7,10,14}]   ;;  %s3283_s4 = inlined_call_operand.vmem [shape: bf16[32,96], index: 4, kind: input, shape index: {}]   ;;  %s3284_s5 = inlined_call_operand.vmem [shape: f32[1,96], index: 5, kind: input, shape index: {}]   ;;  %s3285_s6 = inlined_call_operand.vmem [shape: bf16[32,32], index: 6, kind: input, shape index: {}]   ;;  %s3286_s7 = inlined_call_operand.vmem [shape: f32[1,32], index: 7, kind: input, shape index: {}, may-alias: {3,7,10,14}]   ;;  %s3287_s8 = inlined_call_operand.vmem [shape: f32[2,64,64], index: 8, kind: input, shape index: {}]   ;;  %s3288_s9 = inlined_call_operand.vmem [shape: f32[1,32], index: 9, kind: input, shape index: {}, may-alias: {2,9}]   ;;  %s3289_s10 = inlined_call_operand.vmem [shape: f32[1,32], index: 10, kind: input, shape index: {}, may-alias: {3,7,10,14}]   ;;  %s3290_s11 = inlined_call_operand.vmem [shape: bf16[32,128], index: 11, kind: input, shape index: {}]   ;;  %s3291_s12 = inlined_call_operand.vmem [shape: f32[1,128], index: 12, kind: input, shape index: {}]   ;;  %s3292_s13 = inlined_call_operand.vmem [shape: bf16[128,32], index: 13, kind: input, shape index: {}]   ;;  %s3293_s14 = inlined_call_operand.vmem [shape: f32[1,32], index: 14, kind: input, shape index: {}, may-alias: {3,7,10,14}]   ;;  %s3294_s15 = inlined_call_operand.vmem [shape: bf16[128,32], index: 15, kind: output, shape index: {}]  }
   0x1 LB: > { %s2141_s19 = sadd.s32 4294967295, %s2608_s18   ;;  %p2145_p0 = scmp.ge.s32.totalorder %s2608_s18, 1  ;;  %s2608_s18 = sphi %s2697_s18, %s25_s18  }
   0x2   : > { %p438_p1 = scmp.lt.s32.totalorder %s2608_s18, 3 }
   0x4   : > { %p439_p2 = pnand %p2145_p0, %p438_p1 }
   0x5   : > { %s2146_s20 = sshll.u32 (!%p439_p2), %s2141_s19, 3  ;;  %vm517_vm0 = vcmask (!%p439_p2), 261120   ;;  %v2610_v20 = vmov (!%p439_p2), 0   ;;  %v652_v56 = vld [vmem:[%s3280_s1 + $0x8] sm:$0xff] (!%p439_p2)  ;;  %v653_v57 = vld [vmem:[%s3280_s1 + $0x10] sm:$0xff] (!%p439_p2)  ;;  %v651_v58 = vld [vmem:[%s3280_s1] sm:$0xff] (!%p439_p2) }
   0x6   : > { %442 = sbr.rel (%p439_p2) target bundleno = 3278 (0xcce), region = 80  ;;  %p487_p3 = scmp.lt.s32.totalorder (!%p439_p2), %s2146_s20, 15  ;;  %2455 = vset.pattern.permute.xlu1 (!%p439_p2), %v2610_v20  ;;  %2454 = vset.pattern.permute.xlu0 (!%p439_p2), %v2610_v20  ;;  %v654_v59 = vld [vmem:[%s3280_s1 + $0x18] sm:$0xff] (!%p439_p2)  ;;  %v655_v60 = vld [vmem:[%s3280_s1 + $0x20] sm:$0xff] (!%p439_p2)  ;;  %v656_v62 = vld [vmem:[%s3280_s1 + $0x28] sm:$0xff] (!%p439_p2)  ;;  %vm827_vm1 = vcmask (!%p439_p2), 130048  }
   0x7   : > { %v2476_v61 = vld [vmem:[%s3283_s4] sm:$0xff] (!%p439_p2)   ;;  %v2477_v63 = vld [vmem:[%s3283_s4 + $0x8] sm:$0xff] (!%p439_p2)   ;;  %s2611_s27 = smov (!%p439_p2), 96   ;;  %s2612_s28 = smov (!%p439_p2), 64   ;;  %vm941_vm2 = vcmask (!%p439_p2), 523264   ;;  %vm2076_vm3 = vcmask (!%p439_p2), 257024  }
   0x8   : > { %2307 = vmatprep.subr.bf16.mxu0 (!%p439_p2), %v2476_v61  ;;  %s2613_s22 = smov (!%p439_p2), 80   ;;  %s2616_s19 = smov (!%p439_p2), 16  }
   0x9   : > { %2308 = vmatpush3.bf16.msra.mxu0 (!%p439_p2), %v2476_v61 }
   0xa   : > { %2309 = vmatprep.subr.bf16.mxu0 (!%p439_p2), %v2477_v63 }
   0xd   : > { %s3296_s20 = smov (!%p487_p3, %s2146_s20), 15  ;;  %2310 = vmatpush3.bf16.msra.mxu0 %v2477_v63 }
   0xe   : > { %s2147_s21 = sshll.u32 %s3296_s20, 2 }
   0xf   : > { %s490_s24 = scalar_lea.vmem %s3279_s0, %s2147_s21  ;;  %s3251_s30 = scalar_lea.vmem %s3294_s15, %s2147_s21 }
  0x10   : > { %v2227_v0 = vld [vmem:[%s490_s24] sm:$0xff]   ;;  %v2242_v1 = vld [vmem:[%s490_s24 + $0x8] sm:$0xff]   ;;  %v2243_v6 = vld [vmem:[%s490_s24 + $0x10] sm:$0xff]  }
  0x11   : > { %v2713_v2 = vunpack.c.l.bf16 %v2227_v0  ;;  %v2715_v3 = vunpack.c.l.bf16 %v2242_v1  ;;  %v2717_v4 = vunpack.c.h.bf16 %v2227_v0  ;;  %v2719_v5 = vunpack.c.h.bf16 %v2242_v1  ;;  %v2244_v13 = vld [vmem:[%s490_s24 + $0x18] sm:$0xff]   ;;  %v657_v0 = vld [vmem:[%s3280_s1 + $0x30] sm:$0xff] }
  0x12   : > { %v2729_v11 = vunpack.c.l.bf16 %v2243_v6  ;;  %v2731_v12 = vunpack.c.h.bf16 %v2243_v6  ;;  %v2737_v16 = vunpack.c.l.bf16 %v2244_v13  ;;  %v2739_v17 = vunpack.c.h.bf16 %v2244_v13 }
  0x13   : > { %v518_v7 = vsel %vm517_vm0, %v2713_v2, 0.0  ;;  %v524_v8 = vsel %vm517_vm0, %v2715_v3, 0.0  ;;  %v521_v9 = vsel %vm517_vm0, %v2717_v4, 0.0  ;;  %v527_v10 = vsel %vm517_vm0, %v2719_v5, 0.0 }
  0x14   : > { %519 = vadd.xlane.f32.xlu0 %v518_v7  ;;  %525 = vadd.xlane.f32.xlu1 %v524_v8  ;;  %v530_v14 = vsel %vm517_vm0, %v2729_v11, 0.0  ;;  %v533_v15 = vsel %vm517_vm0, %v2731_v12, 0.0  ;;  %v536_v18 = vsel %vm517_vm0, %v2737_v16, 0.0  ;;  %v539_v19 = vsel %vm517_vm0, %v2739_v17, 0.0 }
  0x18   : > { %522 = vadd.xlane.f32.xlu0 %v521_v9  ;;  %528 = vadd.xlane.f32.xlu1 %v527_v10  ;;  %v658_v10 = vld [vmem:[%s3280_s1 + $0x38] sm:$0xff] }
  0x1c   : > { %531 = vadd.xlane.f32.xlu0 %v530_v14  ;;  %534 = vadd.xlane.f32.xlu1 %v533_v15 }
  0x20   : > { %537 = vadd.xlane.f32.xlu0 %v536_v18  ;;  %540 = vadd.xlane.f32.xlu1 %v539_v19 }
  0xa1   : > { %v520_v21 = vpop.xlane.xlu0 %519  ;;  %v526_v22 = vpop.xlane.xlu1 %525 }
  0xa2   : > { %v543_v23 = vmul.f32 0.03125, %v520_v21  ;;  %v545_v24 = vmul.f32 0.03125, %v526_v22 }
  0xa4   : > { %v2746_v25 = vsub.f32 %v2713_v2, %v543_v23  ;;  %v2749_v26 = vsub.f32 %v2715_v3, %v545_v24 }
  0xa5   : > { %v523_v27 = vpop.xlane.xlu0 %522  ;;  %v529_v28 = vpop.xlane.xlu1 %528 }
  0xa6   : > { %v544_v29 = vmul.f32 0.03125, %v523_v27  ;;  %v546_v30 = vmul.f32 0.03125, %v529_v28  ;;  %v559_v31 = vmul.f32 %v2746_v25, %v2746_v25  ;;  %v561_v32 = vmul.f32 %v2749_v26, %v2749_v26 }
  0xa8   : > { %v2756_v33 = vsub.f32 %v2717_v4, %v544_v29  ;;  %v2759_v34 = vsub.f32 %v2719_v5, %v546_v30  ;;  %v567_v35 = vsel %vm517_vm0, %v559_v31, 0.0  ;;  %v573_v38 = vsel %vm517_vm0, %v561_v32, 0.0 }
  0xa9   : > { %568 = vadd.xlane.f32.xlu0 %v567_v35  ;;  %v532_v36 = vpop.xlane.xlu0 %531  ;;  %v535_v37 = vpop.xlane.xlu1 %534 }
  0xaa   : > { %v547_v39 = vmul.f32 0.03125, %v532_v36  ;;  %v548_v40 = vmul.f32 0.03125, %v535_v37  ;;  %v560_v41 = vmul.f32 %v2756_v33, %v2756_v33  ;;  %v562_v42 = vmul.f32 %v2759_v34, %v2759_v34 }
  0xac   : > { %v2768_v43 = vsub.f32 %v2729_v11, %v547_v39  ;;  %v2771_v44 = vsub.f32 %v2731_v12, %v548_v40  ;;  %v570_v45 = vsel %vm517_vm0, %v560_v41, 0.0  ;;  %v576_v48 = vsel %vm517_vm0, %v562_v42, 0.0 }
  0xad   : > { %574 = vadd.xlane.f32.xlu0 %v573_v38  ;;  %571 = vadd.xlane.f32.xlu1 %v570_v45  ;;  %v538_v46 = vpop.xlane.xlu0 %537  ;;  %v541_v1 = vpop.xlane.xlu1 %540  ;;  %v2150_v38 = vld [vmem:[%s3281_s2] ss:$0 sm:$0xff] }
  0xae   : > { %v549_v47 = vmul.f32 0.03125, %v538_v46  ;;  %v563_v49 = vmul.f32 %v2768_v43, %v2768_v43  ;;  %v564_v50 = vmul.f32 %v2771_v44, %v2771_v44  ;;  %v550_v6 = vmul.f32 0.03125, %v541_v1  ;;  %v2151_v46 = vld [vmem:[%s3282_s3] ss:$0 sm:$0xff] }
  0xb0   : > { %v2780_v51 = vsub.f32 %v2737_v16, %v549_v47  ;;  %v579_v52 = vsel %vm517_vm0, %v563_v49, 0.0  ;;  %v582_v53 = vsel %vm517_vm0, %v564_v50, 0.0  ;;  %v2815_v7 = vsub.f32 %v2739_v17, %v550_v6 }
  0xb1   : > { %577 = vadd.xlane.f32.xlu1 %v576_v48  ;;  %580 = vadd.xlane.f32.xlu0 %v579_v52 }
  0xb2   : > { %v565_v54 = vmul.f32 %v2780_v51, %v2780_v51  ;;  %v566_v8 = vmul.f32 %v2815_v7, %v2815_v7 }
  0xb4   : > { %v585_v55 = vsel %vm517_vm0, %v565_v54, 0.0  ;;  %v588_v9 = vsel %vm517_vm0, %v566_v8, 0.0 }
  0xb5   : > { %583 = vadd.xlane.f32.xlu1 %v582_v53  ;;  %586 = vadd.xlane.f32.xlu0 %v585_v55 }
  0xc6   : > { %666 = vperm.xlu1 %2455, %v652_v56  }
  0xca   : > { %671 = vperm.xlu1 %2455, %v653_v57  }
  0xcb   : > { %661 = vperm.xlu0 %2454, %v651_v58  }
  0xce   : > { %676 = vperm.xlu1 %2455, %v654_v59  }
  0xd2   : > { %681 = vperm.xlu1 %2455, %v655_v60  }
  0xd6   : > { %686 = vperm.xlu1 %2455, %v656_v62  }
  0xda   : > { %691 = vperm.xlu1 %2455, %v657_v0  }
  0xfe   : > { %589 = vadd.xlane.f32.xlu1 %v588_v9 }
 0x10f   : > { %696 = vperm.xlu1 %2455, %v658_v10  }
 0x136   : > { %v569_v13 = vpop.xlane.xlu0 %568 }
 0x137   : > { %v591_v14 = vmul.f32 0.03125, %v569_v13 }
 0x139   : > { %v599_v15 = vadd.f32 1e-05, %v591_v14 }
 0x13a   : > { %v572_v18 = vpop.xlane.xlu1 %571  ;;  %v575_v19 = vpop.xlane.xlu0 %574 }
 0x13b   : > { %2490 = vrsqrt.f32 %v599_v15  ;;  %v592_v20 = vmul.f32 0.03125, %v572_v18  ;;  %v593_v21 = vmul.f32 0.03125, %v575_v19 }
 0x13d   : > { %v600_v22 = vadd.f32 1e-05, %v592_v20  ;;  %v601_v23 = vadd.f32 1e-05, %v593_v21 }
 0x13e   : > { %v578_v24 = vpop.xlane.xlu1 %577  ;;  %v581_v27 = vpop.xlane.xlu0 %580 }
 0x13f   : > { %2492 = vrsqrt.f32 %v600_v22  ;;  %v594_v28 = vmul.f32 0.03125, %v578_v24  ;;  %v595_v29 = vmul.f32 0.03125, %v581_v27 }
 0x140   : > { %2494 = vrsqrt.f32 %v601_v23 }
 0x141   : > { %v602_v30 = vadd.f32 1e-05, %v594_v28  ;;  %v603_v31 = vadd.f32 1e-05, %v595_v29 }
 0x142   : > { %v584_v32 = vpop.xlane.xlu1 %583  ;;  %v587_v45 = vpop.xlane.xlu0 %586 }
 0x143   : > { %2496 = vrsqrt.f32 %v602_v30  ;;  %v596_v35 = vmul.f32 0.03125, %v584_v32  ;;  %v597_v22 = vmul.f32 0.03125, %v587_v45 }
 0x144   : > { %2498 = vrsqrt.f32 %v603_v31 }
 0x145   : > { %v2491_v36 = vpop.eup %2490  ;;  %v604_v37 = vadd.f32 1e-05, %v596_v35  ;;  %v605_v23 = vadd.f32 1e-05, %v597_v22 }
 0x146   : > { %v667_v39 = vpop.permute.xlu1 %666  ;;  %v615_v40 = vmul.f32 %v2491_v36, %v2746_v25 }
 0x147   : > { %2500 = vrsqrt.f32 %v604_v37 }
 0x148   : > { %v629_v41 = vmul.f32 %v2150_v38, %v615_v40  ;;  %2502 = vrsqrt.f32 %v605_v23 }
 0x149   : > { %v2493_v42 = vpop.eup %2492 }
 0x14a   : > { %v2495_v47 = vpop.eup %2494  ;;  %v616_v48 = vmul.f32 %v2493_v42, %v2756_v33  ;;  %v672_v49 = vpop.permute.xlu1 %671  ;;  %v643_v53 = vadd.f32 %v2151_v46, %v629_v41 }
 0x14b   : > { %v617_v50 = vmul.f32 %v2495_v47, %v2749_v26  ;;  %v662_v56 = vpop.permute.xlu0 %661 }
 0x14c   : > { %v630_v52 = vmul.f32 %v2150_v38, %v616_v48  ;;  %v699_v63 = vmul.f32 %v662_v56, %v643_v53  ;;  %v2152_v48 = vld [vmem:[%s3284_s5] ss:$0 sm:$0xff] }
 0x14d   : > { %v2497_v54 = vpop.eup %2496  ;;  %v631_v55 = vmul.f32 %v2150_v38, %v617_v50 }
 0x14e   : > { %v2499_v25 = vpop.eup %2498  ;;  %v644_v57 = vadd.f32 %v2151_v46, %v630_v52  ;;  %v618_v58 = vmul.f32 %v2497_v54, %v2759_v34  ;;  %v677_v59 = vpop.permute.xlu1 %676 }
 0x14f   : > { %v619_v60 = vmul.f32 %v2499_v25, %v2768_v43  ;;  %v645_v62 = vadd.f32 %v2151_v46, %v631_v55 }
 0x150   : > { %v700_v61 = vmul.f32 %v667_v39, %v644_v57  ;;  %v632_v0 = vmul.f32 %v2150_v38, %v618_v58 }
 0x151   : > { %v2501_v33 = vpop.eup %2500  ;;  %v633_v1 = vmul.f32 %v2150_v38, %v619_v60  ;;  %v701_v10 = vmul.f32 %v672_v49, %v645_v62 }
 0x152   : > { %v646_v6 = vadd.f32 %v2151_v46, %v632_v0  ;;  %v682_v26 = vpop.permute.xlu1 %681  ;;  %v707_v8 = vpack.c.bf16 %v700_v61, %v699_v63  ;;  %v620_v9 = vmul.f32 %v2501_v33, %v2771_v44  ;;  %v2503_v29 = vpop.eup %2502 }
 0x153   : > { %v647_v14 = vadd.f32 %v2151_v46, %v633_v1  ;;  %v621_v30 = vmul.f32 %v2503_v29, %v2780_v51 }
 0x154   : > { %v702_v13 = vmul.f32 %v677_v59, %v646_v6  ;;  %2311 = vmatprep.mubr.msk.bf16.mxu0 %vm517_vm0, %v707_v8  ;;  %v634_v34 = vmul.f32 %v2150_v38, %v620_v9 }
 0x155   : > { %v703_v19 = vmul.f32 %v682_v26, %v647_v14  ;;  %v635_v32 = vmul.f32 %v2150_v38, %v621_v30 }
 0x156   : > { %v708_v15 = vpack.c.bf16 %v702_v13, %v701_v10  ;;  %v648_v18 = vadd.f32 %v2151_v46, %v634_v34  ;;  %v687_v43 = vpop.permute.xlu1 %686 }
 0x157   : > { %v649_v37 = vadd.f32 %v2151_v46, %v635_v32 }
 0x158   : > { %v704_v20 = vmul.f32 %v687_v43, %v648_v18  ;;  %2312 = vmatmul.mubr.msk.bf16.vlgmr.msra.gmra.mrb[0].mxu0 %vm517_vm0, %v708_v15  ;;  %v927_v18 = vld [vmem:[%s3287_s8 + $0x10] sm:$0xff] }
 0x15a   : > { %v709_v21 = vpack.c.bf16 %v704_v20, %v703_v19  ;;  %v692_v24 = vpop.permute.xlu1 %691  ;;  %v925_v20 = vld [vmem:[%s3287_s8] sm:$0xff] }
 0x15b   : > { %v705_v41 = vmul.f32 %v692_v24, %v649_v37 }
 0x15c   : > { %2315 = vmatprep.mubr.msk.bf16.mxu0 %vm517_vm0, %v709_v21 }
 0x18b   : > { %v590_v44 = vpop.xlane.xlu1 %589 }
 0x18c   : > { %v598_v27 = vmul.f32 0.03125, %v590_v44 }
 0x18e   : > { %v606_v28 = vadd.f32 1e-05, %v598_v27  ;;  %v926_v27 = vld [vmem:[%s3287_s8 + $0x8] sm:$0xff] }
 0x18f   : > { %v697_v40 = vpop.permute.xlu1 %696 }
 0x190   : > { %2504 = vrsqrt.f32 %v606_v28  ;;  %v928_v28 = vld [vmem:[%s3287_s8 + $0x18] sm:$0xff] }
 0x19a   : > { %v2505_v31 = vpop.eup %2504 }
 0x19b   : > { %v622_v35 = vmul.f32 %v2505_v31, %v2815_v7 }
 0x19d   : > { %v636_v36 = vmul.f32 %v2150_v38, %v622_v35 }
 0x19f   : > { %v650_v39 = vadd.f32 %v2151_v46, %v636_v36 }
 0x1a1   : > { %v706_v42 = vmul.f32 %v697_v40, %v650_v39  ;;  %v931_v40 = vld [vmem:[%s3287_s8 + $0x30] sm:$0xff] }
 0x1a3   : > { %v710_v45 = vpack.c.bf16 %v706_v42, %v705_v41 }
 0x1a5   : > { %2316 = vmatmul.mubr.msk.bf16.gmra.mrb[4].mxu0 %vm517_vm0, %v710_v45 }
 0x22b   : > { %v2313_v47 = vpop.f32.mrb[0].mxu0 }
 0x22c   : > { %v780_v49 = vpop.f32.mrb[1].mxu0  ;;  %v789_v50 = vadd.f32 %v2313_v47, %v2152_v48 }
 0x22d   : > { %v2314_v51 = vpop.f32.mrb[2].mxu0  ;;  %v781_v7 = vadd.f32 %v2152_v48, %v780_v49  ;;  %v932_v49 = vld [vmem:[%s3287_s8 + $0x38] sm:$0xff] }
 0x22e   : > { %v792_v52 = vadd.f32 %v2314_v51, %v2152_v48  ;;  %v783_v53 = vpop.f32.mrb[3].mxu0  ;;  %v929_v51 = vld [vmem:[%s3287_s8 + $0x20] sm:$0xff] }
 0x22f   : > { %v784_v38 = vadd.f32 %v2152_v48, %v783_v53 }
 0x230   : > { %v2844_v54 = vpack.c.bf16 %v792_v52, %v789_v50 }
 0x231   : > { %v2846_v46 = vpack.c.bf16 %v784_v38, %v781_v7  ;;  %v930_v38 = vld [vmem:[%s3287_s8 + $0x28] sm:$0xff] }
 0x232   : > { %821 = vrot.lane.b32.xlu0 %v2844_v54, %s2611_s27 }
 0x233   : > { %819 = vrot.lane.b32.xlu1 %v2846_v46, %s2611_s27  ;;  %2327 = vmatprep.mubr.msk.bf16.mxu1 %vm827_vm1, %v2846_v46 }
 0x278   : > { %v2317_v55 = vpop.f32.mrb[4].mxu0 }
 0x279   : > { %v796_v56 = vpop.f32.mrb[5].mxu0  ;;  %v805_v57 = vadd.f32 %v2317_v55, %v2152_v48 }
 0x27a   : > { %v2318_v25 = vpop.f32.mrb[6].mxu0  ;;  %v797_v60 = vadd.f32 %v2152_v48, %v796_v56 }
 0x27b   : > { %v808_v58 = vadd.f32 %v2318_v25, %v2152_v48  ;;  %v799_v59 = vpop.f32.mrb[7].mxu0 }
 0x27c   : > { %v800_v61 = vadd.f32 %v2152_v48, %v799_v59 }
 0x27d   : > { %v2852_v62 = vpack.c.bf16 %v808_v58, %v805_v57 }
 0x27e   : > { %v2854_v63 = vpack.c.bf16 %v800_v61, %v797_v60 }
 0x27f   : > { %825 = vrot.lane.b32.xlu0 %v2852_v62, %s2611_s27 }
 0x280   : > { %823 = vrot.lane.b32.xlu1 %v2854_v63, %s2611_s27  ;;  %s2615_s27 = smov 48  }
 0x283   : > { %1034 = vrot.lane.b32.xlu0 %v2846_v46, %s2612_s28 }
 0x284   : > { %1036 = vrot.lane.b32.xlu1 %v2844_v54, %s2612_s28 }
 0x288   : > { %1038 = vrot.lane.b32.xlu1 %v2854_v63, %s2612_s28 }
 0x2a4   : > { %v822_v1 = vpop.permute.xlu0 %821 }
 0x2a5   : > { %v820_v0 = vpop.permute.xlu1 %819  ;;  %v844_v6 = vsel %vm827_vm1, %v822_v1, 0 }
 0x2a6   : > { %2431 = vmatprep.subr.msk.bf16.mxu1 %vm827_vm1, %v820_v0  ;;  %v841_v33 = vsel %vm827_vm1, %v820_v0, 0 }
 0x2a7   : > { %2320 = vmatpush3.bf16.xpose.msra.mxu1 %v841_v33 }
 0x2a8   : > { %2432 = vmatprep.subr.msk.bf16.mxu1 %vm827_vm1, %v822_v1 }
 0x2af   : > { %2322 = vmatpush3.bf16.xpose.msra.mxu1 %v844_v6 }
 0x2f1   : > { %v826_v26 = vpop.permute.xlu0 %825 }
 0x2f2   : > { %v824_v8 = vpop.permute.xlu1 %823  ;;  %v850_v34 = vsel %vm827_vm1, %v826_v26, 0 }
 0x2f3   : > { %2433 = vmatprep.subr.msk.bf16.mxu1 %vm827_vm1, %v824_v8  ;;  %v847_v9 = vsel %vm827_vm1, %v824_v8, 0 }
 0x2f4   : > { %2324 = vmatpush3.bf16.xpose.msra.mxu1 %v847_v9 }
 0x2f5   : > { %v1035_v10 = vpop.permute.xlu0 %1034  ;;  %2434 = vmatprep.subr.msk.bf16.mxu1 %vm827_vm1, %v826_v26 }
 0x2f6   : > { %2335 = vmatprep.subr.bf16.mxu0 %v1035_v10  ;;  %v1037_v13 = vpop.permute.xlu1 %1036 }
 0x2f7   : > { %2336 = vmatpush3.bf16.msra.mxu0 %v1035_v10 }
 0x2f8   : > { %2337 = vmatprep.subr.bf16.mxu0 %v1037_v13 }
 0x2fa   : > { %v1039_v14 = vpop.permute.xlu1 %1038 }
 0x2fb   : > { %2338 = vmatpush3.bf16.msra.mxu0 %v1037_v13 }
 0x2fc   : > { %2326 = vmatpush3.bf16.xpose.msra.mxu1 %v850_v34  ;;  %2339 = vmatprep.subr.bf16.mxu0 %v1039_v14 }
 0x2ff   : > { %2340 = vmatpush3.bf16.msra.mxu0 %v1039_v14 }
 0x303   : > { %2328 = vmatmul.mubr.msk.bf16.vlgmr.msra.gmra.mrb[0].mxu1 %vm827_vm1, %v2844_v54 }
 0x304   : > { %2331 = vmatprep.mubr.msk.bf16.mxu1 %vm827_vm1, %v2854_v63 }
 0x30b   : > { %2332 = vmatmul.mubr.msk.bf16.gmra.mrb[4].mxu1 %vm827_vm1, %v2852_v62 }
 0x3d6   : > { %v2329_v15 = vpop.f32.mrb[0].mxu1 }
 0x3d7   : > { %v919_v43 = vmul.f32 0.25, %v2329_v15  ;;  %v886_v19 = vpop.f32.mrb[1].mxu1 }
 0x3d8   : > { %v917_v21 = vmul.f32 0.25, %v886_v19  ;;  %v2330_v22 = vpop.f32.mrb[2].mxu1 }
 0x3d9   : > { %v920_v23 = vmul.f32 0.25, %v2330_v22  ;;  %v889_v24 = vpop.f32.mrb[3].mxu1  ;;  %v935_v44 = vadd.f32 %v927_v18, %v919_v43 }
 0x3da   : > { %v918_v29 = vmul.f32 0.25, %v889_v24  ;;  %v933_v30 = vadd.f32 %v925_v20, %v917_v21 }
 0x3db   : > { %v948_v31 = vsel %vm941_vm2, %v935_v44, -inf  ;;  %v936_v36 = vadd.f32 %v928_v28, %v920_v23 }
 0x3dc   : > { %949 = vmax.xlane.f32.xlu0 %v948_v31  ;;  %v942_v32 = vsel %vm941_vm2, %v933_v30, -inf  ;;  %v934_v35 = vadd.f32 %v926_v27, %v918_v29 }
 0x3dd   : > { %943 = vmax.xlane.f32.xlu1 %v942_v32  ;;  %v951_v48 = vsel %vm941_vm2, %v936_v36, -inf }
 0x3de   : > { %v2333_v37 = vpop.f32.mrb[4].mxu1  ;;  %v945_v39 = vsel %vm941_vm2, %v934_v35, -inf }
 0x3df   : > { %v923_v41 = vmul.f32 0.25, %v2333_v37  ;;  %v902_v42 = vpop.f32.mrb[5].mxu1 }
 0x3e0   : > { %v921_v45 = vmul.f32 0.25, %v902_v42  ;;  %946 = vmax.xlane.f32.xlu0 %v945_v39  ;;  %v2334_v47 = vpop.f32.mrb[6].mxu1 }
 0x3e1   : > { %v924_v50 = vmul.f32 0.25, %v2334_v47  ;;  %952 = vmax.xlane.f32.xlu1 %v951_v48  ;;  %v905_v52 = vpop.f32.mrb[7].mxu1  ;;  %v939_v53 = vadd.f32 %v931_v40, %v923_v41 }
 0x3e2   : > { %v922_v7 = vmul.f32 0.25, %v905_v52  ;;  %v937_v25 = vadd.f32 %v929_v51, %v921_v45 }
 0x3e3   : > { %v960_v55 = vsel %vm941_vm2, %v939_v53, -inf  ;;  %v940_v56 = vadd.f32 %v932_v49, %v924_v50 }
 0x3e4   : > { %961 = vmax.xlane.f32.xlu0 %v960_v55  ;;  %v938_v58 = vadd.f32 %v930_v38, %v922_v7  ;;  %v954_v59 = vsel %vm941_vm2, %v937_v25, -inf }
 0x3e5   : > { %v963_v57 = vsel %vm941_vm2, %v940_v56, -inf }
 0x3e6   : > { %964 = vmax.xlane.f32.xlu1 %v963_v57  ;;  %v957_v60 = vsel %vm941_vm2, %v938_v58, -inf }
 0x3e8   : > { %955 = vmax.xlane.f32.xlu0 %v954_v59 }
 0x3ea   : > { %958 = vmax.xlane.f32.xlu1 %v957_v60 }
 0x3fb   : > { %1133 = vrot.lane.b32.xlu1 %v2844_v54, %s2613_s22 }
 0x3fe   : > { %1040 = vrot.lane.b32.xlu0 %v2852_v62, %s2612_s28  ;;  %s2614_s28 = smov 112  }
 0x469   : > { %v950_v61 = vpop.xlane.xlu0 %949 }
 0x46a   : > { %v968_v0 = vsub.f32 %v935_v44, %v950_v61  ;;  %v944_v33 = vpop.xlane.xlu1 %943 }
 0x46b   : > { %v966_v1 = vsub.f32 %v933_v30, %v944_v33 }
 0x46c   : > { %v978_v6 = vmul.f32 1.442695, %v968_v0 }
 0x46d   : > { %v974_v26 = vmul.f32 1.442695, %v966_v1  ;;  %v947_v8 = vpop.xlane.xlu0 %946 }
 0x46e   : > { %2506 = vpow2.f32 %v978_v6  ;;  %v967_v9 = vsub.f32 %v934_v35, %v947_v8  ;;  %v953_v10 = vpop.xlane.xlu1 %952 }
 0x46f   : > { %v969_v13 = vsub.f32 %v936_v36, %v953_v10  ;;  %2508 = vpow2.f32 %v974_v26 }
 0x470   : > { %v976_v14 = vmul.f32 1.442695, %v967_v9 }
 0x471   : > { %v980_v34 = vmul.f32 1.442695, %v969_v13  ;;  %v962_v15 = vpop.xlane.xlu0 %961 }
 0x472   : > { %v972_v29 = vsub.f32 %v939_v53, %v962_v15 }
 0x473   : > { %2510 = vpow2.f32 %v980_v34  ;;  %v965_v28 = vpop.xlane.xlu1 %964 }
 0x474   : > { %2512 = vpow2.f32 %v976_v14  ;;  %v986_v31 = vmul.f32 1.442695, %v972_v29  ;;  %v973_v37 = vsub.f32 %v940_v56, %v965_v28 }
 0x475   : > { %v956_v18 = vpop.xlane.xlu0 %955 }
 0x476   : > { %v970_v35 = vsub.f32 %v937_v25, %v956_v18  ;;  %2514 = vpow2.f32 %v986_v31  ;;  %v988_v40 = vmul.f32 1.442695, %v973_v37 }
 0x477   : > { %v959_v30 = vpop.xlane.xlu1 %958 }
 0x478   : > { %v2914_v43 = vpop.eup %2506  ;;  %v971_v32 = vsub.f32 %v938_v58, %v959_v30  ;;  %v982_v39 = vmul.f32 1.442695, %v970_v35 }
 0x479   : > { %v1041_v19 = vpop.permute.xlu0 %1040  ;;  %v996_v20 = vsel %vm941_vm2, %v2914_v43, 0.0  ;;  %v2509_v21 = vpop.eup %2508 }
 0x47a   : > { %997 = vadd.xlane.f32.xlu0 %v996_v20  ;;  %2341 = vmatprep.subr.bf16.mxu0 %v1041_v19  ;;  %v990_v23 = vsel %vm941_vm2, %v2509_v21, 0.0  ;;  %v984_v36 = vmul.f32 1.442695, %v971_v32 }
 0x47b   : > { %2342 = vmatpush3.bf16.msra.mxu0 %v1041_v19  ;;  %v1134_v53 = vpop.permute.xlu1 %1133 }
 0x47c   : > { %2516 = vpow2.f32 %v984_v36  ;;  %v1155_v8 = vsel %vm827_vm1, %v1134_v53, 0 }
 0x47d   : > { %v2511_v22 = vpop.eup %2510  ;;  %2518 = vpow2.f32 %v982_v39 }
 0x47e   : > { %991 = vadd.xlane.f32.xlu0 %v990_v23  ;;  %v999_v24 = vsel %vm941_vm2, %v2511_v22, 0.0  ;;  %v2513_v44 = vpop.eup %2512  ;;  %2520 = vpow2.f32 %v988_v40 }
 0x47f   : > { %1000 = vadd.xlane.f32.xlu1 %v999_v24  ;;  %v993_v27 = vsel %vm941_vm2, %v2513_v44, 0.0 }
 0x480   : > { %v2925_v41 = vpop.eup %2514 }
 0x481   : > { %v1008_v42 = vsel %vm941_vm2, %v2925_v41, 0.0 }
 0x483   : > { %994 = vadd.xlane.f32.xlu1 %v993_v27 }
 0x486   : > { %v2517_v45 = vpop.eup %2516 }
 0x487   : > { %v2519_v47 = vpop.eup %2518  ;;  %v1005_v48 = vsel %vm941_vm2, %v2517_v45, 0.0 }
 0x488   : > { %v1002_v49 = vsel %vm941_vm2, %v2519_v47, 0.0  ;;  %v2931_v51 = vpop.eup %2520 }
 0x489   : > { %v1011_v50 = vsel %vm941_vm2, %v2931_v51, 0.0 }
 0x494   : > { %1131 = vrot.lane.b32.xlu0 %v2846_v46, %s2613_s22  ;;  %1135 = vrot.lane.b32.xlu1 %v2854_v63, %s2613_s22 }
 0x4b3   : > { %1009 = vadd.xlane.f32.xlu0 %v1008_v42 }
 0x4b7   : > { %1006 = vadd.xlane.f32.xlu0 %v1005_v48 }
 0x4b8   : > { %1003 = vadd.xlane.f32.xlu1 %v1002_v49 }
 0x4bc   : > { %1012 = vadd.xlane.f32.xlu1 %v1011_v50 }
 0x4cd   : > { %1123 = vrot.lane.b32.xlu1 %v2846_v46, %s2614_s28  ;;  %1137 = vrot.lane.b32.xlu0 %v2852_v62, %s2613_s22 }
 0x4d1   : > { %1127 = vrot.lane.b32.xlu1 %v2854_v63, %s2614_s28  ;;  %1125 = vrot.lane.b32.xlu0 %v2844_v54, %s2614_s28 }
 0x4d5   : > { %1129 = vrot.lane.b32.xlu0 %v2852_v62, %s2614_s28 }
 0x507   : > { %v998_v52 = vpop.xlane.xlu0 %997 }
 0x50b   : > { %v992_v7 = vpop.xlane.xlu0 %991 }
 0x50c   : > { %v1001_v38 = vpop.xlane.xlu1 %1000 }
 0x50d   : > { %2522 = vrcp.f32 %v1001_v38 }
 0x50e   : > { %2524 = vrcp.f32 %v992_v7 }
 0x50f   : > { %v1132_v55 = vpop.permute.xlu0 %1131  ;;  %2526 = vrcp.f32 %v998_v52 }
 0x510   : > { %2435 = vmatprep.subr.msk.bf16.mxu0 %vm827_vm1, %v1132_v55  ;;  %v995_v56 = vpop.xlane.xlu1 %994  ;;  %v1152_v26 = vsel %vm827_vm1, %v1132_v55, 0  ;;  %v2172_v55 = vld [vmem:[%s3287_s8 + $0x48] sm:$0xff] }
 0x511   : > { %2528 = vrcp.f32 %v995_v56  ;;  %v2174_v56 = vld [vmem:[%s3287_s8 + $0x58] sm:$0xff] }
 0x514   : > { %v1136_v9 = vpop.permute.xlu1 %1135 }
 0x515   : > { %v1158_v10 = vsel %vm827_vm1, %v1136_v9, 0 }
 0x517   : > { %v2523_v25 = vpop.eup %2522 }
 0x518   : > { %v2525_v57 = vpop.eup %2524  ;;  %v1021_v60 = vmul.f32 %v2523_v25, %v2511_v22 }
 0x519   : > { %v2527_v58 = vpop.eup %2526  ;;  %v1015_v61 = vmul.f32 %v2525_v57, %v2509_v21 }
 0x51a   : > { %v1019_v33 = vmul.f32 %v2527_v58, %v2914_v43  ;;  %v2173_v58 = vld [vmem:[%s3287_s8 + $0x50] sm:$0xff] }
 0x51b   : > { %v2529_v59 = vpop.eup %2528 }
 0x51c   : > { %v1017_v0 = vmul.f32 %v2529_v59, %v2513_v44  ;;  %v1031_v6 = vpack.c.bf16 %v1021_v60, %v1019_v33 }
 0x51e   : > { %v1030_v1 = vpack.c.bf16 %v1017_v0, %v1015_v61 }
 0x520   : > { %2343 = vmatprep.mubr.msk.bf16.mxu0 %vm941_vm2, %v1030_v1 }
 0x521   : > { %2344 = vmatmul.mubr.msk.bf16.vlgmr.msra.gmra.mrb[8].mxu0 %vm941_vm2, %v1031_v6 }
 0x522   : > { %2352 = vmatpush3.bf16.xpose.msra.mxu0 %v1152_v26  ;;  %v2175_v26 = vld [vmem:[%s3287_s8 + $0x60] sm:$0xff] }
 0x523   : > { %2436 = vmatprep.subr.msk.bf16.mxu0 %vm827_vm1, %v1134_v53 }
 0x52a   : > { %2354 = vmatpush3.bf16.xpose.msra.mxu0 %v1155_v8 }
 0x52b   : > { %2437 = vmatprep.subr.msk.bf16.mxu0 %vm827_vm1, %v1136_v9 }
 0x532   : > { %2356 = vmatpush3.bf16.xpose.msra.mxu0 %v1158_v10 }
 0x540   : > { %v1010_v13 = vpop.xlane.xlu0 %1009 }
 0x544   : > { %v1007_v14 = vpop.xlane.xlu0 %1006 }
 0x545   : > { %2530 = vrcp.f32 %v1007_v14  ;;  %v1004_v34 = vpop.xlane.xlu1 %1003 }
 0x546   : > { %2532 = vrcp.f32 %v1004_v34  ;;  %v2176_v34 = vld [vmem:[%s3287_s8 + $0x68] sm:$0xff] }
 0x547   : > { %2534 = vrcp.f32 %v1010_v13 }
 0x548   : > { %v1138_v15 = vpop.permute.xlu0 %1137 }
 0x549   : > { %v1161_v18 = vsel %vm827_vm1, %v1138_v15, 0  ;;  %2438 = vmatprep.subr.msk.bf16.mxu0 %vm827_vm1, %v1138_v15  ;;  %v1013_v43 = vpop.xlane.xlu1 %1012 }
 0x54a   : > { %2536 = vrcp.f32 %v1013_v43  ;;  %2358 = vmatpush3.bf16.xpose.msra.mxu0 %v1161_v18 }
 0x54c   : > { %v1126_v31 = vpop.permute.xlu0 %1125 }
 0x54d   : > { %v1124_v30 = vpop.permute.xlu1 %1123 }
 0x54f   : > { %v2531_v19 = vpop.eup %2530 }
 0x550   : > { %v2533_v20 = vpop.eup %2532  ;;  %v1025_v21 = vmul.f32 %v2531_v19, %v2517_v45  ;;  %v1130_v35 = vpop.permute.xlu0 %1129 }
 0x551   : > { %v1023_v22 = vmul.f32 %v2533_v20, %v2519_v47  ;;  %v2535_v23 = vpop.eup %2534  ;;  %v1128_v32 = vpop.permute.xlu1 %1127  ;;  %v2177_v20 = vld [vmem:[%s3287_s8 + $0x70] sm:$0xff] }
 0x552   : > { %v1027_v27 = vmul.f32 %v2535_v23, %v2925_v41 }
 0x553   : > { %v1032_v24 = vpack.c.bf16 %v1025_v21, %v1023_v22  ;;  %v2178_v21 = vld [vmem:[%s3287_s8 + $0x78] sm:$0xff] }
 0x554   : > { %v2537_v44 = vpop.eup %2536 }
 0x555   : > { %2347 = vmatprep.mubr.msk.bf16.mxu0 %vm941_vm2, %v1032_v24  ;;  %v1029_v28 = vmul.f32 %v2537_v44, %v2931_v51  ;;  %v2171_v51 = vld [vmem:[%s3287_s8 + $0x40] sm:$0xff] }
 0x557   : > { %v1033_v29 = vpack.c.bf16 %v1029_v28, %v1027_v27 }
 0x559   : > { %2348 = vmatmul.mubr.msk.bf16.gmra.mrb[12].mxu0 %vm941_vm2, %v1033_v29 }
 0x55a   : > { %2359 = vmatprep.mubr.msk.bf16.mxu0 %vm827_vm1, %v1124_v30 }
 0x561   : > { %2360 = vmatmul.mubr.msk.bf16.vlgmr.msra.gmra.mrb[16].mxu0 %vm827_vm1, %v1126_v31 }
 0x562   : > { %2363 = vmatprep.mubr.msk.bf16.mxu0 %vm827_vm1, %v1128_v32 }
 0x569   : > { %2364 = vmatmul.mubr.msk.bf16.gmra.mrb[20].mxu0 %vm827_vm1, %v1130_v35 }
 0x5f4   : > { %v2960_v36 = vpop.f32.mrb[8].mxu0 }
 0x5f5   : > { %v2962_v37 = vpop.f32.mrb[9].mxu0 }
 0x5f6   : > { %v2964_v39 = vpop.f32.mrb[10].mxu0 }
 0x5f7   : > { %v2966_v40 = vpop.f32.mrb[11].mxu0 }
 0x62c   : > { %v2968_v41 = vpop.f32.mrb[12].mxu0 }
 0x62d   : > { %v2970_v42 = vpop.f32.mrb[13].mxu0 }
 0x62e   : > { %v2972_v45 = vpop.f32.mrb[14].mxu0 }
 0x62f   : > { %v2974_v47 = vpop.f32.mrb[15].mxu0 }
 0x634   : > { %v2361_v48 = vpop.f32.mrb[16].mxu0 }
 0x635   : > { %v1197_v49 = vpop.f32.mrb[17].mxu0  ;;  %v1230_v53 = vmul.f32 0.25, %v2361_v48 }
 0x636   : > { %v1228_v50 = vmul.f32 0.25, %v1197_v49  ;;  %v2362_v52 = vpop.f32.mrb[18].mxu0 }
 0x637   : > { %v1231_v7 = vmul.f32 0.25, %v2362_v52  ;;  %v1200_v38 = vpop.f32.mrb[19].mxu0  ;;  %v1247_v0 = vadd.f32 %v2173_v58, %v1230_v53 }
 0x638   : > { %v1229_v25 = vmul.f32 0.25, %v1200_v38  ;;  %v1245_v57 = vadd.f32 %v2171_v51, %v1228_v50 }
 0x639   : > { %v1248_v61 = vadd.f32 %v2174_v56, %v1231_v7  ;;  %v1259_v14 = vsel %vm941_vm2, %v1247_v0, -inf }
 0x63a   : > { %v1253_v59 = vsel %vm941_vm2, %v1245_v57, -inf  ;;  %v1246_v60 = vadd.f32 %v2172_v55, %v1229_v25 }
 0x63b   : > { %1254 = vmax.xlane.f32.xlu1 %v1253_v59  ;;  %v1262_v10 = vsel %vm941_vm2, %v1248_v61, -inf }
 0x63c   : > { %v2365_v33 = vpop.f32.mrb[20].mxu0  ;;  %v1256_v1 = vsel %vm941_vm2, %v1246_v60, -inf }
 0x63d   : > { %1257 = vmax.xlane.f32.xlu0 %v1256_v1  ;;  %v1213_v6 = vpop.f32.mrb[21].mxu0  ;;  %v1234_v15 = vmul.f32 0.25, %v2365_v33 }
 0x63e   : > { %v1232_v8 = vmul.f32 0.25, %v1213_v6  ;;  %v2366_v9 = vpop.f32.mrb[22].mxu0 }
 0x63f   : > { %1263 = vmax.xlane.f32.xlu1 %v1262_v10  ;;  %v1216_v13 = vpop.f32.mrb[23].mxu0  ;;  %v1235_v18 = vmul.f32 0.25, %v2366_v9  ;;  %v1251_v44 = vadd.f32 %v2177_v20, %v1234_v15 }
 0x640   : > { %v1233_v43 = vmul.f32 0.25, %v1216_v13  ;;  %v1249_v19 = vadd.f32 %v2175_v26, %v1232_v8 }
 0x641   : > { %1260 = vmax.xlane.f32.xlu0 %v1259_v14  ;;  %v1252_v27 = vadd.f32 %v2178_v21, %v1235_v18  ;;  %v1271_v28 = vsel %vm941_vm2, %v1251_v44, -inf }
 0x642   : > { %v1250_v22 = vadd.f32 %v2176_v34, %v1233_v43  ;;  %v1265_v23 = vsel %vm941_vm2, %v1249_v19, -inf }
 0x643   : > { %v1274_v29 = vsel %vm941_vm2, %v1252_v27, -inf }
 0x644   : > { %v1268_v24 = vsel %vm941_vm2, %v1250_v22, -inf }
 0x645   : > { %1266 = vmax.xlane.f32.xlu0 %v1265_v23  ;;  %1269 = vmax.xlane.f32.xlu1 %v1268_v24 }
 0x649   : > { %1272 = vmax.xlane.f32.xlu0 %v1271_v28  ;;  %1275 = vmax.xlane.f32.xlu1 %v1274_v29 }
 0x65a   : > { %1347 = vrot.lane.b32.xlu1 %v2844_v54, %s2615_s27 }
 0x65f   : > { %1345 = vrot.lane.b32.xlu0 %v2846_v46, %s2615_s27 }
 0x6c8   : > { %v1255_v30 = vpop.xlane.xlu1 %1254 }
 0x6c9   : > { %v1277_v48 = vsub.f32 %v1245_v57, %v1255_v30 }
 0x6ca   : > { %v1258_v31 = vpop.xlane.xlu0 %1257 }
 0x6cb   : > { %v1278_v32 = vsub.f32 %v1246_v60, %v1258_v31  ;;  %v1285_v7 = vmul.f32 1.442695, %v1277_v48 }
 0x6cc   : > { %v1264_v35 = vpop.xlane.xlu1 %1263 }
 0x6cd   : > { %v1280_v49 = vsub.f32 %v1248_v61, %v1264_v35  ;;  %v1287_v51 = vmul.f32 1.442695, %v1278_v32 }
 0x6ce   : > { %v1261_v50 = vpop.xlane.xlu0 %1260 }
 0x6cf   : > { %v1291_v52 = vmul.f32 1.442695, %v1280_v49  ;;  %v1279_v53 = vsub.f32 %v1247_v0, %v1261_v50 }
 0x6d1   : > { %2538 = vpow2.f32 %v1291_v52  ;;  %v1289_v38 = vmul.f32 1.442695, %v1279_v53 }
 0x6d2   : > { %2540 = vpow2.f32 %v1287_v51  ;;  %v1267_v55 = vpop.xlane.xlu0 %1266  ;;  %v1270_v56 = vpop.xlane.xlu1 %1269 }
 0x6d3   : > { %2542 = vpow2.f32 %v1289_v38  ;;  %v1281_v54 = vsub.f32 %v1249_v19, %v1267_v55  ;;  %v1282_v46 = vsub.f32 %v1250_v22, %v1270_v56 }
 0x6d4   : > { %2544 = vpow2.f32 %v1285_v7 }
 0x6d5   : > { %v1293_v57 = vmul.f32 1.442695, %v1281_v54  ;;  %v1295_v1 = vmul.f32 1.442695, %v1282_v46 }
 0x6d6   : > { %v1273_v25 = vpop.xlane.xlu0 %1272  ;;  %v1276_v58 = vpop.xlane.xlu1 %1275 }
 0x6d7   : > { %v1283_v59 = vsub.f32 %v1251_v44, %v1273_v25  ;;  %v1284_v60 = vsub.f32 %v1252_v27, %v1276_v58 }
 0x6d9   : > { %v1297_v61 = vmul.f32 1.442695, %v1283_v59  ;;  %v1299_v33 = vmul.f32 1.442695, %v1284_v60 }
 0x6da   : > { %v1346_v6 = vpop.permute.xlu0 %1345  ;;  %v1348_v8 = vpop.permute.xlu1 %1347 }
 0x6db   : > { %v3012_v0 = vpop.eup %2538  ;;  %2546 = vpow2.f32 %v1297_v61  ;;  %2367 = vmatprep.subr.bf16.mxu0 %v1346_v6 }
 0x6dc   : > { %v2541_v26 = vpop.eup %2540  ;;  %2548 = vpow2.f32 %v1299_v33  ;;  %2368 = vmatpush3.bf16.msra.mxu0 %v1346_v6  ;;  %v1310_v9 = vsel %vm941_vm2, %v3012_v0, 0.0  ;;  %v2478_v6 = vld [vmem:[%s3285_s6] sm:$0xff]  }
 0x6dd   : > { %v2543_v10 = vpop.eup %2542  ;;  %2550 = vpow2.f32 %v1293_v57  ;;  %1311 = vadd.xlane.f32.xlu1 %v1310_v9  ;;  %2369 = vmatprep.subr.bf16.mxu0 %v1348_v8  ;;  %v1304_v34 = vsel %vm941_vm2, %v2541_v26, 0.0 }
 0x6de   : > { %2552 = vpow2.f32 %v1295_v1  ;;  %v1307_v13 = vsel %vm941_vm2, %v2543_v10, 0.0  ;;  %v2545_v14 = vpop.eup %2544  ;;  %2383 = vmatprep.subr.bf16.mxu1 %v2478_v6 }
 0x6df   : > { %1308 = vadd.xlane.f32.xlu0 %v1307_v13  ;;  %v1301_v15 = vsel %vm941_vm2, %v2545_v14, 0.0  ;;  %2384 = vmatpush3.bf16.msra.mxu1 %v2478_v6 }
 0x6e0   : > { %2370 = vmatpush3.bf16.msra.mxu0 %v1348_v8 }
 0x6e1   : > { %1305 = vadd.xlane.f32.xlu1 %v1304_v34 }
 0x6e3   : > { %1302 = vadd.xlane.f32.xlu0 %v1301_v15 }
 0x6e5   : > { %v2547_v18 = vpop.eup %2546 }
 0x6e6   : > { %v2549_v43 = vpop.eup %2548  ;;  %v1319_v19 = vsel %vm941_vm2, %v2547_v18, 0.0 }
 0x6e7   : > { %v2551_v20 = vpop.eup %2550  ;;  %1320 = vadd.xlane.f32.xlu0 %v1319_v19  ;;  %v1322_v21 = vsel %vm941_vm2, %v2549_v43, 0.0 }
 0x6e8   : > { %v2553_v22 = vpop.eup %2552  ;;  %1323 = vadd.xlane.f32.xlu1 %v1322_v21  ;;  %v1313_v23 = vsel %vm941_vm2, %v2551_v20, 0.0 }
 0x6e9   : > { %v1316_v24 = vsel %vm941_vm2, %v2553_v22, 0.0 }
 0x6eb   : > { %1314 = vadd.xlane.f32.xlu0 %v1313_v23 }
 0x6ec   : > { %1317 = vadd.xlane.f32.xlu1 %v1316_v24 }
 0x6fd   : > { %1349 = vrot.lane.b32.xlu1 %v2854_v63, %s2615_s27 }
 0x701   : > { %1351 = vrot.lane.b32.xlu0 %v2852_v62, %s2615_s27 }
 0x76a   : > { %v1312_v44 = vpop.xlane.xlu1 %1311 }
 0x76c   : > { %v1309_v27 = vpop.xlane.xlu0 %1308 }
 0x76e   : > { %v1306_v28 = vpop.xlane.xlu1 %1305 }
 0x76f   : > { %2554 = vrcp.f32 %v1306_v28 }
 0x770   : > { %v1303_v29 = vpop.xlane.xlu0 %1302 }
 0x771   : > { %2556 = vrcp.f32 %v1303_v29 }
 0x772   : > { %2558 = vrcp.f32 %v1309_v27 }
 0x773   : > { %2560 = vrcp.f32 %v1312_v44 }
 0x774   : > { %v1321_v30 = vpop.xlane.xlu0 %1320 }
 0x775   : > { %v1324_v31 = vpop.xlane.xlu1 %1323  ;;  %2562 = vrcp.f32 %v1321_v30 }
 0x778   : > { %v1315_v32 = vpop.xlane.xlu0 %1314 }
 0x779   : > { %v2555_v35 = vpop.eup %2554  ;;  %2564 = vrcp.f32 %v1315_v32  ;;  %v1318_v48 = vpop.xlane.xlu1 %1317 }
 0x77a   : > { %2566 = vrcp.f32 %v1318_v48  ;;  %v1328_v62 = vmul.f32 %v2555_v35, %v2541_v26 }
 0x77b   : > { %v2557_v63 = vpop.eup %2556  ;;  %2568 = vrcp.f32 %v1324_v31 }
 0x77c   : > { %v1326_v49 = vmul.f32 %v2557_v63, %v2545_v14  ;;  %v2559_v51 = vpop.eup %2558  ;;  %v1352_v7 = vpop.permute.xlu0 %1351 }
 0x77d   : > { %v1350_v50 = vpop.permute.xlu1 %1349  ;;  %v2561_v53 = vpop.eup %2560  ;;  %v1330_v38 = vmul.f32 %v2559_v51, %v2543_v10 }
 0x77e   : > { %2371 = vmatprep.subr.bf16.mxu0 %v1350_v50  ;;  %v1341_v52 = vpack.c.bf16 %v1328_v62, %v1326_v49  ;;  %v1332_v56 = vmul.f32 %v2561_v53, %v3012_v0  ;;  %v2479_v0 = vld [vmem:[%s3285_s6 + $0x8] sm:$0xff]  }
 0x77f   : > { %2372 = vmatpush3.bf16.msra.mxu0 %v1350_v50  ;;  %v2563_v55 = vpop.eup %2562  ;;  %2385 = vmatprep.subr.bf16.mxu1 %v2479_v0 }
 0x780   : > { %2373 = vmatprep.subr.bf16.mxu0 %v1352_v7  ;;  %2375 = vmatprep.mubr.msk.bf16.mxu0 %vm941_vm2, %v1341_v52  ;;  %v1342_v25 = vpack.c.bf16 %v1332_v56, %v1330_v38  ;;  %v1338_v61 = vmul.f32 %v2563_v55, %v2547_v18 }
 0x781   : > { %2386 = vmatpush3.bf16.msra.mxu1 %v2479_v0 }
 0x783   : > { %v2565_v54 = vpop.eup %2564  ;;  %2374 = vmatpush3.bf16.msra.mxu0 %v1352_v7  ;;  %v2183_v7 = vld [vmem:[%s3286_s7] ss:$0 sm:$0xff] }
 0x784   : > { %v2567_v46 = vpop.eup %2566  ;;  %v1334_v58 = vmul.f32 %v2565_v54, %v2551_v20 }
 0x785   : > { %v2569_v59 = vpop.eup %2568  ;;  %v1336_v60 = vmul.f32 %v2567_v46, %v2553_v22 }
 0x786   : > { %2376 = vmatmul.mubr.msk.bf16.vlgmr.msra.gmra.mrb[24].mxu0 %vm941_vm2, %v1342_v25  ;;  %v1340_v33 = vmul.f32 %v2569_v59, %v2549_v43 }
 0x787   : > { %v1343_v57 = vpack.c.bf16 %v1336_v60, %v1334_v58 }
 0x788   : > { %v1344_v1 = vpack.c.bf16 %v1340_v33, %v1338_v61 }
 0x789   : > { %2379 = vmatprep.mubr.msk.bf16.mxu0 %vm941_vm2, %v1343_v57 }
 0x78e   : > { %2380 = vmatmul.mubr.msk.bf16.gmra.mrb[28].mxu0 %vm941_vm2, %v1344_v1 }
 0x859   : > { %v2377_v26 = vpop.f32.mrb[24].mxu0 }
 0x85a   : > { %v1403_v8 = vpop.f32.mrb[25].mxu0 }
 0x85b   : > { %v2378_v9 = vpop.f32.mrb[26].mxu0 }
 0x85c   : > { %v2461_v10 = vpack.i.bf16 %v2378_v9, %v2377_v26  ;;  %v1406_v13 = vpop.f32.mrb[27].mxu0 }
 0x85d   : > { %v2456_v14 = vpack.i.bf16 %v1406_v13, %v1403_v8 }
 0x85e   : > { %2462 = vrot.lane.b32.xlu0 %v2461_v10, %s2616_s19 }
 0x85f   : > { %2457 = vrot.lane.b32.xlu1 %v2456_v14, %s2616_s19 }
 0x861   : > { %v2381_v34 = vpop.f32.mrb[28].mxu0 }
 0x862   : > { %v1419_v15 = vpop.f32.mrb[29].mxu0 }
 0x863   : > { %v2382_v18 = vpop.f32.mrb[30].mxu0 }
 0x864   : > { %v2471_v43 = vpack.i.bf16 %v2382_v18, %v2381_v34  ;;  %v1422_v19 = vpop.f32.mrb[31].mxu0 }
 0x865   : > { %v2466_v20 = vpack.i.bf16 %v1422_v19, %v1419_v15 }
 0x866   : > { %2472 = vrot.lane.b32.xlu0 %v2471_v43, %s2616_s19 }
 0x867   : > { %2467 = vrot.lane.b32.xlu1 %v2466_v20, %s2616_s19 }
 0x8d0   : > { %v2463_v21 = vpop.permute.xlu0 %2462 }
 0x8d1   : > { %v2465_v22 = vunpack.i.h.bf16 %v2463_v21  ;;  %v2464_v23 = vunpack.i.l.bf16 %v2463_v21  ;;  %v2458_v24 = vpop.permute.xlu1 %2457 }
 0x8d2   : > { %v2460_v44 = vunpack.i.h.bf16 %v2458_v24  ;;  %v2459_v27 = vunpack.i.l.bf16 %v2458_v24 }
 0x8d3   : > { %v1469_v28 = vsel %vm827_vm1, %v2964_v39, %v2465_v22  ;;  %v1468_v29 = vsel %vm827_vm1, %v2960_v36, %v2464_v23 }
 0x8d4   : > { %v1475_v30 = vpack.c.bf16 %v1469_v28, %v1468_v29  ;;  %v1467_v31 = vsel %vm827_vm1, %v2966_v40, %v2460_v44  ;;  %v1466_v32 = vsel %vm827_vm1, %v2962_v37, %v2459_v27 }
 0x8d5   : > { %v1474_v35 = vpack.c.bf16 %v1467_v31, %v1466_v32 }
 0x8d7   : > { %2387 = vmatprep.mubr.msk.bf16.mxu1 %vm517_vm0, %v1474_v35 }
 0x8d8   : > { %2388 = vmatmul.mubr.msk.bf16.vlgmr.msra.gmra.mrb[8].mxu1 %vm517_vm0, %v1475_v30  ;;  %v2473_v48 = vpop.permute.xlu0 %2472 }
 0x8d9   : > { %v2475_v63 = vunpack.i.h.bf16 %v2473_v48  ;;  %v2474_v49 = vunpack.i.l.bf16 %v2473_v48  ;;  %v2468_v62 = vpop.permute.xlu1 %2467 }
 0x8da   : > { %v2470_v39 = vunpack.i.h.bf16 %v2468_v62  ;;  %v2469_v51 = vunpack.i.l.bf16 %v2468_v62 }
 0x8db   : > { %v1473_v36 = vsel %vm827_vm1, %v2972_v45, %v2475_v63  ;;  %v1472_v40 = vsel %vm827_vm1, %v2968_v41, %v2474_v49 }
 0x8dc   : > { %v1477_v50 = vpack.c.bf16 %v1473_v36, %v1472_v40  ;;  %v1471_v37 = vsel %vm827_vm1, %v2974_v47, %v2470_v39  ;;  %v1470_v52 = vsel %vm827_vm1, %v2970_v42, %v2469_v51 }
 0x8dd   : > { %v1476_v53 = vpack.c.bf16 %v1471_v37, %v1470_v52 }
 0x8df   : > { %2391 = vmatprep.mubr.msk.bf16.mxu1 %vm517_vm0, %v1476_v53 }
 0x8e0   : > { %2392 = vmatmul.mubr.msk.bf16.gmra.mrb[12].mxu1 %vm517_vm0, %v1477_v50 }
 0x9ab   : > { %v2389_v45 = vpop.f32.mrb[8].mxu1 }
 0x9ac   : > { %v1547_v38 = vpop.f32.mrb[9].mxu1  ;;  %v1556_v56 = vadd.f32 %v2389_v45, %v2183_v7 }
 0x9ad   : > { %v1548_v55 = vadd.f32 %v2183_v7, %v1547_v38  ;;  %v2390_v41 = vpop.f32.mrb[10].mxu1 }
 0x9ae   : > { %v1559_v54 = vadd.f32 %v2390_v41, %v2183_v7  ;;  %v1550_v46 = vpop.f32.mrb[11].mxu1  ;;  %v3073_v60 = vadd.f32 %v2715_v3, %v1556_v56 }
 0x9af   : > { %v3062_v47 = vadd.f32 %v2713_v2, %v1548_v55  ;;  %v1551_v42 = vadd.f32 %v2183_v7, %v1550_v46 }
 0x9b0   : > { %v3065_v25 = vadd.f32 %v2719_v5, %v1559_v54  ;;  %v1594_v6 = vsel %vm517_vm0, %v3073_v60, 0.0 }
 0x9b1   : > { %v3068_v58 = vadd.f32 %v2717_v4, %v1551_v42  ;;  %v1588_v59 = vsel %vm517_vm0, %v3062_v47, 0.0 }
 0x9b2   : > { %1589 = vadd.xlane.f32.xlu1 %v1588_v59  ;;  %v1597_v5 = vsel %vm517_vm0, %v3065_v25, 0.0  ;;  %v2480_v59 = vld [vmem:[%s3290_s11] sm:$0xff]  }
 0x9b3   : > { %v2393_v57 = vpop.f32.mrb[12].mxu1  ;;  %v1591_v61 = vsel %vm517_vm0, %v3068_v58, 0.0  ;;  %2395 = vmatprep.subr.bf16.mxu0 %v2480_v59 }
 0x9b4   : > { %1592 = vadd.xlane.f32.xlu0 %v1591_v61  ;;  %v1563_v2 = vpop.f32.mrb[13].mxu1  ;;  %v1572_v0 = vadd.f32 %v2393_v57, %v2183_v7  ;;  %2396 = vmatpush3.bf16.msra.mxu0 %v2480_v59  ;;  %v2481_v57 = vld [vmem:[%s3290_s11 + $0x8] sm:$0xff]  }
 0x9b5   : > { %v1564_v33 = vadd.f32 %v2183_v7, %v1563_v2  ;;  %v2394_v1 = vpop.f32.mrb[14].mxu1  ;;  %2397 = vmatprep.subr.bf16.mxu0 %v2481_v57 }
 0x9b6   : > { %1598 = vadd.xlane.f32.xlu1 %v1597_v5  ;;  %v1566_v4 = vpop.f32.mrb[15].mxu1  ;;  %v1575_v26 = vadd.f32 %v2394_v1, %v2183_v7  ;;  %v3088_v10 = vadd.f32 %v2737_v16, %v1572_v0 }
 0x9b7   : > { %v3082_v3 = vadd.f32 %v2729_v11, %v1564_v33  ;;  %v1567_v8 = vadd.f32 %v2183_v7, %v1566_v4 }
 0x9b8   : > { %1595 = vadd.xlane.f32.xlu0 %v1594_v6  ;;  %v3091_v13 = vadd.f32 %v2739_v17, %v1575_v26  ;;  %2398 = vmatpush3.bf16.msra.mxu0 %v2481_v57 }
 0x9b9   : > { %v3085_v9 = vadd.f32 %v2731_v12, %v1567_v8  ;;  %v1600_v34 = vsel %vm517_vm0, %v3082_v3, 0.0  ;;  %v1606_v12 = vsel %vm517_vm0, %v3088_v10, 0.0 }
 0x9ba   : > { %v1609_v11 = vsel %vm517_vm0, %v3091_v13, 0.0 }
 0x9bb   : > { %v1603_v14 = vsel %vm517_vm0, %v3085_v9, 0.0 }
 0x9bc   : > { %1604 = vadd.xlane.f32.xlu1 %v1603_v14  ;;  %1601 = vadd.xlane.f32.xlu0 %v1600_v34 }
 0x9c0   : > { %1610 = vadd.xlane.f32.xlu1 %v1609_v11  ;;  %1607 = vadd.xlane.f32.xlu0 %v1606_v12 }
 0xa3f   : > { %v1590_v16 = vpop.xlane.xlu1 %1589 }
 0xa40   : > { %v1612_v15 = vmul.f32 0.03125, %v1590_v16 }
 0xa41   : > { %v1593_v17 = vpop.xlane.xlu0 %1592 }
 0xa42   : > { %v3102_v18 = vsub.f32 %v3062_v47, %v1612_v15  ;;  %v1613_v43 = vmul.f32 0.03125, %v1593_v17 }
 0xa43   : > { %v1599_v19 = vpop.xlane.xlu1 %1598 }
 0xa44   : > { %v3105_v20 = vsub.f32 %v3068_v58, %v1613_v43  ;;  %v1615_v21 = vmul.f32 0.03125, %v1599_v19  ;;  %v1628_v22 = vmul.f32 %v3102_v18, %v3102_v18 }
 0xa45   : > { %v1596_v23 = vpop.xlane.xlu0 %1595 }
 0xa46   : > { %v3110_v24 = vsub.f32 %v3065_v25, %v1615_v21  ;;  %v1614_v44 = vmul.f32 0.03125, %v1596_v23  ;;  %v1636_v27 = vsel %vm517_vm0, %v1628_v22, 0.0  ;;  %v1629_v28 = vmul.f32 %v3105_v20, %v3105_v20  ;;  %v2190_v23 = vld [vmem:[%s3288_s9] ss:$0 sm:$0xff] }
 0xa47   : > { %1637 = vadd.xlane.f32.xlu0 %v1636_v27 }
 0xa48   : > { %v3116_v29 = vsub.f32 %v3073_v60, %v1614_v44  ;;  %v1639_v30 = vsel %vm517_vm0, %v1629_v28, 0.0  ;;  %v1631_v31 = vmul.f32 %v3110_v24, %v3110_v24 }
 0xa49   : > { %1640 = vadd.xlane.f32.xlu1 %v1639_v30  ;;  %v1605_v32 = vpop.xlane.xlu1 %1604  ;;  %v1602_v35 = vpop.xlane.xlu0 %1601 }
 0xa4a   : > { %v1617_v48 = vmul.f32 0.03125, %v1605_v32  ;;  %v1616_v63 = vmul.f32 0.03125, %v1602_v35  ;;  %v1630_v49 = vmul.f32 %v3116_v29, %v3116_v29  ;;  %v1645_v51 = vsel %vm517_vm0, %v1631_v31, 0.0 }
 0xa4c   : > { %v3124_v62 = vsub.f32 %v3085_v9, %v1617_v48  ;;  %v3127_v39 = vsub.f32 %v3082_v3, %v1616_v63  ;;  %v1642_v36 = vsel %vm517_vm0, %v1630_v49, 0.0  ;;  %v2191_v63 = vld [vmem:[%s3289_s10] ss:$0 sm:$0xff] }
 0xa4d   : > { %1646 = vadd.xlane.f32.xlu1 %v1645_v51  ;;  %v1611_v40 = vpop.xlane.xlu1 %1610  ;;  %1643 = vadd.xlane.f32.xlu0 %v1642_v36  ;;  %v1608_v50 = vpop.xlane.xlu0 %1607 }
 0xa4e   : > { %v1619_v37 = vmul.f32 0.03125, %v1611_v40  ;;  %v1618_v52 = vmul.f32 0.03125, %v1608_v50  ;;  %v1633_v53 = vmul.f32 %v3124_v62, %v3124_v62  ;;  %v1632_v7 = vmul.f32 %v3127_v39, %v3127_v39 }
 0xa50   : > { %v3136_v45 = vsub.f32 %v3091_v13, %v1619_v37  ;;  %v3139_v38 = vsub.f32 %v3088_v10, %v1618_v52  ;;  %v1651_v55 = vsel %vm517_vm0, %v1633_v53, 0.0  ;;  %v1648_v41 = vsel %vm517_vm0, %v1632_v7, 0.0 }
 0xa51   : > { %1652 = vadd.xlane.f32.xlu1 %v1651_v55  ;;  %1649 = vadd.xlane.f32.xlu0 %v1648_v41 }
 0xa52   : > { %v1635_v56 = vmul.f32 %v3136_v45, %v3136_v45  ;;  %v1634_v54 = vmul.f32 %v3139_v38, %v3139_v38 }
 0xa54   : > { %v1657_v46 = vsel %vm517_vm0, %v1635_v56, 0.0  ;;  %v1654_v42 = vsel %vm517_vm0, %v1634_v54, 0.0 }
 0xa55   : > { %1658 = vadd.xlane.f32.xlu1 %v1657_v46  ;;  %1655 = vadd.xlane.f32.xlu0 %v1654_v42 }
 0xad4   : > { %v1638_v61 = vpop.xlane.xlu0 %1637 }
 0xad5   : > { %v1660_v2 = vmul.f32 0.03125, %v1638_v61 }
 0xad6   : > { %v1641_v33 = vpop.xlane.xlu1 %1640 }
 0xad7   : > { %v1668_v1 = vadd.f32 1e-05, %v1660_v2  ;;  %v1661_v5 = vmul.f32 0.03125, %v1641_v33 }
 0xad9   : > { %2570 = vrsqrt.f32 %v1668_v1  ;;  %v1669_v4 = vadd.f32 1e-05, %v1661_v5 }
 0xada   : > { %v1647_v6 = vpop.xlane.xlu1 %1646  ;;  %v1644_v0 = vpop.xlane.xlu0 %1643 }
 0xadb   : > { %2572 = vrsqrt.f32 %v1669_v4  ;;  %v1663_v26 = vmul.f32 0.03125, %v1647_v6  ;;  %v1662_v8 = vmul.f32 0.03125, %v1644_v0 }
 0xadd   : > { %v1671_v14 = vadd.f32 1e-05, %v1663_v26  ;;  %v1670_v34 = vadd.f32 1e-05, %v1662_v8  ;;  %v2484_v26 = vld [vmem:[%s3292_s13 + $0x10] sm:$0xff]   ;;  %v2485_v8 = vld [vmem:[%s3292_s13 + $0x18] sm:$0xff]  }
 0xade   : > { %v1653_v11 = vpop.xlane.xlu1 %1652  ;;  %v1650_v12 = vpop.xlane.xlu0 %1649 }
 0xadf   : > { %2574 = vrsqrt.f32 %v1671_v14  ;;  %v1665_v16 = vmul.f32 0.03125, %v1653_v11  ;;  %v1664_v15 = vmul.f32 0.03125, %v1650_v12  ;;  %v2486_v14 = vld [vmem:[%s3292_s13 + $0x20] sm:$0xff]   ;;  %v2488_v11 = vld [vmem:[%s3292_s13 + $0x30] sm:$0xff]   ;;  %v2489_v12 = vld [vmem:[%s3292_s13 + $0x38] sm:$0xff]  }
 0xae0   : > { %2576 = vrsqrt.f32 %v1670_v34  ;;  %v2487_v34 = vld [vmem:[%s3292_s13 + $0x28] sm:$0xff]  }
 0xae1   : > { %v1673_v17 = vadd.f32 1e-05, %v1665_v16  ;;  %v1672_v43 = vadd.f32 1e-05, %v1664_v15  ;;  %v2192_v16 = vld [vmem:[%s3291_s12] ss:$0 sm:$0xff] }
 0xae2   : > { %v1659_v19 = vpop.xlane.xlu1 %1658  ;;  %v1656_v21 = vpop.xlane.xlu0 %1655 }
 0xae3   : > { %v2571_v22 = vpop.eup %2570  ;;  %2578 = vrsqrt.f32 %v1673_v17  ;;  %v1667_v44 = vmul.f32 0.03125, %v1659_v19  ;;  %v1666_v27 = vmul.f32 0.03125, %v1656_v21 }
 0xae4   : > { %v1684_v28 = vmul.f32 %v2571_v22, %v3102_v18  ;;  %2580 = vrsqrt.f32 %v1672_v43 }
 0xae5   : > { %v2573_v30 = vpop.eup %2572  ;;  %v1675_v31 = vadd.f32 1e-05, %v1667_v44  ;;  %v1674_v32 = vadd.f32 1e-05, %v1666_v27 }
 0xae6   : > { %v1685_v35 = vmul.f32 %v2573_v30, %v3105_v20  ;;  %v1698_v48 = vmul.f32 %v2190_v23, %v1684_v28 }
 0xae7   : > { %2582 = vrsqrt.f32 %v1675_v31 }
 0xae8   : > { %2584 = vrsqrt.f32 %v1674_v32  ;;  %v1699_v49 = vmul.f32 %v2190_v23, %v1685_v35  ;;  %v1712_v50 = vadd.f32 %v2191_v63, %v1698_v48 }
 0xae9   : > { %v2575_v51 = vpop.eup %2574 }
 0xaea   : > { %v2577_v36 = vpop.eup %2576  ;;  %v1687_v40 = vmul.f32 %v2575_v51, %v3110_v24  ;;  %v1713_v18 = vadd.f32 %v2191_v63, %v1699_v49 }
 0xaeb   : > { %v1686_v37 = vmul.f32 %v2577_v36, %v3116_v29 }
 0xaec   : > { %v1701_v52 = vmul.f32 %v2190_v23, %v1687_v40  ;;  %v1720_v53 = vpack.c.bf16 %v1713_v18, %v1712_v50 }
 0xaed   : > { %v2579_v7 = vpop.eup %2578  ;;  %v1700_v20 = vmul.f32 %v2190_v23, %v1686_v37 }
 0xaee   : > { %v2581_v55 = vpop.eup %2580  ;;  %v1715_v41 = vadd.f32 %v2191_v63, %v1701_v52  ;;  %v1689_v56 = vmul.f32 %v2579_v7, %v3124_v62  ;;  %2399 = vmatprep.mubr.msk.bf16.mxu0 %vm517_vm0, %v1720_v53 }
 0xaef   : > { %v1714_v54 = vadd.f32 %v2191_v63, %v1700_v20  ;;  %v1688_v46 = vmul.f32 %v2581_v55, %v3127_v39 }
 0xaf0   : > { %v1703_v42 = vmul.f32 %v2190_v23, %v1689_v56 }
 0xaf1   : > { %v2583_v59 = vpop.eup %2582  ;;  %v1721_v24 = vpack.c.bf16 %v1715_v41, %v1714_v54  ;;  %v1702_v57 = vmul.f32 %v2190_v23, %v1688_v46 }
 0xaf2   : > { %v2585_v61 = vpop.eup %2584  ;;  %v1691_v29 = vmul.f32 %v2583_v59, %v3136_v45  ;;  %v1717_v2 = vadd.f32 %v2191_v63, %v1703_v42  ;;  %v2482_v45 = vld [vmem:[%s3292_s13] sm:$0xff]  }
 0xaf3   : > { %v1690_v33 = vmul.f32 %v2585_v61, %v3139_v38  ;;  %2400 = vmatmul.mubr.msk.bf16.vlgmr.msra.gmra.mrb[32].mxu0 %vm517_vm0, %v1721_v24  ;;  %v1716_v1 = vadd.f32 %v2191_v63, %v1702_v57  ;;  %2407 = vmatprep.subr.bf16.mxu1 %v2482_v45  ;;  %v2483_v38 = vld [vmem:[%s3292_s13 + $0x8] sm:$0xff]  }
 0xaf4   : > { %v1705_v5 = vmul.f32 %v2190_v23, %v1691_v29  ;;  %2408 = vmatpush3.bf16.msra.mxu1 %v2482_v45 }
 0xaf5   : > { %v1722_v62 = vpack.c.bf16 %v1717_v2, %v1716_v1  ;;  %v1704_v4 = vmul.f32 %v2190_v23, %v1690_v33  ;;  %2409 = vmatprep.subr.bf16.mxu1 %v2483_v38 }
 0xaf6   : > { %v1719_v6 = vadd.f32 %v2191_v63, %v1705_v5 }
 0xaf7   : > { %2403 = vmatprep.mubr.msk.bf16.mxu0 %vm517_vm0, %v1722_v62  ;;  %v1718_v39 = vadd.f32 %v2191_v63, %v1704_v4 }
 0xaf8   : > { %2410 = vmatpush3.bf16.msra.mxu1 %v2483_v38 }
 0xaf9   : > { %v1723_v0 = vpack.c.bf16 %v1719_v6, %v1718_v39  ;;  %2411 = vmatprep.subr.bf16.mxu1 %v2484_v26 }
 0xafb   : > { %2404 = vmatmul.mubr.msk.bf16.gmra.mrb[36].mxu0 %vm517_vm0, %v1723_v0 }
 0xafc   : > { %2412 = vmatpush3.bf16.msra.mxu1 %v2484_v26 }
 0xafd   : > { %2413 = vmatprep.subr.bf16.mxu1 %v2485_v8 }
 0xb00   : > { %2414 = vmatpush3.bf16.msra.mxu1 %v2485_v8 }
 0xb01   : > { %2415 = vmatprep.subr.bf16.mxu1 %v2486_v14 }
 0xb04   : > { %2416 = vmatpush3.bf16.msra.mxu1 %v2486_v14 }
 0xb05   : > { %2417 = vmatprep.subr.bf16.mxu1 %v2487_v34 }
 0xb08   : > { %2418 = vmatpush3.bf16.msra.mxu1 %v2487_v34 }
 0xb09   : > { %2419 = vmatprep.subr.bf16.mxu1 %v2488_v11 }
 0xb0c   : > { %2420 = vmatpush3.bf16.msra.mxu1 %v2488_v11 }
 0xb0d   : > { %2421 = vmatprep.subr.bf16.mxu1 %v2489_v12 }
 0xb10   : > { %2422 = vmatpush3.bf16.msra.mxu1 %v2489_v12 }
 0xbc6   : > { %v2401_v15 = vpop.f32.mrb[32].mxu0 }
 0xbc7   : > { %v3200_v17 = vadd.f32 %v2401_v15, %v2192_v16  ;;  %v1793_v43 = vpop.f32.mrb[33].mxu0 }
 0xbc8   : > { %v3202_v19 = vadd.f32 %v2192_v16, %v1793_v43  ;;  %v2402_v21 = vpop.f32.mrb[34].mxu0 }
 0xbc9   : > { %v1834_v22 = vmul.f32 0.044715, %v3200_v17  ;;  %v3205_v23 = vadd.f32 %v2402_v21, %v2192_v16  ;;  %v1796_v44 = vpop.f32.mrb[35].mxu0 }
 0xbca   : > { %v1832_v27 = vmul.f32 0.044715, %v3202_v19  ;;  %v3208_v28 = vadd.f32 %v2192_v16, %v1796_v44 }
 0xbcb   : > { %v1842_v30 = vmul.f32 %v1834_v22, %v3200_v17  ;;  %v1835_v31 = vmul.f32 0.044715, %v3205_v23 }
 0xbcc   : > { %v1840_v32 = vmul.f32 %v1832_v27, %v3202_v19  ;;  %v1833_v35 = vmul.f32 0.044715, %v3208_v28 }
 0xbcd   : > { %v1850_v48 = vmul.f32 %v1842_v30, %v3200_v17  ;;  %v1843_v63 = vmul.f32 %v1835_v31, %v3205_v23  ;;  %v1826_v30 = vmul.f32 0.5, %v3200_v17  ;;  %v1827_v31 = vmul.f32 0.5, %v3205_v23 }
 0xbce   : > { %v1848_v49 = vmul.f32 %v1840_v32, %v3202_v19  ;;  %v1841_v51 = vmul.f32 %v1833_v35, %v3208_v28  ;;  %v2405_v36 = vpop.f32.mrb[36].mxu0  ;;  %v1824_v35 = vmul.f32 0.5, %v3202_v19 }
 0xbcf   : > { %v1858_v40 = vadd.f32 %v1850_v48, %v3200_v17  ;;  %v1851_v50 = vmul.f32 %v1843_v63, %v3205_v23  ;;  %v3220_v18 = vadd.f32 %v2405_v36, %v2192_v16  ;;  %v1809_v37 = vpop.f32.mrb[37].mxu0  ;;  %v1825_v48 = vmul.f32 0.5, %v3208_v28 }
 0xbd0   : > { %v1849_v52 = vmul.f32 %v1841_v51, %v3208_v28  ;;  %v3223_v53 = vadd.f32 %v2192_v16, %v1809_v37  ;;  %v2406_v7 = vpop.f32.mrb[38].mxu0  ;;  %v1856_v20 = vadd.f32 %v1848_v49, %v3202_v19 }
 0xbd1   : > { %v1866_v55 = vmul.f32 0.7978846, %v1858_v40  ;;  %v1859_v41 = vadd.f32 %v1851_v50, %v3205_v23  ;;  %v1838_v56 = vmul.f32 0.044715, %v3220_v18  ;;  %v1821_v54 = vadd.f32 %v2406_v7, %v2192_v16  ;;  %v1812_v46 = vpop.f32.mrb[39].mxu0 }
 0xbd2   : > { %v1836_v42 = vmul.f32 0.044715, %v3223_v53  ;;  %v1813_v59 = vadd.f32 %v2192_v16, %v1812_v46  ;;  %v1857_v24 = vadd.f32 %v1849_v52, %v3208_v28  ;;  %v1864_v57 = vmul.f32 0.7978846, %v1856_v20 }
 0xbd3   : > { %2586 = vtanh.f32 %v1866_v55  ;;  %v1867_v61 = vmul.f32 0.7978846, %v1859_v41  ;;  %v1846_v29 = vmul.f32 %v1838_v56, %v3220_v18  ;;  %v1839_v2 = vmul.f32 0.044715, %v1821_v54 }
 0xbd4   : > { %v1844_v33 = vmul.f32 %v1836_v42, %v3223_v53  ;;  %v1837_v1 = vmul.f32 0.044715, %v1813_v59  ;;  %v1865_v5 = vmul.f32 0.7978846, %v1857_v24  ;;  %2588 = vtanh.f32 %v1864_v57 }
 0xbd5   : > { %2590 = vtanh.f32 %v1867_v61  ;;  %v1854_v62 = vmul.f32 %v1846_v29, %v3220_v18  ;;  %v1847_v4 = vmul.f32 %v1839_v2, %v1821_v54  ;;  %v1830_v23 = vmul.f32 0.5, %v3220_v18 }
 0xbd6   : > { %v1852_v6 = vmul.f32 %v1844_v33, %v3223_v53  ;;  %v1845_v39 = vmul.f32 %v1837_v1, %v1813_v59  ;;  %2592 = vtanh.f32 %v1865_v5  ;;  %v1831_v19 = vmul.f32 0.5, %v1821_v54  ;;  %v2199_v1 = vld [vmem:[%s3293_s14] ss:$0 sm:$0xff] }
 0xbd7   : > { %v1855_v0 = vmul.f32 %v1847_v4, %v1821_v54  ;;  %v1862_v45 = vadd.f32 %v1854_v62, %v3220_v18  ;;  %v1828_v28 = vmul.f32 0.5, %v3223_v53  ;;  %v1829_v46 = vmul.f32 0.5, %v1813_v59 }
 0xbd8   : > { %v1853_v38 = vmul.f32 %v1845_v39, %v1813_v59  ;;  %v1860_v26 = vadd.f32 %v1852_v6, %v3223_v53 }
 0xbd9   : > { %v1863_v8 = vadd.f32 %v1855_v0, %v1821_v54  ;;  %v1870_v14 = vmul.f32 0.7978846, %v1862_v45 }
 0xbda   : > { %v1861_v34 = vadd.f32 %v1853_v38, %v1813_v59  ;;  %v1868_v11 = vmul.f32 0.7978846, %v1860_v26 }
 0xbdb   : > { %v1871_v12 = vmul.f32 0.7978846, %v1863_v8  ;;  %2594 = vtanh.f32 %v1870_v14 }
 0xbdc   : > { %v1869_v16 = vmul.f32 0.7978846, %v1861_v34  ;;  %2596 = vtanh.f32 %v1868_v11 }
 0xbdd   : > { %v2587_v15 = vpop.eup %2586  ;;  %2598 = vtanh.f32 %v1871_v12 }
 0xbde   : > { %v2589_v43 = vpop.eup %2588  ;;  %v1882_v21 = vadd.f32 1.0, %v2587_v15  ;;  %2600 = vtanh.f32 %v1869_v16 }
 0xbdf   : > { %v2591_v22 = vpop.eup %2590  ;;  %v1880_v44 = vadd.f32 1.0, %v2589_v43 }
 0xbe0   : > { %v2593_v27 = vpop.eup %2592  ;;  %v1883_v32 = vadd.f32 1.0, %v2591_v22  ;;  %v1890_v49 = vmul.f32 %v1882_v21, %v1826_v30 }
 0xbe1   : > { %v1881_v63 = vadd.f32 1.0, %v2593_v27  ;;  %v1888_v36 = vmul.f32 %v1880_v44, %v1824_v35 }
 0xbe2   : > { %v1891_v51 = vmul.f32 %v1883_v32, %v1827_v31 }
 0xbe3   : > { %v1889_v40 = vmul.f32 %v1881_v63, %v1825_v48 }
 0xbe4   : > { %v1897_v50 = vpack.c.bf16 %v1891_v51, %v1890_v49 }
 0xbe5   : > { %v2595_v37 = vpop.eup %2594  ;;  %v1896_v52 = vpack.c.bf16 %v1889_v40, %v1888_v36 }
 0xbe6   : > { %v2597_v7 = vpop.eup %2596  ;;  %v1886_v20 = vadd.f32 1.0, %v2595_v37 }
 0xbe7   : > { %v2599_v55 = vpop.eup %2598  ;;  %2423 = vmatprep.mubr.bf16.mxu1 %v1896_v52  ;;  %v1884_v17 = vadd.f32 1.0, %v2597_v7 }
 0xbe8   : > { %v2601_v41 = vpop.eup %2600  ;;  %2424 = vmatmul.mubr.bf16.vlgmr.msra.gmra.mrb[16].mxu1 %v1897_v50  ;;  %v1887_v56 = vadd.f32 1.0, %v2599_v55  ;;  %v1894_v24 = vmul.f32 %v1886_v20, %v1830_v23 }
 0xbe9   : > { %v1885_v42 = vadd.f32 1.0, %v2601_v41  ;;  %v1892_v61 = vmul.f32 %v1884_v17, %v1828_v28 }
 0xbea   : > { %v1895_v57 = vmul.f32 %v1887_v56, %v1831_v19 }
 0xbeb   : > { %v1893_v29 = vmul.f32 %v1885_v42, %v1829_v46 }
 0xbec   : > { %v1899_v2 = vpack.c.bf16 %v1895_v57, %v1894_v24 }
 0xbed   : > { %v1898_v33 = vpack.c.bf16 %v1893_v29, %v1892_v61 }
 0xbef   : > { %2427 = vmatprep.mubr.bf16.mxu1 %v1898_v33 }
 0xbf0   : > { %2428 = vmatmul.mubr.bf16.gmra.mrb[20].mxu1 %v1899_v2 }
 0xcbb   : > { %v2425_v18 = vpop.f32.mrb[16].mxu1 }
 0xcbc   : > { %v2014_v54 = vadd.f32 %v2425_v18, %v2199_v1  ;;  %v2005_v5 = vpop.f32.mrb[17].mxu1 }
 0xcbd   : > { %v2006_v62 = vadd.f32 %v2199_v1, %v2005_v5  ;;  %v2426_v53 = vpop.f32.mrb[18].mxu1 }
 0xcbe   : > { %v2038_v59 = vadd.f32 %v2014_v54, %v3073_v60  ;;  %v2017_v4 = vadd.f32 %v2426_v53, %v2199_v1  ;;  %v2008_v6 = vpop.f32.mrb[19].mxu1 }
 0xcbf   : > { %v2036_v39 = vadd.f32 %v2006_v62, %v3062_v47  ;;  %v2009_v0 = vadd.f32 %v2199_v1, %v2008_v6 }
 0xcc0   : > { %v2220_v45 = vpack.c.bf16 %v2038_v59, %v2038_v59  ;;  %v2039_v38 = vadd.f32 %v2017_v4, %v3065_v25 }
 0xcc1   : > { %v2218_v60 = vpack.c.bf16 %v2036_v39, %v2036_v39  ;;  %v2037_v26 = vadd.f32 %v2009_v0, %v3068_v58 }
 0xcc2   : > { %2079 = vst.msk [vmem:[%s3251_s30 + $0x8] sm:$0xf] %vm2076_vm3, %v2220_v45  ;;  %v2221_v8 = vpack.c.bf16 %v2039_v38, %v2039_v38 }
 0xcc3   : > { %2077 = vst.msk [vmem:[%s3251_s30] sm:$0xf] %vm2076_vm3, %v2218_v60  ;;  %v2219_v14 = vpack.c.bf16 %v2037_v26, %v2037_v26  ;;  %v2429_v34 = vpop.f32.mrb[20].mxu1 }
 0xcc4   : > { %2080 = vst.msk [vmem:[%s3251_s30 + $0xc] sm:$0xf] %vm2076_vm3, %v2221_v8  ;;  %v2030_v11 = vadd.f32 %v2429_v34, %v2199_v1  ;;  %v2021_v47 = vpop.f32.mrb[21].mxu1 }
 0xcc5   : > { %2078 = vst.msk [vmem:[%s3251_s30 + $0x4] sm:$0xf] %vm2076_vm3, %v2219_v14  ;;  %v2022_v25 = vadd.f32 %v2199_v1, %v2021_v47  ;;  %v2430_v12 = vpop.f32.mrb[22].mxu1 }
 0xcc6   : > { %v2042_v58 = vadd.f32 %v2030_v11, %v3088_v10  ;;  %v2033_v16 = vadd.f32 %v2430_v12, %v2199_v1  ;;  %v2024_v15 = vpop.f32.mrb[23].mxu1 }
 0xcc7   : > { %v2040_v43 = vadd.f32 %v2022_v25, %v3082_v3  ;;  %v2025_v21 = vadd.f32 %v2199_v1, %v2024_v15 }
 0xcc8   : > { %v2224_v22 = vpack.c.bf16 %v2042_v58, %v2042_v58  ;;  %v2043_v44 = vadd.f32 %v2033_v16, %v3091_v13 }
 0xcc9   : > { %v2222_v27 = vpack.c.bf16 %v2040_v43, %v2040_v43  ;;  %v2041_v30 = vadd.f32 %v2025_v21, %v3085_v9 }
 0xcca   : > { %2083 = vst.msk [vmem:[%s3251_s30 + $0x18] sm:$0xf] %vm2076_vm3, %v2224_v22  ;;  %v2225_v31 = vpack.c.bf16 %v2043_v44, %v2043_v44 }
 0xccb   : > { %2081 = vst.msk [vmem:[%s3251_s30 + $0x10] sm:$0xf] %vm2076_vm3, %v2222_v27  ;;  %v2223_v32 = vpack.c.bf16 %v2041_v30, %v2041_v30 }
 0xccc   : > { %2084 = vst.msk [vmem:[%s3251_s30 + $0x1c] sm:$0xf] %vm2076_vm3, %v2225_v31 }
 0xccd   : > { %2082 = vst.msk [vmem:[%s3251_s30 + $0x14] sm:$0xf] %vm2076_vm3, %v2223_v32 }
 0xcce PF: > { %s25_s18 = sadd.s32 1, %s2608_s18  }
 0xccf   : > { %p22_p4 = scmp.ge.s32.totalorder %s25_s18, 4  }
 0xcd1   :  { %24 = sbr.rel (!%p22_p4) target bundleno = 1 (0x1), region = 111 }

// kernel: swin_forward.9
= control target key start
LH: loop header
LB: loop body
LE: loop exit
PB: predicated region body
PF: predicated region fallthrough
CT: control target
= control target key end

     0   :  { %s2139_s18 = smov 0   ;;  %s2466_s0 = inlined_call_operand.vmem [shape: bf16[32,64], index: 0, kind: input, shape index: {}]   ;;  %s2467_s1 = inlined_call_operand.vmem [shape: f32[16,1], index: 1, kind: input, shape index: {}]   ;;  %s2468_s2 = inlined_call_operand.vmem [shape: f32[1,64], index: 2, kind: input, shape index: {}, may-alias: {2,9}]   ;;  %s2469_s3 = inlined_call_operand.vmem [shape: f32[1,64], index: 3, kind: input, shape index: {}, may-alias: {3,7,10,14}]   ;;  %s2470_s4 = inlined_call_operand.vmem [shape: bf16[64,192], index: 4, kind: input, shape index: {}]   ;;  %s2471_s5 = inlined_call_operand.vmem [shape: f32[1,192], index: 5, kind: input, shape index: {}]   ;;  %s2472_s6 = inlined_call_operand.vmem [shape: bf16[64,64], index: 6, kind: input, shape index: {}]   ;;  %s2473_s7 = inlined_call_operand.vmem [shape: f32[1,64], index: 7, kind: input, shape index: {}, may-alias: {3,7,10,14}]   ;;  %s2474_s8 = inlined_call_operand.vmem [shape: f32[4,16,16], index: 8, kind: input, shape index: {}]   ;;  %s2475_s9 = inlined_call_operand.vmem [shape: f32[1,64], index: 9, kind: input, shape index: {}, may-alias: {2,9}]   ;;  %s2476_s10 = inlined_call_operand.vmem [shape: f32[1,64], index: 10, kind: input, shape index: {}, may-alias: {3,7,10,14}]   ;;  %s2477_s11 = inlined_call_operand.vmem [shape: bf16[64,256], index: 11, kind: input, shape index: {}]   ;;  %s2478_s12 = inlined_call_operand.vmem [shape: f32[1,256], index: 12, kind: input, shape index: {}]   ;;  %s2479_s13 = inlined_call_operand.vmem [shape: bf16[256,64], index: 13, kind: input, shape index: {}]   ;;  %s2480_s14 = inlined_call_operand.vmem [shape: f32[1,64], index: 14, kind: input, shape index: {}, may-alias: {3,7,10,14}]   ;;  %s2481_s15 = inlined_call_operand.vmem [shape: bf16[32,64], index: 15, kind: output, shape index: {}]  }
   0x1 LB: > { %s1733_s19 = sadd.s32 4294967295, %s2047_s18   ;;  %p1737_p0 = scmp.ge.s32.totalorder %s2047_s18, 1  ;;  %s2047_s18 = sphi %s2139_s18, %s25_s18  }
   0x2   : > { %p438_p1 = scmp.lt.s32.totalorder %s2047_s18, 3 }
   0x4   : > { %p439_p2 = pnand %p1737_p0, %p438_p1 }
   0x5   : > { %s1738_s20 = sshll.u32 (!%p439_p2), %s1733_s19, 1  ;;  %vm505_vm0 = vcmask (!%p439_p2), 523264   ;;  %v549_v5 = vld [vmem:[%s2467_s1] sm:$0xff] (!%p439_p2)  ;;  %v2049_v6 = vmov (!%p439_p2), 0   ;;  %v550_v17 = vld [vmem:[%s2467_s1 + $0x8] sm:$0xff] (!%p439_p2)  ;;  %v574_v47 = vlaneseq (!%p439_p2)  ;;  %v2050_v49 = vmov (!%p439_p2), 0.0  }
   0x6   : > { %442 = sbr.rel (%p439_p2) target bundleno = 2622 (0xa3e), region = 80  ;;  %p487_p3 = scmp.lt.s32.totalorder (!%p439_p2), %s1738_s20, 3  ;;  %1932 = vset.pattern.permute.xlu0 (!%p439_p2), %v2049_v6  ;;  %1933 = vset.pattern.permute.xlu1 (!%p439_p2), %v2049_v6  ;;  %v1949_v18 = vld [vmem:[%s2470_s4 + $0x4] ss:$8 sps:$4 sm:$0xff] (!%p439_p2)   ;;  %v1951_v19 = vld [vmem:[%s2470_s4] ss:$8 sps:$4 sm:$0xff] (!%p439_p2)  }
   0x7   : > { %659 = vmatprep.mubr.bf16.mxu1 (!%p439_p2), %v2049_v6  ;;  %v1952_v20 = vld [vmem:[%s2470_s4 + $0x14] ss:$8 sps:$4 sm:$0xff] (!%p439_p2)   ;;  %627 = vmatprep.subr.bf16.mxu1 (!%p439_p2), %v1949_v18  ;;  %v1954_v21 = vld [vmem:[%s2470_s4 + $0x10] ss:$8 sps:$4 sm:$0xff] (!%p439_p2)   ;;  %v1955_v22 = vld [vmem:[%s2470_s4 + $0x24] ss:$8 sps:$4 sm:$0xff] (!%p439_p2)  }
   0x8   : > { %628 = vmatpush1.bf16.msra.mxu1 (!%p439_p2), %v1951_v19  ;;  %v1957_v23 = vld [vmem:[%s2470_s4 + $0x20] ss:$8 sps:$4 sm:$0xff] (!%p439_p2)   ;;  %v1958_v24 = vld [vmem:[%s2470_s4 + $0x34] ss:$8 sps:$4 sm:$0xff] (!%p439_p2)   ;;  %v1960_v25 = vld [vmem:[%s2470_s4 + $0x30] ss:$8 sps:$4 sm:$0xff] (!%p439_p2)   ;;  %1866 = vmatprep.subr.bf16.mxu0 (!%p439_p2), %v2050_v49 }
   0x9   : > { %629 = vmatprep.subr.bf16.mxu1 (!%p439_p2), %v1952_v20  ;;  %v1742_v33 = vld [vmem:[%s2468_s2] ss:$0 sm:$0xff] (!%p439_p2)  ;;  %v2207_v48 = vshrl.u32 (!%p439_p2), %v574_v47, 7  ;;  %vm2051_vm1 = vmmov (!%p439_p2), 0   ;;  %s2052_s27 = smov (!%p439_p2), 64   ;;  %s2053_s28 = smov (!%p439_p2), 48  }
   0xa   : > { %v1743_v37 = vld [vmem:[%s2469_s3] ss:$0 sm:$0xff] (!%p439_p2)  ;;  %1868 = vmatprep.mubr.msk.bf16.mxu0 (!%p439_p2), %vm2051_vm1, %v2050_v49  ;;  %s2054_s29 = smov (!%p439_p2), 112   ;;  %s2055_s30 = smov (!%p439_p2), 32   ;;  %vm675_vm2 = vcmask (!%p439_p2), 130048   ;;  %v726_v20 = vld [vmem:[%s2474_s8 + $0x8] sm:$0xff] (!%p439_p2) }
   0xb   : > { %v576_v50 = vsub.s32 (!%p439_p2), 0, %v2207_v48  ;;  %v572_v51 = vld [vmem:[%s2471_s5] sm:$0x3] (!%p439_p2)  ;;  %v580_v52 = vsub.s32 (!%p439_p2), 1, %v2207_v48  ;;  %s2056_s16 = smov (!%p439_p2), 96   ;;  %s2057_s17 = smov (!%p439_p2), 16  }
   0xc   : > { %630 = vmatpush1.bf16.msra.mxu1 (!%p439_p2), %v1954_v21  ;;  %s2058_s19 = smov (!%p439_p2), 80   ;;  %vm1207_vm3 = vcmask (!%p439_p2), 261120   ;;  %vm1210_vm4 = vcmask (!%p439_p2), 392192   ;;  %vm1674_vm5 = vcmask (!%p439_p2), 519168  }
   0xd   : > { %s2483_s20 = smov (!%p487_p3, %s1738_s20), 3  ;;  %631 = vmatprep.subr.bf16.mxu1 %v1955_v22  ;;  %v577_v53 = vrot.slane %v572_v51, %v576_v50  ;;  %v581_v55 = vrot.slane %v572_v51, %v580_v52 }
   0xe   : > { %s1739_s21 = sshll.u32 %s2483_s20, 2 }
   0xf   : > { %s490_s24 = scalar_lea.vmem %s2466_s0, %s1739_s21 }
  0x10   : > { %v1808_v0 = vld [vmem:[%s490_s24] sm:$0xff]   ;;  %632 = vmatpush1.bf16.msra.mxu1 %v1957_v23 }
  0x11   : > { %v2155_v1 = vunpack.c.l.bf16 %v1808_v0  ;;  %v2157_v2 = vunpack.c.h.bf16 %v1808_v0  ;;  %633 = vmatprep.subr.bf16.mxu1 %v1958_v24 }
  0x13   : > { %v506_v3 = vsel %vm505_vm0, %v2155_v1, 0.0  ;;  %v509_v4 = vsel %vm505_vm0, %v2157_v2, 0.0 }
  0x14   : > { %507 = vadd.xlane.f32.xlu0 %v506_v3  ;;  %634 = vmatpush1.bf16.msra.mxu1 %v1960_v25  ;;  %v1756_v25 = vld [vmem:[%s2474_s8 + $0x10] sm:$0xff] }
  0x15   : > { %1854 = vmatprep.subr.bf16.mxu1 %v2050_v49 }
  0x18   : > { %510 = vadd.xlane.f32.xlu0 %v509_v4 }
  0x2e   : > { %553 = vperm.xlu0 %1932, %v549_v5  }
  0xa1   : > { %v508_v7 = vpop.xlane.xlu0 %507 }
  0xa2   : > { %v513_v8 = vmul.f32 0.015625, %v508_v7 }
  0xa4   : > { %v515_v9 = vsub.f32 %v2155_v1, %v513_v8 }
  0xa5   : > { %v511_v10 = vpop.xlane.xlu0 %510 }
  0xa6   : > { %v514_v11 = vmul.f32 0.015625, %v511_v10  ;;  %v517_v12 = vmul.f32 %v515_v9, %v515_v9 }
  0xa8   : > { %v516_v13 = vsub.f32 %v2157_v2, %v514_v11  ;;  %v519_v14 = vsel %vm505_vm0, %v517_v12, 0.0 }
  0xa9   : > { %520 = vadd.xlane.f32.xlu1 %v519_v14 }
  0xaa   : > { %v518_v15 = vmul.f32 %v516_v13, %v516_v13 }
  0xac   : > { %v522_v16 = vsel %vm505_vm0, %v518_v15, 0.0 }
  0xad   : > { %523 = vadd.xlane.f32.xlu1 %v522_v16  ;;  %v554_v41 = vpop.permute.xlu0 %553  ;;  %v725_v16 = vld [vmem:[%s2474_s8] sm:$0xff] }
  0xbe   : > { %558 = vperm.xlu1 %1933, %v550_v17  }
 0x136   : > { %v521_v26 = vpop.xlane.xlu1 %520 }
 0x137   : > { %v525_v27 = vmul.f32 0.015625, %v521_v26 }
 0x139   : > { %v527_v28 = vadd.f32 1e-05, %v525_v27 }
 0x13a   : > { %v524_v29 = vpop.xlane.xlu1 %523 }
 0x13b   : > { %1993 = vrsqrt.f32 %v527_v28  ;;  %v526_v30 = vmul.f32 0.015625, %v524_v29 }
 0x13d   : > { %v528_v31 = vadd.f32 1e-05, %v526_v30 }
 0x13e   : > { %v559_v42 = vpop.permute.xlu1 %558 }
 0x13f   : > { %1995 = vrsqrt.f32 %v528_v31  ;;  %v1757_v31 = vld [vmem:[%s2474_s8 + $0x18] sm:$0xff] }
 0x145   : > { %v1994_v32 = vpop.eup %1993 }
 0x146   : > { %v531_v34 = vmul.f32 %v1994_v32, %v515_v9 }
 0x148   : > { %v539_v35 = vmul.f32 %v1742_v33, %v531_v34 }
 0x149   : > { %v1996_v36 = vpop.eup %1995 }
 0x14a   : > { %v532_v38 = vmul.f32 %v1996_v36, %v516_v13  ;;  %v547_v39 = vadd.f32 %v1743_v37, %v539_v35 }
 0x14c   : > { %v540_v40 = vmul.f32 %v1742_v33, %v532_v38  ;;  %v561_v44 = vmul.f32 %v554_v41, %v547_v39  ;;  %v1760_v39 = vld [vmem:[%s2474_s8 + $0x20] sm:$0xff] }
 0x14e   : > { %v548_v43 = vadd.f32 %v1743_v37, %v540_v40 }
 0x150   : > { %v562_v45 = vmul.f32 %v559_v42, %v548_v43 }
 0x152   : > { %v563_v46 = vpack.c.bf16 %v562_v45, %v561_v44  ;;  %v1761_v44 = vld [vmem:[%s2474_s8 + $0x28] sm:$0xff] }
 0x154   : > { %1752 = vmatmul.mubr.msk.bf16.vlgmr.msra.gmra.mrb[0].mxu1 %vm505_vm0, %v563_v46 }
 0x155   : > { %1856 = vmatprep.mubr.msk.bf16.mxu1 %vm2051_vm1, %v2050_v49 }
 0x227   : > { %v661_v54 = vpop.f32.mrb[0].mxu1 }
 0x228   : > { %v663_v56 = vpop.f32.mrb[1].mxu1  ;;  %v662_v58 = vadd.f32 %v661_v54, %v577_v53 }
 0x229   : > { %v665_v57 = vpop.f32.mrb[2].mxu1  ;;  %v664_v61 = vadd.f32 %v663_v56, %v581_v55  ;;  %v1764_v56 = vld [vmem:[%s2474_s8 + $0x30] sm:$0xff] }
 0x22a   : > { %v666_v59 = vadd.f32 %v665_v57, %v577_v53  ;;  %v667_v60 = vpop.f32.mrb[3].mxu1 }
 0x22b   : > { %v668_v62 = vadd.f32 %v667_v60, %v581_v55  ;;  %v1765_v60 = vld [vmem:[%s2474_s8 + $0x38] sm:$0xff] }
 0x22c   : > { %v670_v63 = vpack.c.bf16 %v666_v59, %v662_v58 }
 0x22d   : > { %v2224_v0 = vpack.c.bf16 %v668_v62, %v664_v61 }
 0x22e   : > { %673 = vrot.lane.b32.xlu1 %v670_v63, %s2052_s27 }
 0x232   : > { %798 = vrot.lane.b32.xlu1 %v670_v63, %s2053_s28 }
 0x236   : > { %796 = vrot.lane.b32.xlu1 %v670_v63, %s2054_s29 }
 0x23a   : > { %927 = vrot.lane.b32.xlu1 %v670_v63, %s2055_s30 }
 0x23e   : > { %925 = vrot.lane.b32.xlu1 %v670_v63, %s2056_s16 }
 0x242   : > { %1055 = vrot.lane.b32.xlu1 %v670_v63, %s2057_s17 }
 0x246   : > { %1053 = vrot.lane.b32.xlu1 %v670_v63, %s2058_s19 }
 0x2a0   : > { %v674_v3 = vpop.permute.xlu1 %673 }
 0x2a1   : > { %v680_v4 = vsel %vm675_vm2, %v674_v3, 0 }
 0x2a2   : > { %1855 = vmatpush3.bf16.xpose.msra.mxu1 %v680_v4 }
 0x2a3   : > { %1860 = vmatprep.subr.bf16.mxu1 %v2050_v49 }
 0x2a4   : > { %v799_v5 = vpop.permute.xlu1 %798 }
 0x2a5   : > { %v804_v7 = vsel %vm675_vm2, %v799_v5, 0 }
 0x2a6   : > { %1867 = vmatpush3.bf16.xpose.msra.mxu0 %v804_v7 }
 0x2a7   : > { %1878 = vmatprep.subr.bf16.mxu0 %v2050_v49 }
 0x2a8   : > { %v797_v8 = vpop.permute.xlu1 %796 }
 0x2a9   : > { %1857 = vmatmul.mubr.msk.bf16.vlgmr.msra.gmra.mrb[4].mxu1 %vm675_vm2, %v670_v63 }
 0x2aa   : > { %1861 = vmatpush3.bf16.msra.mxu1 %v2224_v0  ;;  %1862 = vmatprep.mubr.msk.bf16.mxu1 %vm2051_vm1, %v2050_v49 }
 0x2ab   : > { %1872 = vmatprep.subr.bf16.mxu1 %v2050_v49 }
 0x2ac   : > { %v928_v9 = vpop.permute.xlu1 %927 }
 0x2ad   : > { %v933_v10 = vsel %vm675_vm2, %v928_v9, 0  ;;  %1869 = vmatmul.mubr.msk.bf16.vlgmr.msra.gmra.mrb[0].mxu0 %vm675_vm2, %v797_v8 }
 0x2ae   : > { %1879 = vmatpush3.bf16.xpose.msra.mxu0 %v933_v10  ;;  %1880 = vmatprep.mubr.msk.bf16.mxu0 %vm2051_vm1, %v2050_v49 }
 0x2af   : > { %1890 = vmatprep.subr.bf16.mxu0 %v2050_v49 }
 0x2b0   : > { %v926_v11 = vpop.permute.xlu1 %925 }
 0x2b4   : > { %v1056_v12 = vpop.permute.xlu1 %1055 }
 0x2b5   : > { %v1061_v13 = vsel %vm675_vm2, %v1056_v12, 0  ;;  %1881 = vmatmul.mubr.msk.bf16.vlgmr.msra.gmra.mrb[4].mxu0 %vm675_vm2, %v926_v11 }
 0x2b6   : > { %1891 = vmatpush3.bf16.xpose.msra.mxu0 %v1061_v13  ;;  %1892 = vmatprep.mubr.msk.bf16.mxu0 %vm2051_vm1, %v2050_v49 }
 0x2b7   : > { %1902 = vmatprep.subr.bf16.mxu0 %v2050_v49 }
 0x2b8   : > { %v1054_v14 = vpop.permute.xlu1 %1053 }
 0x2bd   : > { %1893 = vmatmul.mubr.msk.bf16.vlgmr.msra.gmra.mrb[8].mxu0 %vm675_vm2, %v1054_v14 }
 0x2be   : > { %1910 = vmatprep.mubr.msk.bf16.mxu0 %vm2051_vm1, %v2050_v49 }
 0x37c   : > { %v716_v15 = vpop.f32.mrb[4].mxu1 }
 0x37d   : > { %v723_v17 = vmul.f32 0.25, %v716_v15  ;;  %v1858_v18 = vpop.f32.mrb[5].mxu1 }
 0x37e   : > { %v719_v19 = vpop.f32.mrb[6].mxu1 }
 0x37f   : > { %v724_v21 = vmul.f32 0.25, %v719_v19  ;;  %v1859_v22 = vpop.f32.mrb[7].mxu1  ;;  %v727_v23 = vadd.f32 %v725_v16, %v723_v17 }
 0x380   : > { %v840_v24 = vpop.f32.mrb[0].mxu0 }
 0x381   : > { %v847_v26 = vmul.f32 0.25, %v840_v24  ;;  %v1870_v27 = vpop.f32.mrb[1].mxu0  ;;  %v729_v28 = vsel %vm675_vm2, %v727_v23, -inf  ;;  %v728_v29 = vadd.f32 %v726_v20, %v724_v21 }
 0x382   : > { %730 = vmax.xlane.f32.xlu0 %v729_v28  ;;  %v843_v30 = vpop.f32.mrb[2].mxu0 }
 0x383   : > { %v848_v32 = vmul.f32 0.25, %v843_v30  ;;  %v1871_v33 = vpop.f32.mrb[3].mxu0  ;;  %v732_v34 = vsel %vm675_vm2, %v728_v29, -inf  ;;  %v2268_v35 = vadd.f32 %v1756_v25, %v847_v26 }
 0x384   : > { %733 = vmax.xlane.f32.xlu1 %v732_v34 }
 0x385   : > { %v854_v36 = vsel %vm675_vm2, %v2268_v35, -inf  ;;  %v853_v37 = vadd.f32 %v1757_v31, %v848_v32 }
 0x386   : > { %855 = vmax.xlane.f32.xlu0 %v854_v36 }
 0x387   : > { %v857_v42 = vsel %vm675_vm2, %v853_v37, -inf }
 0x388   : > { %v969_v38 = vpop.f32.mrb[4].mxu0 }
 0x389   : > { %v976_v40 = vmul.f32 0.25, %v969_v38  ;;  %v1882_v41 = vpop.f32.mrb[5].mxu0 }
 0x38a   : > { %858 = vmax.xlane.f32.xlu0 %v857_v42  ;;  %v972_v43 = vpop.f32.mrb[6].mxu0 }
 0x38b   : > { %v977_v45 = vmul.f32 0.25, %v972_v43  ;;  %v1883_v46 = vpop.f32.mrb[7].mxu0  ;;  %v2279_v47 = vadd.f32 %v1760_v39, %v976_v40 }
 0x38d   : > { %v983_v51 = vsel %vm675_vm2, %v2279_v47, -inf  ;;  %v982_v53 = vadd.f32 %v1761_v44, %v977_v45 }
 0x38e   : > { %984 = vmax.xlane.f32.xlu1 %v983_v51 }
 0x38f   : > { %v986_v54 = vsel %vm675_vm2, %v982_v53, -inf }
 0x390   : > { %987 = vmax.xlane.f32.xlu0 %v986_v54  ;;  %v1097_v55 = vpop.f32.mrb[8].mxu0 }
 0x391   : > { %v1104_v57 = vmul.f32 0.25, %v1097_v55  ;;  %v1894_v58 = vpop.f32.mrb[9].mxu0 }
 0x392   : > { %v1100_v59 = vpop.f32.mrb[10].mxu0 }
 0x393   : > { %v1105_v61 = vmul.f32 0.25, %v1100_v59  ;;  %v1895_v62 = vpop.f32.mrb[11].mxu0  ;;  %v1109_v63 = vadd.f32 %v1764_v56, %v1104_v57 }
 0x395   : > { %v1111_v3 = vsel %vm675_vm2, %v1109_v63, -inf  ;;  %v1110_v4 = vadd.f32 %v1765_v60, %v1105_v61 }
 0x396   : > { %1112 = vmax.xlane.f32.xlu1 %v1111_v3 }
 0x397   : > { %v1114_v5 = vsel %vm675_vm2, %v1110_v4, -inf }
 0x398   : > { %1115 = vmax.xlane.f32.xlu0 %v1114_v5 }
 0x40f   : > { %v731_v7 = vpop.xlane.xlu0 %730 }
 0x410   : > { %v735_v8 = vsub.f32 %v727_v23, %v731_v7 }
 0x411   : > { %v734_v9 = vpop.xlane.xlu1 %733 }
 0x412   : > { %v737_v10 = vmul.f32 1.442695, %v735_v8  ;;  %v736_v11 = vsub.f32 %v728_v29, %v734_v9 }
 0x413   : > { %v856_v12 = vpop.xlane.xlu0 %855 }
 0x414   : > { %1997 = vpow2.f32 %v737_v10  ;;  %v739_v13 = vmul.f32 1.442695, %v736_v11  ;;  %v860_v33 = vsub.f32 %v2268_v35, %v856_v12 }
 0x416   : > { %1999 = vpow2.f32 %v739_v13  ;;  %v862_v36 = vmul.f32 1.442695, %v860_v33 }
 0x417   : > { %v859_v14 = vpop.xlane.xlu0 %858 }
 0x418   : > { %v861_v15 = vsub.f32 %v853_v37, %v859_v14 }
 0x41a   : > { %v864_v16 = vmul.f32 1.442695, %v861_v15 }
 0x41b   : > { %v985_v34 = vpop.xlane.xlu1 %984 }
 0x41c   : > { %2001 = vpow2.f32 %v864_v16  ;;  %v989_v37 = vsub.f32 %v2279_v47, %v985_v34  ;;  %v1964_v34 = vld [vmem:[%s2472_s6 + $0x18] sm:$0xff]  }
 0x41d   : > { %v988_v17 = vpop.xlane.xlu0 %987 }
 0x41e   : > { %v1998_v18 = vpop.eup %1997  ;;  %v990_v19 = vsub.f32 %v982_v53, %v988_v17  ;;  %v991_v39 = vmul.f32 1.442695, %v989_v37 }
 0x41f   : > { %v741_v20 = vsel %vm675_vm2, %v1998_v18, 0.0 }
 0x420   : > { %v2000_v21 = vpop.eup %1999  ;;  %v993_v22 = vmul.f32 1.442695, %v990_v19  ;;  %742 = vadd.xlane.f32.xlu1 %v741_v20 }
 0x421   : > { %v744_v23 = vsel %vm675_vm2, %v2000_v21, 0.0 }
 0x422   : > { %2003 = vpow2.f32 %v993_v22  ;;  %745 = vadd.xlane.f32.xlu0 %v744_v23 }
 0x423   : > { %v1113_v38 = vpop.xlane.xlu1 %1112 }
 0x424   : > { %v1117_v40 = vsub.f32 %v1109_v63, %v1113_v38 }
 0x425   : > { %v1116_v24 = vpop.xlane.xlu0 %1115 }
 0x426   : > { %v2002_v25 = vpop.eup %2001  ;;  %v1118_v26 = vsub.f32 %v1110_v4, %v1116_v24  ;;  %v1119_v41 = vmul.f32 1.442695, %v1117_v40 }
 0x427   : > { %v869_v27 = vsel %vm675_vm2, %v2002_v25, 0.0 }
 0x428   : > { %v1121_v28 = vmul.f32 1.442695, %v1118_v26  ;;  %870 = vadd.xlane.f32.xlu0 %v869_v27 }
 0x42a   : > { %2005 = vpow2.f32 %v1121_v28  ;;  %v1962_v28 = vld [vmem:[%s2472_s6 + $0x8] sm:$0xff]  }
 0x42b   : > { %2007 = vpow2.f32 %v862_v36 }
 0x42c   : > { %v2295_v29 = vpop.eup %2003  ;;  %2009 = vpow2.f32 %v991_v39 }
 0x42d   : > { %v998_v30 = vsel %vm675_vm2, %v2295_v29, 0.0  ;;  %2011 = vpow2.f32 %v1119_v41 }
 0x42e   : > { %999 = vadd.xlane.f32.xlu0 %v998_v30 }
 0x431   : > { %878 = vrot.lane.b32.xlu1 %v2224_v0, %s2054_s29 }
 0x434   : > { %v2301_v31 = vpop.eup %2005 }
 0x435   : > { %v1126_v32 = vsel %vm675_vm2, %v2301_v31, 0.0  ;;  %v2008_v42 = vpop.eup %2007 }
 0x436   : > { %1127 = vadd.xlane.f32.xlu0 %v1126_v32  ;;  %v866_v43 = vsel %vm675_vm2, %v2008_v42, 0.0  ;;  %v2010_v44 = vpop.eup %2009 }
 0x437   : > { %v995_v35 = vsel %vm675_vm2, %v2010_v44, 0.0  ;;  %v2012_v45 = vpop.eup %2011 }
 0x438   : > { %v1123_v46 = vsel %vm675_vm2, %v2012_v45, 0.0 }
 0x44c   : > { %1006 = vrot.lane.b32.xlu0 %v2224_v0, %s2056_s16 }
 0x455   : > { %867 = vadd.xlane.f32.xlu1 %v866_v43 }
 0x459   : > { %996 = vadd.xlane.f32.xlu1 %v995_v35 }
 0x45d   : > { %1124 = vadd.xlane.f32.xlu1 %v1123_v46 }
 0x46e   : > { %1134 = vrot.lane.b32.xlu1 %v2224_v0, %s2058_s19 }
 0x4ad   : > { %v743_v47 = vpop.xlane.xlu1 %742 }
 0x4ae   : > { %2013 = vrcp.f32 %v743_v47 }
 0x4af   : > { %v746_v51 = vpop.xlane.xlu0 %745 }
 0x4b0   : > { %2015 = vrcp.f32 %v746_v51 }
 0x4b1   : > { %v879_v58 = vpop.permute.xlu1 %878 }
 0x4b5   : > { %v871_v59 = vpop.xlane.xlu0 %870 }
 0x4b6   : > { %2017 = vrcp.f32 %v871_v59 }
 0x4b8   : > { %v2014_v53 = vpop.eup %2013 }
 0x4b9   : > { %v748_v55 = vmul.f32 %v2014_v53, %v1998_v18 }
 0x4ba   : > { %v2016_v54 = vpop.eup %2015 }
 0x4bb   : > { %v750_v56 = vmul.f32 %v2016_v54, %v2000_v21  ;;  %v1000_v60 = vpop.xlane.xlu0 %999 }
 0x4bd   : > { %v751_v57 = vpack.c.bf16 %v750_v56, %v748_v55 }
 0x4bf   : > { %1863 = vmatmul.mubr.msk.bf16.vlgmr.msra.gmra.mrb[8].mxu1 %vm675_vm2, %v751_v57 }
 0x4c0   : > { %1873 = vmatpush3.bf16.msra.mxu1 %v879_v58  ;;  %1874 = vmatprep.mubr.msk.bf16.mxu1 %vm2051_vm1, %v2050_v49  ;;  %v2018_v62 = vpop.eup %2017 }
 0x4c1   : > { %1884 = vmatprep.subr.bf16.mxu1 %v2050_v49  ;;  %v875_v5 = vmul.f32 %v2018_v62, %v2002_v25  ;;  %v1961_v25 = vld [vmem:[%s2472_s6] sm:$0xff]  }
 0x4c2   : > { %1903 = vmatpush3.bf16.msra.mxu0 %v1961_v25  ;;  %v1971_v25 = vld [vmem:[%s2477_s11 + $0x20] ss:$8 sps:$4 sm:$0xff]  }
 0x4c3   : > { %v1128_v63 = vpop.xlane.xlu0 %1127  ;;  %1904 = vmatprep.subr.bf16.mxu0 %v2050_v49 }
 0x4c6   : > { %1905 = vmatpush3.bf16.msra.mxu0 %v1962_v28 }
 0x4c7   : > { %v1007_v10 = vpop.permute.xlu0 %1006  ;;  %1906 = vmatprep.subr.bf16.mxu0 %v2050_v49 }
 0x4e2   : > { %v868_v0 = vpop.xlane.xlu1 %867 }
 0x4e3   : > { %2019 = vrcp.f32 %v868_v0 }
 0x4e6   : > { %v997_v61 = vpop.xlane.xlu1 %996 }
 0x4e7   : > { %2021 = vrcp.f32 %v997_v61  ;;  %v1767_v61 = vld [vmem:[%s2473_s7] ss:$0 sm:$0xff] }
 0x4e8   : > { %2023 = vrcp.f32 %v1000_v60 }
 0x4ea   : > { %v1125_v3 = vpop.xlane.xlu1 %1124 }
 0x4eb   : > { %2025 = vrcp.f32 %v1125_v3 }
 0x4ec   : > { %2027 = vrcp.f32 %v1128_v63 }
 0x4ed   : > { %v2020_v4 = vpop.eup %2019 }
 0x4ee   : > { %v873_v7 = vmul.f32 %v2020_v4, %v2008_v42  ;;  %v1135_v16 = vpop.permute.xlu1 %1134 }
 0x4f0   : > { %v876_v8 = vpack.c.bf16 %v875_v5, %v873_v7 }
 0x4f1   : > { %v2022_v9 = vpop.eup %2021 }
 0x4f2   : > { %1875 = vmatmul.mubr.msk.bf16.vlgmr.msra.gmra.mrb[12].mxu1 %vm675_vm2, %v876_v8  ;;  %v2024_v11 = vpop.eup %2023  ;;  %v1002_v12 = vmul.f32 %v2022_v9, %v2010_v44 }
 0x4f3   : > { %1885 = vmatpush3.bf16.msra.mxu1 %v1007_v10  ;;  %1886 = vmatprep.mubr.msk.bf16.mxu1 %vm2051_vm1, %v2050_v49  ;;  %v1004_v13 = vmul.f32 %v2024_v11, %v2295_v29 }
 0x4f4   : > { %1896 = vmatprep.subr.bf16.mxu1 %v2050_v49 }
 0x4f5   : > { %v1005_v14 = vpack.c.bf16 %v1004_v13, %v1002_v12  ;;  %v2026_v15 = vpop.eup %2025 }
 0x4f6   : > { %v2028_v17 = vpop.eup %2027  ;;  %v1130_v18 = vmul.f32 %v2026_v15, %v2012_v45 }
 0x4f7   : > { %v1132_v19 = vmul.f32 %v2028_v17, %v2301_v31  ;;  %v1963_v31 = vld [vmem:[%s2472_s6 + $0x10] sm:$0xff]  }
 0x4f8   : > { %1907 = vmatpush3.bf16.msra.mxu0 %v1963_v31 }
 0x4f9   : > { %v1133_v20 = vpack.c.bf16 %v1132_v19, %v1130_v18  ;;  %1908 = vmatprep.subr.bf16.mxu0 %v2050_v49 }
 0x4fa   : > { %1887 = vmatmul.mubr.msk.bf16.vlgmr.msra.gmra.mrb[16].mxu1 %vm675_vm2, %v1005_v14 }
 0x4fb   : > { %1897 = vmatpush3.bf16.msra.mxu1 %v1135_v16  ;;  %1898 = vmatprep.mubr.msk.bf16.mxu1 %vm2051_vm1, %v2050_v49 }
 0x4fc   : > { %1909 = vmatpush3.bf16.msra.mxu0 %v1964_v34 }
 0x502   : > { %1899 = vmatmul.mubr.msk.bf16.vlgmr.msra.gmra.mrb[20].mxu1 %vm675_vm2, %v1133_v20  ;;  %v1967_v20 = vld [vmem:[%s2477_s11 + $0x4] ss:$8 sps:$4 sm:$0xff]  }
 0x503   : > { %1439 = vmatprep.mubr.bf16.mxu1 %v2049_v6  ;;  %1407 = vmatprep.subr.bf16.mxu1 %v1967_v20 }
 0x592   : > { %v789_v21 = vpop.f32.mrb[8].mxu1 }
 0x593   : > { %v1864_v22 = vpop.f32.mrb[9].mxu1 }
 0x594   : > { %v792_v23 = vpop.f32.mrb[10].mxu1  ;;  %v1970_v22 = vld [vmem:[%s2477_s11 + $0x14] ss:$8 sps:$4 sm:$0xff]  }
 0x595   : > { %v1865_v24 = vpop.f32.mrb[11].mxu1 }
 0x596   : > { %v1973_v24 = vld [vmem:[%s2477_s11 + $0x24] ss:$8 sps:$4 sm:$0xff]  }
 0x5c5   : > { %v918_v26 = vpop.f32.mrb[12].mxu1 }
 0x5c6   : > { %v1876_v27 = vpop.f32.mrb[13].mxu1 }
 0x5c7   : > { %v921_v29 = vpop.f32.mrb[14].mxu1  ;;  %v1976_v27 = vld [vmem:[%s2477_s11 + $0x34] ss:$8 sps:$4 sm:$0xff]  }
 0x5c8   : > { %v1934_v30 = vpack.i.bf16 %v921_v29, %v918_v26  ;;  %v1877_v6 = vpop.f32.mrb[15].mxu1  ;;  %v1974_v26 = vld [vmem:[%s2477_s11 + $0x30] ss:$8 sps:$4 sm:$0xff]  }
 0x5ca   : > { %1935 = vrot.lane.b32.xlu1 %v1934_v30, %s2057_s17 }
 0x5cd   : > { %v1046_v32 = vpop.f32.mrb[16].mxu1 }
 0x5ce   : > { %v1888_v33 = vpop.f32.mrb[17].mxu1 }
 0x5cf   : > { %v1049_v36 = vpop.f32.mrb[18].mxu1 }
 0x5d0   : > { %v1939_v37 = vpack.i.bf16 %v1049_v36, %v1046_v32  ;;  %v1889_v38 = vpop.f32.mrb[19].mxu1  ;;  %v1773_v36 = vld [vmem:[%s2475_s9] ss:$0 sm:$0xff] }
 0x5d2   : > { %1940 = vrot.lane.b32.xlu0 %v1939_v37, %s2055_s30 }
 0x5d5   : > { %v1174_v39 = vpop.f32.mrb[20].mxu1 }
 0x5d6   : > { %v1900_v40 = vpop.f32.mrb[21].mxu1 }
 0x5d7   : > { %v1177_v41 = vpop.f32.mrb[22].mxu1  ;;  %v1774_v40 = vld [vmem:[%s2476_s10] ss:$0 sm:$0xff] }
 0x5d8   : > { %v1944_v42 = vpack.i.bf16 %v1177_v41, %v1174_v39  ;;  %v1901_v43 = vpop.f32.mrb[23].mxu1 }
 0x5da   : > { %1945 = vrot.lane.b32.xlu1 %v1944_v42, %s2053_s28  ;;  %s496_s28 = scalar_lea.vmem %s2481_s15, %s1739_s21 }
 0x63c   : > { %v1936_v44 = vpop.permute.xlu1 %1935 }
 0x63d   : > { %v1938_v35 = vunpack.i.h.bf16 %v1936_v44  ;;  %v1937_v45 = vunpack.i.l.bf16 %v1936_v44 }
 0x63f   : > { %v1206_v53 = vsel %vm675_vm2, %v792_v23, %v1938_v35  ;;  %v1205_v54 = vsel %vm675_vm2, %v789_v21, %v1937_v45  ;;  %v1965_v21 = vld [vmem:[%s2477_s11] ss:$8 sps:$4 sm:$0xff]   ;;  %v1968_v23 = vld [vmem:[%s2477_s11 + $0x10] ss:$8 sps:$4 sm:$0xff]  }
 0x640   : > { %1408 = vmatpush1.bf16.msra.mxu1 %v1965_v21  ;;  %v1978_v35 = vld [vmem:[%s2479_s13] sm:$0xff]   ;;  %v1979_v45 = vld [vmem:[%s2479_s13 + $0x48] sm:$0xff]  }
 0x641   : > { %1409 = vmatprep.subr.bf16.mxu1 %v1970_v22 }
 0x644   : > { %v1941_v49 = vpop.permute.xlu0 %1940  ;;  %1410 = vmatpush1.bf16.msra.mxu1 %v1968_v23 }
 0x645   : > { %v1943_v46 = vunpack.i.h.bf16 %v1941_v49  ;;  %v1942_v47 = vunpack.i.l.bf16 %v1941_v49  ;;  %1411 = vmatprep.subr.bf16.mxu1 %v1973_v24  ;;  %v1977_v49 = vld [vmem:[%s2479_s13 + $0x40] sm:$0xff]  }
 0x646   : > { %1832 = vmatprep.subr.bf16.mxu0 %v1977_v49 }
 0x647   : > { %v1208_v57 = vsel %vm1207_vm3, %v1205_v54, %v1942_v47  ;;  %v1209_v58 = vsel %vm1207_vm3, %v1206_v53, %v1943_v46  ;;  %v1980_v46 = vld [vmem:[%s2479_s13 + $0x8] sm:$0xff]   ;;  %v1981_v47 = vld [vmem:[%s2479_s13 + $0x50] sm:$0xff]   ;;  %v1983_v53 = vld [vmem:[%s2479_s13 + $0x58] sm:$0xff]  }
 0x648   : > { %1412 = vmatpush1.bf16.msra.mxu1 %v1971_v25  ;;  %v1984_v54 = vld [vmem:[%s2479_s13 + $0x18] sm:$0xff]  }
 0x649   : > { %1413 = vmatprep.subr.bf16.mxu1 %v1976_v27 }
 0x64c   : > { %v1946_v51 = vpop.permute.xlu1 %1945  ;;  %1414 = vmatpush1.bf16.msra.mxu1 %v1974_v26 }
 0x64d   : > { %v1948_v55 = vunpack.i.h.bf16 %v1946_v51  ;;  %v1947_v56 = vunpack.i.l.bf16 %v1946_v51  ;;  %v1982_v51 = vld [vmem:[%s2479_s13 + $0x10] sm:$0xff]  }
 0x64f   : > { %v1211_v59 = vsel %vm1210_vm4, %v1208_v57, %v1947_v56  ;;  %v1212_v0 = vsel %vm1210_vm4, %v1209_v58, %v1948_v55  ;;  %v1985_v55 = vld [vmem:[%s2479_s13 + $0x60] sm:$0xff]   ;;  %v1987_v57 = vld [vmem:[%s2479_s13 + $0x68] sm:$0xff]  }
 0x650   : > { %v1213_v60 = vpack.c.bf16 %v1212_v0, %v1211_v59  ;;  %v1986_v56 = vld [vmem:[%s2479_s13 + $0x20] sm:$0xff]   ;;  %v1988_v58 = vld [vmem:[%s2479_s13 + $0x28] sm:$0xff]   ;;  %v1989_v59 = vld [vmem:[%s2479_s13 + $0x70] sm:$0xff]  }
 0x651   : > { %v1990_v0 = vld [vmem:[%s2479_s13 + $0x30] sm:$0xff]  }
 0x652   : > { %1911 = vmatmul.mubr.msk.bf16.vlgmr.msra.gmra.mrb[12].mxu0 %vm505_vm0, %v1213_v60  ;;  %v1991_v60 = vld [vmem:[%s2479_s13 + $0x78] sm:$0xff]  }
 0x653   : > { %1833 = vmatpush3.bf16.msra.mxu0 %v1978_v35 }
 0x654   : > { %1834 = vmatprep.subr.bf16.mxu0 %v1979_v45 }
 0x657   : > { %1835 = vmatpush3.bf16.msra.mxu0 %v1980_v46 }
 0x658   : > { %1836 = vmatprep.subr.bf16.mxu0 %v1981_v47  ;;  %v1784_v47 = vld [vmem:[%s2480_s14] ss:$0 sm:$0xff] }
 0x65b   : > { %1837 = vmatpush3.bf16.msra.mxu0 %v1982_v51 }
 0x65c   : > { %1838 = vmatprep.subr.bf16.mxu0 %v1983_v53 }
 0x65f   : > { %1839 = vmatpush3.bf16.msra.mxu0 %v1984_v54 }
 0x660   : > { %1840 = vmatprep.subr.bf16.mxu0 %v1985_v55 }
 0x663   : > { %1841 = vmatpush3.bf16.msra.mxu0 %v1986_v56 }
 0x664   : > { %1842 = vmatprep.subr.bf16.mxu0 %v1987_v57 }
 0x667   : > { %1843 = vmatpush3.bf16.msra.mxu0 %v1988_v58 }
 0x668   : > { %1844 = vmatprep.subr.bf16.mxu0 %v1989_v59 }
 0x66b   : > { %1845 = vmatpush3.bf16.msra.mxu0 %v1990_v0 }
 0x66c   : > { %1846 = vmatprep.subr.bf16.mxu0 %v1991_v60 }
 0x725   : > { %v1290_v62 = vpop.f32.mrb[12].mxu0 }
 0x726   : > { %v1291_v63 = vadd.f32 %v1767_v61, %v1290_v62  ;;  %v1912_v3 = vpop.f32.mrb[13].mxu0  ;;  %v1352_v62 = vld [vmem:[%s2478_s12] sm:$0x3] }
 0x727   : > { %v1293_v4 = vpop.f32.mrb[14].mxu0  ;;  %v1361_v3 = vrot.slane %v1352_v62, %v580_v52 }
 0x728   : > { %v2354_v5 = vadd.f32 %v2155_v1, %v1291_v63  ;;  %v1294_v7 = vadd.f32 %v1767_v61, %v1293_v4  ;;  %v1913_v8 = vpop.f32.mrb[15].mxu0  ;;  %v1992_v61 = vld [vmem:[%s2479_s13 + $0x38] sm:$0xff]   ;;  %v1357_v63 = vrot.slane %v1352_v62, %v576_v50 }
 0x729   : > { %1847 = vmatpush3.bf16.msra.mxu0 %v1992_v61 }
 0x72a   : > { %v2357_v9 = vadd.f32 %v2157_v2, %v1294_v7  ;;  %v1301_v10 = vsel %vm505_vm0, %v2354_v5, 0.0 }
 0x72b   : > { %1302 = vadd.xlane.f32.xlu0 %v1301_v10 }
 0x72c   : > { %v1304_v11 = vsel %vm505_vm0, %v2357_v9, 0.0 }
 0x72d   : > { %1305 = vadd.xlane.f32.xlu1 %v1304_v11 }
 0x7b8   : > { %v1303_v12 = vpop.xlane.xlu0 %1302 }
 0x7b9   : > { %v1307_v13 = vmul.f32 0.015625, %v1303_v12 }
 0x7ba   : > { %v1306_v14 = vpop.xlane.xlu1 %1305 }
 0x7bb   : > { %v1309_v15 = vsub.f32 %v2354_v5, %v1307_v13  ;;  %v1308_v1 = vmul.f32 0.015625, %v1306_v14 }
 0x7bd   : > { %v1310_v16 = vsub.f32 %v2357_v9, %v1308_v1  ;;  %v1311_v17 = vmul.f32 %v1309_v15, %v1309_v15 }
 0x7bf   : > { %v1313_v2 = vsel %vm505_vm0, %v1311_v17, 0.0  ;;  %v1312_v18 = vmul.f32 %v1310_v16, %v1310_v16 }
 0x7c0   : > { %1314 = vadd.xlane.f32.xlu0 %v1313_v2 }
 0x7c1   : > { %v1316_v19 = vsel %vm505_vm0, %v1312_v18, 0.0 }
 0x7c4   : > { %1317 = vadd.xlane.f32.xlu0 %v1316_v19 }
 0x84d   : > { %v1315_v28 = vpop.xlane.xlu0 %1314 }
 0x84e   : > { %v1319_v29 = vmul.f32 0.015625, %v1315_v28 }
 0x850   : > { %v1321_v30 = vadd.f32 1e-05, %v1319_v29 }
 0x851   : > { %v1318_v6 = vpop.xlane.xlu0 %1317 }
 0x852   : > { %2029 = vrsqrt.f32 %v1321_v30  ;;  %v1320_v31 = vmul.f32 0.015625, %v1318_v6 }
 0x854   : > { %v1322_v32 = vadd.f32 1e-05, %v1320_v31 }
 0x856   : > { %2031 = vrsqrt.f32 %v1322_v32 }
 0x85c   : > { %v2030_v33 = vpop.eup %2029 }
 0x85d   : > { %v1325_v34 = vmul.f32 %v2030_v33, %v1309_v15 }
 0x85f   : > { %v1333_v38 = vmul.f32 %v1773_v36, %v1325_v34 }
 0x860   : > { %v2032_v37 = vpop.eup %2031 }
 0x861   : > { %v1326_v39 = vmul.f32 %v2032_v37, %v1310_v16  ;;  %v1341_v42 = vadd.f32 %v1774_v40, %v1333_v38 }
 0x863   : > { %v1334_v41 = vmul.f32 %v1773_v36, %v1326_v39 }
 0x865   : > { %v1342_v43 = vadd.f32 %v1774_v40, %v1334_v41 }
 0x867   : > { %v1343_v44 = vpack.c.bf16 %v1342_v43, %v1341_v42 }
 0x869   : > { %1783 = vmatmul.mubr.msk.bf16.vlgmr.msra.gmra.mrb[24].mxu1 %vm505_vm0, %v1343_v44 }
 0x93c   : > { %v1441_v4 = vpop.f32.mrb[24].mxu1 }
 0x93d   : > { %v1442_v7 = vadd.f32 %v1441_v4, %v1357_v63  ;;  %v1443_v8 = vpop.f32.mrb[25].mxu1 }
 0x93e   : > { %v1444_v10 = vadd.f32 %v1443_v8, %v1361_v3  ;;  %v1445_v11 = vpop.f32.mrb[26].mxu1 }
 0x93f   : > { %v1454_v12 = vmul.f32 0.044715, %v1442_v7  ;;  %v1446_v13 = vadd.f32 %v1445_v11, %v1357_v63  ;;  %v1447_v14 = vpop.f32.mrb[27].mxu1  ;;  %v1450_v36 = vmul.f32 0.5, %v1442_v7 }
 0x940   : > { %v1455_v15 = vmul.f32 0.044715, %v1444_v10  ;;  %v1448_v1 = vadd.f32 %v1447_v14, %v1361_v3  ;;  %v1451_v39 = vmul.f32 0.5, %v1444_v10 }
 0x941   : > { %v1458_v16 = vmul.f32 %v1454_v12, %v1442_v7  ;;  %v1456_v17 = vmul.f32 0.044715, %v1446_v13  ;;  %v1452_v37 = vmul.f32 0.5, %v1446_v13 }
 0x942   : > { %v1459_v2 = vmul.f32 %v1455_v15, %v1444_v10  ;;  %v1457_v18 = vmul.f32 0.044715, %v1448_v1  ;;  %v1453_v40 = vmul.f32 0.5, %v1448_v1 }
 0x943   : > { %v1462_v19 = vmul.f32 %v1458_v16, %v1442_v7  ;;  %v1460_v20 = vmul.f32 %v1456_v17, %v1446_v13 }
 0x944   : > { %v1463_v50 = vmul.f32 %v1459_v2, %v1444_v10  ;;  %v1461_v21 = vmul.f32 %v1457_v18, %v1448_v1 }
 0x945   : > { %v1466_v48 = vadd.f32 %v1462_v19, %v1442_v7  ;;  %v1464_v52 = vmul.f32 %v1460_v20, %v1446_v13 }
 0x946   : > { %v1465_v22 = vmul.f32 %v1461_v21, %v1448_v1  ;;  %v1467_v23 = vadd.f32 %v1463_v50, %v1444_v10 }
 0x947   : > { %v1470_v24 = vmul.f32 0.7978846, %v1466_v48  ;;  %v1468_v25 = vadd.f32 %v1464_v52, %v1446_v13 }
 0x948   : > { %v1469_v26 = vadd.f32 %v1465_v22, %v1448_v1  ;;  %v1471_v27 = vmul.f32 0.7978846, %v1467_v23 }
 0x949   : > { %2033 = vtanh.f32 %v1470_v24  ;;  %v1472_v28 = vmul.f32 0.7978846, %v1468_v25 }
 0x94a   : > { %v1473_v29 = vmul.f32 0.7978846, %v1469_v26  ;;  %2035 = vtanh.f32 %v1471_v27 }
 0x94b   : > { %2037 = vtanh.f32 %v1472_v28 }
 0x94c   : > { %2039 = vtanh.f32 %v1473_v29 }
 0x953   : > { %v2034_v30 = vpop.eup %2033 }
 0x954   : > { %v2036_v6 = vpop.eup %2035  ;;  %v1478_v31 = vadd.f32 1.0, %v2034_v30 }
 0x955   : > { %v2038_v32 = vpop.eup %2037  ;;  %v1479_v33 = vadd.f32 1.0, %v2036_v6 }
 0x956   : > { %v2040_v34 = vpop.eup %2039  ;;  %v1480_v38 = vadd.f32 1.0, %v2038_v32  ;;  %v1482_v42 = vmul.f32 %v1478_v31, %v1450_v36 }
 0x957   : > { %v1481_v41 = vadd.f32 1.0, %v2040_v34  ;;  %v1483_v44 = vmul.f32 %v1479_v33, %v1451_v39 }
 0x958   : > { %v1484_v43 = vmul.f32 %v1480_v38, %v1452_v37 }
 0x959   : > { %v1485_v49 = vmul.f32 %v1481_v41, %v1453_v40 }
 0x95a   : > { %v1486_v35 = vpack.c.bf16 %v1484_v43, %v1482_v42 }
 0x95b   : > { %v1487_v45 = vpack.c.bf16 %v1485_v49, %v1483_v44 }
 0x95d   : > { %1655 = vmatprep.mubr.bf16.mxu0 %v1487_v45 }
 0x95e   : > { %1656 = vmatmul.mubr.bf16.vlgmr.msra.gmra.mrb[16].mxu0 %v1486_v35 }
 0xa31   : > { %v1848_v46 = vpop.f32.mrb[16].mxu0 }
 0xa32   : > { %v1849_v51 = vpop.f32.mrb[17].mxu0 }
 0xa33   : > { %v1850_v53 = vadd.f32 %v1849_v51, %v1848_v46  ;;  %v1851_v54 = vpop.f32.mrb[18].mxu0 }
 0xa34   : > { %v1852_v55 = vpop.f32.mrb[19].mxu0 }
 0xa35   : > { %v1658_v56 = vadd.f32 %v1850_v53, %v1784_v47  ;;  %v1853_v57 = vadd.f32 %v1852_v55, %v1851_v54 }
 0xa37   : > { %v1664_v58 = vadd.f32 %v1658_v56, %v2354_v5  ;;  %v1661_v59 = vadd.f32 %v1853_v57, %v1784_v47 }
 0xa39   : > { %v1805_v0 = vpack.c.bf16 %v1664_v58, %v1664_v58  ;;  %v1665_v60 = vadd.f32 %v1661_v59, %v2357_v9 }
 0xa3b   : > { %1675 = vst.msk [vmem:[%s496_s28] sm:$0xf] %vm1674_vm5, %v1805_v0  ;;  %v1806_v61 = vpack.c.bf16 %v1665_v60, %v1665_v60 }
 0xa3d   : > { %1676 = vst.msk [vmem:[%s496_s28 + $0x4] sm:$0xf] %vm1674_vm5, %v1806_v61 }
 0xa3e PF: > { %s25_s18 = sadd.s32 1, %s2047_s18  }
 0xa3f   : > { %p22_p4 = scmp.ge.s32.totalorder %s25_s18, 4  }
 0xa41   :  { %24 = sbr.rel (!%p22_p4) target bundleno = 1 (0x1), region = 113 }

</bundles_post_ra>
